<compile_context>
chip_gen: v5e
topology: v5e:2x2
jax: 0.10.0
libtpu: 0.0.40
codegen_flags: <defaults>
</compile_context>

<pallas_src>
import functools

import jax
import jax.numpy as jnp
from jax.experimental import pallas as pl
from jax.experimental.pallas import tpu as pltpu


# MXU input precision: bf16 inputs, f32 accumulation. One-hots are exact in
# bf16; flip to jnp.float32 for bit-closer numerics vs the PyTorch reference.
_MXU_DTYPE = jnp.bfloat16


def _mxu_dot(a, b):
    return jnp.dot(a.astype(_MXU_DTYPE), b.astype(_MXU_DTYPE),
                   preferred_element_type=jnp.float32)


# ------------------------------ fused kernel --------------------------------

def _fused_pdn_kernel(
    # all inputs are whole-array VMEM-resident (no grid)
    x_ref,       # [N, F]      node features (f32)
    ea_ref,      # [E, Fe]     edge features (bf16)
    sdt_ref,     # [N, E]      one-hot destination (bf16)
    ss_ref,      # [E, N]      one-hot source (bf16)
    noself_ref,  # [N, 1]      1.0 for nodes WITHOUT a pre-existing self loop
    pool_ref,    # [G, N]      global_add_pool one-hot (bf16)
    linw_ref,    # [C, K]
    linb_ref,    # [1, K]
    w0_ref,      # [F, C]      conv1 node weight (bf16)
    whid_ref,    # [T-1, C, C] hidden node weights (bf16)
    bstk_ref,    # [T, 1, C]   node biases (conv1 at index 0)
    ew1_ref,     # [T, Fe, H]  edge-MLP first linear weights
    eb1_ref,     # [T, 1, H]
    ew2_ref,     # [T, 1, H]   edge-MLP second linear weights (row vectors)
    eb2_ref,     # [T, 1, 1]
    o_ref,       # [G, K]
    *, n_hidden_layers, inv_n):
  L = n_hidden_layers

  # loop-invariant structure, loaded once (stays in vregs / VMEM temps)
  ea = ea_ref[...]
  sdt = sdt_ref[...]
  ss = ss_ref[...]
  noself = noself_ref[...]

  def pdn_layer(xh, w_node, b_node, ew1_l, eb1_l, ew2_l, eb2_l):
    # per-edge weight: sigmoid(Linear(ReLU(Linear(edge_attr)))) -> [E, 1]
    h = jnp.maximum(_mxu_dot(ea, ew1_l) + eb1_l, 0.0)             # [E, H]
    logit = jnp.sum(h * ew2_l, axis=1, keepdims=True) + eb2_l     # [E, 1]
    w_e = jax.nn.sigmoid(logit)                                   # [E, 1]
    # node transform (PDNConv lin has no bias)
    z = _mxu_dot(xh, w_node)                                      # [N, C]
    # gcn_norm aggregation WITHOUT materializing the [N, N] adjacency:
    #   deg[d] = sum_{e: dst_e=d} w_e   (+1 for an added self loop)
    #   agg[d] = sum_{e: dst_e=d} w_e * (D^-1/2 z)[src_e]
    deg = _mxu_dot(sdt, w_e) + noself                             # [N, 1]
    dis = jnp.where(deg > 0.0,
                    jax.lax.rsqrt(jnp.maximum(deg, 1e-12)), 0.0)  # [N, 1]
    y = dis * z                                                   # [N, C]
    agg = _mxu_dot(sdt, w_e * _mxu_dot(ss, y))                    # [N, C]
    # added self loop (weight 1) contributes dis*dis*z = dis * (noself * y)
    return dis * (agg + noself * y) + b_node                      # [N, C]

  # ---- conv1 (no pre-BN / ReLU) ---------------------------------------------
  x0 = pdn_layer(x_ref[...], w0_ref[...], bstk_ref[0],
                 ew1_ref[0], eb1_ref[0], ew2_ref[0], eb2_ref[0])

  # ---- 6 blocks x L hidden layers; dense-add skip kept as a running sum ----
  def body(i, carry):
    x, ssum = carry
    # training-mode BatchNorm1d (gamma=1, beta=0, eps=1e-5, biased var) + ReLU
    mean = jnp.sum(x, axis=0, keepdims=True) * inv_n
    d = x - mean
    var = jnp.maximum(jnp.sum(d * d, axis=0, keepdims=True) * inv_n, 0.0)
    xh = jnp.maximum(d * jax.lax.rsqrt(var + 1e-5), 0.0)
    li = i + 1                          # overall layer index (conv1 == 0)
    conv = pdn_layer(xh, whid_ref[i], bstk_ref[li],
                     ew1_ref[li], eb1_ref[li], ew2_ref[li], eb2_ref[li])
    is_end = (li % L) == 0              # end of one of the 6 skip blocks
    xn = jnp.where(is_end, conv + ssum, conv)
    ssum = jnp.where(is_end, ssum + xn, ssum)
    return xn, ssum

  x_fin, _ = jax.lax.fori_loop(0, 6 * L, body, (x0, x0), unroll=True)

  # ---- epilogue: ReLU -> global_add_pool -> Linear head ---------------------
  # TODO(synk): F.dropout is a no-op here (p=0.0 / eval path); stochastic
  # dropout via pltpu.prng_* not emitted.
  x6 = jnp.maximum(x_fin, 0.0)
  pooled = _mxu_dot(pool_ref[...], x6)                            # [G, C]
  o_ref[...] = (_mxu_dot(pooled, linw_ref[...])
                + linb_ref[...]).astype(o_ref.dtype)              # [G, K]


# ------------------------------ call wrapper --------------------------------

def fused_forward_call(x, ea, sdt, ss, noself, pool, lin_w, lin_b,
                       w0, whid, bstk, ew1, eb1, ew2, eb2,
                       *, n_hidden_layers, n_nodes, n_graphs, n_classes):
    kern = functools.partial(_fused_pdn_kernel,
                             n_hidden_layers=n_hidden_layers,
                             inv_n=1.0 / float(n_nodes))
    vmem = pl.BlockSpec(memory_space=pltpu.MemorySpace.VMEM)
    args = (x, ea, sdt, ss, noself, pool, lin_w, lin_b,
            w0, whid, bstk, ew1, eb1, ew2, eb2)
    return pl.pallas_call(
        kern,
        out_shape=jax.ShapeDtypeStruct((n_graphs, n_classes), jnp.float32),
        in_specs=[vmem] * len(args),
        out_specs=vmem,
    )(*args)


# ------------------------------- JAX glue ------------------------------------

@functools.partial(jax.jit, static_argnames=("n_hidden_layers",))
def forward(params, x, edge_index, edge_attr, P, *, n_hidden_layers,
            dropout_p=0.0):
    assert n_hidden_layers >= 1
    del dropout_p  # no-op (p=0.0); see TODO in kernel epilogue
    N = x.shape[0]
    G = P.shape[0]

    conv1 = params["conv1"]
    C = conv1["W"].shape[1]
    K = params["lin_W"].shape[1]
    H = conv1["mw1"].shape[1]

    # layer order: conv1, then block1[0..L-1], ..., block6[0..L-1]
    layers = [conv1]
    for blk in params["hidden"]:
        layers.extend(blk)

    # stacked, VMEM-resident parameters (bf16 only where they feed the MXU)
    w0 = conv1["W"].astype(jnp.bfloat16)                                  # [F, C]
    whid = jnp.stack([p["W"] for p in layers[1:]]).astype(jnp.bfloat16)   # [T-1,C,C]
    bstk = jnp.stack([p["b"].reshape(1, C) for p in layers])              # [T, 1, C]
    ew1 = jnp.stack([p["mw1"] for p in layers])                           # [T, Fe, H]
    eb1 = jnp.stack([p["mb1"].reshape(1, H) for p in layers])             # [T, 1, H]
    ew2 = jnp.stack([p["mw2"].reshape(1, H) for p in layers])             # [T, 1, H]
    eb2 = jnp.stack([p["mb2"].reshape(1, 1) for p in layers])             # [T, 1, 1]

    # graph structure as dense one-hots (vectorized comparisons, no scatter);
    # bf16 is exact for 0/1 values and halves their VMEM / DMA footprint.
    src, dst = edge_index[0], edge_index[1]
    iota_n = jnp.arange(N, dtype=src.dtype)
    sdt = (iota_n[:, None] == dst[None, :]).astype(jnp.bfloat16)          # [N, E]
    ss = (src[:, None] == iota_n[None, :]).astype(jnp.bfloat16)           # [E, N]
    # add_remaining_self_loops(fill=1): existing self loops flow through the
    # edge list with their sigmoid weights; weight-1 loops are added only for
    # nodes without one.  (Nodes with multiple pre-existing self loops have
    # their weights summed — negligible deviation.)
    self_edge = src == dst
    has_self = jnp.any((iota_n[:, None] == dst[None, :]) & self_edge[None, :],
                       axis=1)
    noself = (1.0 - has_self.astype(jnp.float32))[:, None]                # [N, 1]

    return fused_forward_call(
        x.astype(jnp.float32), edge_attr.astype(jnp.bfloat16),
        sdt, ss, noself, P.astype(jnp.bfloat16),
        params["lin_W"], params["lin_b"],
        w0, whid, bstk, ew1, eb1, ew2, eb2,
        n_hidden_layers=n_hidden_layers, n_nodes=N,
        n_graphs=G, n_classes=K)


# ----------------------------- parameter init --------------------------------

def init_pdnconv(key, cin, cout, fe, he):
    ks = jax.random.split(key, 6)
    return {
        "W":   jax.random.normal(ks[0], (cin, cout), jnp.float32) * 0.2,
        "b":   jax.random.normal(ks[1], (1, cout), jnp.float32) * 0.05,
        "mw1": jax.random.normal(ks[2], (fe, he), jnp.float32) * 0.3,
        "mb1": jax.random.normal(ks[3], (he,), jnp.float32) * 0.05,
        "mw2": jax.random.normal(ks[4], (he,), jnp.float32) * 0.3,
        "mb2": jax.random.normal(ks[5], (1,), jnp.float32) * 0.05,
    }


def init_params(key, num_node_features, out_channels, num_edge_features,
                n_hidden_layers, num_classes):
    k_conv1, k_hidden, k_lin = jax.random.split(key, 3)
    hidden = []
    hk = jax.random.split(k_hidden, 6 * max(n_hidden_layers, 1))
    idx = 0
    for _ in range(6):
        block = []
        for _ in range(n_hidden_layers):
            block.append(init_pdnconv(hk[idx], out_channels, out_channels,
                                      num_edge_features, num_edge_features))
            idx += 1
        hidden.append(block)
    kl1, kl2 = jax.random.split(k_lin)
    return {
        "conv1": init_pdnconv(k_conv1, num_node_features, out_channels,
                              num_edge_features, num_edge_features),
        "hidden": hidden,
        "lin_W": jax.random.normal(kl1, (out_channels, num_classes),
                                   jnp.float32) * 0.2,
        "lin_b": jax.random.normal(kl2, (1, num_classes), jnp.float32) * 0.05,
    }


# ---------------------------------- main --------------------------------------

if __name__ == "__main__":
    num_node_features = 8
    num_edge_features = 8
    out_channels = 32
    n_hidden_layers = 1
    num_classes = 4
    nodes_per_graph = 16
    num_graphs = 2
    N = nodes_per_graph * num_graphs

    key = jax.random.PRNGKey(0)
    k_param, k_x, k_e = jax.random.split(key, 3)

    params = init_params(k_param, num_node_features, out_channels,
                         num_edge_features, n_hidden_layers, num_classes)

    x = jax.random.normal(k_x, (N, num_node_features), jnp.float32)

    # two disjoint ring graphs (bidirectional edges, no self loops)
    src, dst = [], []
    for g in range(num_graphs):
        off = g * nodes_per_graph
        for v in range(nodes_per_graph):
            u = off + v
            w = off + (v + 1) % nodes_per_graph
            src += [u, w]
            dst += [w, u]
    edge_index = jnp.array([src, dst], dtype=jnp.int32)     # [2, E]
    E = edge_index.shape[1]
    edge_attr = jax.random.normal(k_e, (E, num_edge_features), jnp.float32)

    # batch vector -> one-hot pooling matrix [G, N]
    batch = jnp.repeat(jnp.arange(num_graphs, dtype=jnp.int32),
                       nodes_per_graph)
    P = (batch[None, :] == jnp.arange(num_graphs, dtype=jnp.int32)[:, None]
         ).astype(jnp.float32)

    out = forward(params, x, edge_index, edge_attr, P,
                  n_hidden_layers=n_hidden_layers)
    out = jax.block_until_ready(out)

    assert out.shape == (num_graphs, num_classes)
    assert bool(jnp.all(jnp.isfinite(out)))
    print("KERNEL_OK")
</pallas_src>

<mosaic_0001>
module attributes {stable_mosaic.version = 11 : i64} {
  func.func @_fused_pdn_kernel(%arg0: memref<32x8xf32, #tpu.memory_space<vmem>>, %arg1: memref<64x8xbf16, #tpu.memory_space<vmem>>, %arg2: memref<32x64xbf16, #tpu.memory_space<vmem>>, %arg3: memref<64x32xbf16, #tpu.memory_space<vmem>>, %arg4: memref<32x1xf32, #tpu.memory_space<vmem>>, %arg5: memref<2x32xbf16, #tpu.memory_space<vmem>>, %arg6: memref<32x4xf32, #tpu.memory_space<vmem>>, %arg7: memref<1x4xf32, #tpu.memory_space<vmem>>, %arg8: memref<8x32xbf16, #tpu.memory_space<vmem>>, %arg9: memref<6x32x32xbf16, #tpu.memory_space<vmem>>, %arg10: memref<7x1x32xf32, #tpu.memory_space<vmem>>, %arg11: memref<7x8x8xf32, #tpu.memory_space<vmem>>, %arg12: memref<7x1x8xf32, #tpu.memory_space<vmem>>, %arg13: memref<7x1x8xf32, #tpu.memory_space<vmem>>, %arg14: memref<7x1x1xf32, #tpu.memory_space<vmem>>, %arg15: memref<2x4xf32, #tpu.memory_space<vmem>>) attributes {dimension_semantics = [], scalar_prefetch = 0 : i64, scratch_operands = 0 : i64, tpu.core_type = #tpu.core_type<tc>} {
    %c0 = arith.constant 0 : index
    %c0_0 = arith.constant 0 : index
    %0 = vector.load %arg1[%c0, %c0_0] : memref<64x8xbf16, #tpu.memory_space<vmem>>, vector<64x8xbf16>
    %c0_1 = arith.constant 0 : index
    %c0_2 = arith.constant 0 : index
    %1 = vector.load %arg2[%c0_1, %c0_2] : memref<32x64xbf16, #tpu.memory_space<vmem>>, vector<32x64xbf16>
    %c0_3 = arith.constant 0 : index
    %c0_4 = arith.constant 0 : index
    %2 = vector.load %arg3[%c0_3, %c0_4] : memref<64x32xbf16, #tpu.memory_space<vmem>>, vector<64x32xbf16>
    %c0_5 = arith.constant 0 : index
    %c0_6 = arith.constant 0 : index
    %3 = vector.load %arg4[%c0_5, %c0_6] : memref<32x1xf32, #tpu.memory_space<vmem>>, vector<32x1xf32>
    %c0_7 = arith.constant 0 : index
    %c0_8 = arith.constant 0 : index
    %4 = vector.load %arg0[%c0_7, %c0_8] : memref<32x8xf32, #tpu.memory_space<vmem>>, vector<32x8xf32>
    %c0_9 = arith.constant 0 : index
    %c0_10 = arith.constant 0 : index
    %5 = vector.load %arg8[%c0_9, %c0_10] : memref<8x32xbf16, #tpu.memory_space<vmem>>, vector<8x32xbf16>
    %c0_11 = arith.constant 0 : index
    %c0_12 = arith.constant 0 : index
    %c0_13 = arith.constant 0 : index
    %6 = vector.load %arg10[%c0_11, %c0_12, %c0_13] : memref<7x1x32xf32, #tpu.memory_space<vmem>>, vector<1x1x32xf32>
    %7 = vector.shape_cast %6 : vector<1x1x32xf32> to vector<1x32xf32>
    %c0_14 = arith.constant 0 : index
    %c0_15 = arith.constant 0 : index
    %c0_16 = arith.constant 0 : index
    %8 = vector.load %arg11[%c0_14, %c0_15, %c0_16] : memref<7x8x8xf32, #tpu.memory_space<vmem>>, vector<1x8x8xf32>
    %9 = vector.shape_cast %8 : vector<1x8x8xf32> to vector<8x8xf32>
    %c0_17 = arith.constant 0 : index
    %c0_18 = arith.constant 0 : index
    %c0_19 = arith.constant 0 : index
    %10 = vector.load %arg12[%c0_17, %c0_18, %c0_19] : memref<7x1x8xf32, #tpu.memory_space<vmem>>, vector<1x1x8xf32>
    %11 = vector.shape_cast %10 : vector<1x1x8xf32> to vector<1x8xf32>
    %c0_20 = arith.constant 0 : index
    %c0_21 = arith.constant 0 : index
    %c0_22 = arith.constant 0 : index
    %12 = vector.load %arg13[%c0_20, %c0_21, %c0_22] : memref<7x1x8xf32, #tpu.memory_space<vmem>>, vector<1x1x8xf32>
    %13 = vector.shape_cast %12 : vector<1x1x8xf32> to vector<1x8xf32>
    %c0_23 = arith.constant 0 : index
    %c0_24 = arith.constant 0 : index
    %c0_25 = arith.constant 0 : index
    %14 = vector.load %arg14[%c0_23, %c0_24, %c0_25] : memref<7x1x1xf32, #tpu.memory_space<vmem>>, vector<1x1x1xf32>
    %15 = vector.shape_cast %14 : vector<1x1x1xf32> to vector<1x1xf32>
    %16 = arith.truncf %9 : vector<8x8xf32> to vector<8x8xbf16>
    %cst = arith.constant dense<0.000000e+00> : vector<64x8xf32>
    %17 = tpu.matmul %0, %16, %cst {dimension_numbers = #tpu.dot_dimension_numbers<[1], [0], [0], [1], [0, 0, 1, 1], [], []>} : vector<64x8xbf16>, vector<8x8xbf16>, vector<64x8xf32> -> vector<64x8xf32>
    %18 = vector.broadcast %11 : vector<1x8xf32> to vector<64x8xf32>
    %19 = arith.addf %17, %18 : vector<64x8xf32>
    %cst_26 = arith.constant 0.000000e+00 : f32
    %20 = vector.broadcast %cst_26 : f32 to vector<64x8xf32>
    %21 = arith.maximumf %19, %20 : vector<64x8xf32>
    %22 = vector.broadcast %13 : vector<1x8xf32> to vector<64x8xf32>
    %23 = arith.mulf %21, %22 : vector<64x8xf32>
    %cst_27 = arith.constant dense<0.000000e+00> : vector<64xf32>
    %24 = vector.multi_reduction <add>, %23, %cst_27 [1] : vector<64x8xf32> to vector<64xf32>
    %25 = vector.shape_cast %24 : vector<64xf32> to vector<64x1xf32>
    %26 = vector.broadcast %15 : vector<1x1xf32> to vector<64x1xf32>
    %27 = arith.addf %25, %26 : vector<64x1xf32>
    %28 = arith.negf %27 : vector<64x1xf32>
    %29 = math.exp %28 : vector<64x1xf32>
    %cst_28 = arith.constant 1.000000e+00 : f32
    %30 = vector.broadcast %cst_28 : f32 to vector<64x1xf32>
    %31 = arith.addf %30, %29 : vector<64x1xf32>
    %32 = arith.divf %30, %31 : vector<64x1xf32>
    %33 = arith.truncf %4 : vector<32x8xf32> to vector<32x8xbf16>
    %cst_29 = arith.constant dense<0.000000e+00> : vector<32x32xf32>
    %34 = tpu.matmul %33, %5, %cst_29 {dimension_numbers = #tpu.dot_dimension_numbers<[1], [0], [0], [1], [0, 0, 1, 1], [], []>} : vector<32x8xbf16>, vector<8x32xbf16>, vector<32x32xf32> -> vector<32x32xf32>
    %35 = arith.truncf %32 : vector<64x1xf32> to vector<64x1xbf16>
    %cst_30 = arith.constant dense<0.000000e+00> : vector<32x1xf32>
    %36 = tpu.matmul %1, %35, %cst_30 {dimension_numbers = #tpu.dot_dimension_numbers<[1], [0], [0], [1], [0, 0, 1, 1], [], []>} : vector<32x64xbf16>, vector<64x1xbf16>, vector<32x1xf32> -> vector<32x1xf32>
    %37 = arith.addf %36, %3 : vector<32x1xf32>
    %cst_31 = arith.constant 0.000000e+00 : f32
    %38 = vector.broadcast %cst_31 : f32 to vector<32x1xf32>
    %39 = arith.cmpf ogt, %37, %38 : vector<32x1xf32>
    %cst_32 = arith.constant 9.99999996E-13 : f32
    %40 = vector.broadcast %cst_32 : f32 to vector<32x1xf32>
    %41 = arith.maximumf %37, %40 : vector<32x1xf32>
    %42 = math.rsqrt %41 : vector<32x1xf32>
    %cst_33 = arith.constant 0.000000e+00 : f32
    %43 = vector.broadcast %cst_33 : f32 to vector<32x1xf32>
    %44 = arith.select %39, %42, %43 : vector<32x1xi1>, vector<32x1xf32>
    %45 = vector.broadcast %44 : vector<32x1xf32> to vector<32x32xf32>
    %46 = arith.mulf %45, %34 : vector<32x32xf32>
    %47 = arith.truncf %46 : vector<32x32xf32> to vector<32x32xbf16>
    %cst_34 = arith.constant dense<0.000000e+00> : vector<64x32xf32>
    %48 = tpu.matmul %2, %47, %cst_34 {dimension_numbers = #tpu.dot_dimension_numbers<[1], [0], [0], [1], [0, 0, 1, 1], [], []>} : vector<64x32xbf16>, vector<32x32xbf16>, vector<64x32xf32> -> vector<64x32xf32>
    %49 = vector.broadcast %32 : vector<64x1xf32> to vector<64x32xf32>
    %50 = arith.mulf %49, %48 : vector<64x32xf32>
    %51 = arith.truncf %50 : vector<64x32xf32> to vector<64x32xbf16>
    %cst_35 = arith.constant dense<0.000000e+00> : vector<32x32xf32>
    %52 = tpu.matmul %1, %51, %cst_35 {dimension_numbers = #tpu.dot_dimension_numbers<[1], [0], [0], [1], [0, 0, 1, 1], [], []>} : vector<32x64xbf16>, vector<64x32xbf16>, vector<32x32xf32> -> vector<32x32xf32>
    %53 = vector.broadcast %3 : vector<32x1xf32> to vector<32x32xf32>
    %54 = arith.mulf %53, %46 : vector<32x32xf32>
    %55 = arith.addf %52, %54 : vector<32x32xf32>
    %56 = vector.broadcast %44 : vector<32x1xf32> to vector<32x32xf32>
    %57 = arith.mulf %56, %55 : vector<32x32xf32>
    %58 = vector.broadcast %7 : vector<1x32xf32> to vector<32x32xf32>
    %59 = arith.addf %57, %58 : vector<32x32xf32>
    %c0_i32 = arith.constant 0 : i32
    %cst_36 = arith.constant dense<0.000000e+00> : vector<32xf32>
    %60 = vector.multi_reduction <add>, %59, %cst_36 [0] : vector<32x32xf32> to vector<32xf32>
    %61 = vector.shape_cast %60 : vector<32xf32> to vector<1x32xf32>
    %cst_37 = arith.constant 3.125000e-02 : f32
    %62 = vector.broadcast %cst_37 : f32 to vector<1x32xf32>
    %63 = arith.mulf %61, %62 : vector<1x32xf32>
    %64 = vector.broadcast %63 : vector<1x32xf32> to vector<32x32xf32>
    %65 = arith.subf %59, %64 : vector<32x32xf32>
    %66 = arith.mulf %65, %65 : vector<32x32xf32>
    %cst_38 = arith.constant dense<0.000000e+00> : vector<32xf32>
    %67 = vector.multi_reduction <add>, %66, %cst_38 [0] : vector<32x32xf32> to vector<32xf32>
    %68 = vector.shape_cast %67 : vector<32xf32> to vector<1x32xf32>
    %cst_39 = arith.constant 3.125000e-02 : f32
    %69 = vector.broadcast %cst_39 : f32 to vector<1x32xf32>
    %70 = arith.mulf %68, %69 : vector<1x32xf32>
    %cst_40 = arith.constant 0.000000e+00 : f32
    %71 = vector.broadcast %cst_40 : f32 to vector<1x32xf32>
    %72 = arith.maximumf %70, %71 : vector<1x32xf32>
    %cst_41 = arith.constant 9.99999974E-6 : f32
    %73 = vector.broadcast %cst_41 : f32 to vector<1x32xf32>
    %74 = arith.addf %72, %73 : vector<1x32xf32>
    %75 = math.rsqrt %74 : vector<1x32xf32>
    %76 = vector.broadcast %75 : vector<1x32xf32> to vector<32x32xf32>
    %77 = arith.mulf %65, %76 : vector<32x32xf32>
    %cst_42 = arith.constant 0.000000e+00 : f32
    %78 = vector.broadcast %cst_42 : f32 to vector<32x32xf32>
    %79 = arith.maximumf %77, %78 : vector<32x32xf32>
    %c1_i32 = arith.constant 1 : i32
    %80 = arith.addi %c0_i32, %c1_i32 : i32
    %81 = arith.index_cast %c0_i32 : i32 to index
    %c0_43 = arith.constant 0 : index
    %c0_44 = arith.constant 0 : index
    %82 = vector.load %arg9[%81, %c0_43, %c0_44] : memref<6x32x32xbf16, #tpu.memory_space<vmem>>, vector<1x32x32xbf16>
    %83 = vector.shape_cast %82 : vector<1x32x32xbf16> to vector<32x32xbf16>
    %84 = arith.index_cast %80 : i32 to index
    %c0_45 = arith.constant 0 : index
    %c0_46 = arith.constant 0 : index
    %85 = vector.load %arg10[%84, %c0_45, %c0_46] : memref<7x1x32xf32, #tpu.memory_space<vmem>>, vector<1x1x32xf32>
    %86 = vector.shape_cast %85 : vector<1x1x32xf32> to vector<1x32xf32>
    %87 = arith.index_cast %80 : i32 to index
    %c0_47 = arith.constant 0 : index
    %c0_48 = arith.constant 0 : index
    %88 = vector.load %arg11[%87, %c0_47, %c0_48] : memref<7x8x8xf32, #tpu.memory_space<vmem>>, vector<1x8x8xf32>
    %89 = vector.shape_cast %88 : vector<1x8x8xf32> to vector<8x8xf32>
    %90 = arith.index_cast %80 : i32 to index
    %c0_49 = arith.constant 0 : index
    %c0_50 = arith.constant 0 : index
    %91 = vector.load %arg12[%90, %c0_49, %c0_50] : memref<7x1x8xf32, #tpu.memory_space<vmem>>, vector<1x1x8xf32>
    %92 = vector.shape_cast %91 : vector<1x1x8xf32> to vector<1x8xf32>
    %93 = arith.index_cast %80 : i32 to index
    %c0_51 = arith.constant 0 : index
    %c0_52 = arith.constant 0 : index
    %94 = vector.load %arg13[%93, %c0_51, %c0_52] : memref<7x1x8xf32, #tpu.memory_space<vmem>>, vector<1x1x8xf32>
    %95 = vector.shape_cast %94 : vector<1x1x8xf32> to vector<1x8xf32>
    %96 = arith.index_cast %80 : i32 to index
    %c0_53 = arith.constant 0 : index
    %c0_54 = arith.constant 0 : index
    %97 = vector.load %arg14[%96, %c0_53, %c0_54] : memref<7x1x1xf32, #tpu.memory_space<vmem>>, vector<1x1x1xf32>
    %98 = vector.shape_cast %97 : vector<1x1x1xf32> to vector<1x1xf32>
    %99 = arith.truncf %89 : vector<8x8xf32> to vector<8x8xbf16>
    %cst_55 = arith.constant dense<0.000000e+00> : vector<64x8xf32>
    %100 = tpu.matmul %0, %99, %cst_55 {dimension_numbers = #tpu.dot_dimension_numbers<[1], [0], [0], [1], [0, 0, 1, 1], [], []>} : vector<64x8xbf16>, vector<8x8xbf16>, vector<64x8xf32> -> vector<64x8xf32>
    %101 = vector.broadcast %92 : vector<1x8xf32> to vector<64x8xf32>
    %102 = arith.addf %100, %101 : vector<64x8xf32>
    %cst_56 = arith.constant 0.000000e+00 : f32
    %103 = vector.broadcast %cst_56 : f32 to vector<64x8xf32>
    %104 = arith.maximumf %102, %103 : vector<64x8xf32>
    %105 = vector.broadcast %95 : vector<1x8xf32> to vector<64x8xf32>
    %106 = arith.mulf %104, %105 : vector<64x8xf32>
    %cst_57 = arith.constant dense<0.000000e+00> : vector<64xf32>
    %107 = vector.multi_reduction <add>, %106, %cst_57 [1] : vector<64x8xf32> to vector<64xf32>
    %108 = vector.shape_cast %107 : vector<64xf32> to vector<64x1xf32>
    %109 = vector.broadcast %98 : vector<1x1xf32> to vector<64x1xf32>
    %110 = arith.addf %108, %109 : vector<64x1xf32>
    %111 = arith.negf %110 : vector<64x1xf32>
    %112 = math.exp %111 : vector<64x1xf32>
    %cst_58 = arith.constant 1.000000e+00 : f32
    %113 = vector.broadcast %cst_58 : f32 to vector<64x1xf32>
    %114 = arith.addf %113, %112 : vector<64x1xf32>
    %115 = arith.divf %113, %114 : vector<64x1xf32>
    %116 = arith.truncf %79 : vector<32x32xf32> to vector<32x32xbf16>
    %cst_59 = arith.constant dense<0.000000e+00> : vector<32x32xf32>
    %117 = tpu.matmul %116, %83, %cst_59 {dimension_numbers = #tpu.dot_dimension_numbers<[1], [0], [0], [1], [0, 0, 1, 1], [], []>} : vector<32x32xbf16>, vector<32x32xbf16>, vector<32x32xf32> -> vector<32x32xf32>
    %118 = arith.truncf %115 : vector<64x1xf32> to vector<64x1xbf16>
    %cst_60 = arith.constant dense<0.000000e+00> : vector<32x1xf32>
    %119 = tpu.matmul %1, %118, %cst_60 {dimension_numbers = #tpu.dot_dimension_numbers<[1], [0], [0], [1], [0, 0, 1, 1], [], []>} : vector<32x64xbf16>, vector<64x1xbf16>, vector<32x1xf32> -> vector<32x1xf32>
    %120 = arith.addf %119, %3 : vector<32x1xf32>
    %cst_61 = arith.constant 0.000000e+00 : f32
    %121 = vector.broadcast %cst_61 : f32 to vector<32x1xf32>
    %122 = arith.cmpf ogt, %120, %121 : vector<32x1xf32>
    %cst_62 = arith.constant 9.99999996E-13 : f32
    %123 = vector.broadcast %cst_62 : f32 to vector<32x1xf32>
    %124 = arith.maximumf %120, %123 : vector<32x1xf32>
    %125 = math.rsqrt %124 : vector<32x1xf32>
    %cst_63 = arith.constant 0.000000e+00 : f32
    %126 = vector.broadcast %cst_63 : f32 to vector<32x1xf32>
    %127 = arith.select %122, %125, %126 : vector<32x1xi1>, vector<32x1xf32>
    %128 = vector.broadcast %127 : vector<32x1xf32> to vector<32x32xf32>
    %129 = arith.mulf %128, %117 : vector<32x32xf32>
    %130 = arith.truncf %129 : vector<32x32xf32> to vector<32x32xbf16>
    %cst_64 = arith.constant dense<0.000000e+00> : vector<64x32xf32>
    %131 = tpu.matmul %2, %130, %cst_64 {dimension_numbers = #tpu.dot_dimension_numbers<[1], [0], [0], [1], [0, 0, 1, 1], [], []>} : vector<64x32xbf16>, vector<32x32xbf16>, vector<64x32xf32> -> vector<64x32xf32>
    %132 = vector.broadcast %115 : vector<64x1xf32> to vector<64x32xf32>
    %133 = arith.mulf %132, %131 : vector<64x32xf32>
    %134 = arith.truncf %133 : vector<64x32xf32> to vector<64x32xbf16>
    %cst_65 = arith.constant dense<0.000000e+00> : vector<32x32xf32>
    %135 = tpu.matmul %1, %134, %cst_65 {dimension_numbers = #tpu.dot_dimension_numbers<[1], [0], [0], [1], [0, 0, 1, 1], [], []>} : vector<32x64xbf16>, vector<64x32xbf16>, vector<32x32xf32> -> vector<32x32xf32>
    %136 = vector.broadcast %3 : vector<32x1xf32> to vector<32x32xf32>
    %137 = arith.mulf %136, %129 : vector<32x32xf32>
    %138 = arith.addf %135, %137 : vector<32x32xf32>
    %139 = vector.broadcast %127 : vector<32x1xf32> to vector<32x32xf32>
    %140 = arith.mulf %139, %138 : vector<32x32xf32>
    %141 = vector.broadcast %86 : vector<1x32xf32> to vector<32x32xf32>
    %142 = arith.addf %140, %141 : vector<32x32xf32>
    %c1_i32_66 = arith.constant 1 : i32
    %c0_i32_67 = arith.constant 0 : i32
    %143 = arith.cmpi eq, %c1_i32_66, %c0_i32_67 : i32
    %c1_i32_68 = arith.constant 1 : i32
    %144 = arith.select %143, %c1_i32_68, %c1_i32_66 : i32
    %145 = arith.remsi %80, %144 : i32
    %c0_i32_69 = arith.constant 0 : i32
    %146 = arith.cmpi ne, %145, %c0_i32_69 : i32
    %c0_i32_70 = arith.constant 0 : i32
    %147 = arith.cmpi slt, %145, %c0_i32_70 : i32
    %c0_i32_71 = arith.constant 0 : i32
    %148 = arith.cmpi slt, %144, %c0_i32_71 : i32
    %149 = arith.xori %147, %148 : i1
    %150 = arith.andi %149, %146 : i1
    %151 = arith.addi %145, %144 : i32
    %152 = arith.select %150, %151, %145 : i32
    %c0_i32_72 = arith.constant 0 : i32
    %153 = arith.cmpi eq, %152, %c0_i32_72 : i32
    %154 = arith.addf %142, %59 : vector<32x32xf32>
    %155 = arith.select %153, %154, %142 : vector<32x32xf32>
    %156 = arith.addf %59, %155 : vector<32x32xf32>
    %157 = arith.select %153, %156, %59 : vector<32x32xf32>
    %c1_i32_73 = arith.constant 1 : i32
    %cst_74 = arith.constant dense<0.000000e+00> : vector<32xf32>
    %158 = vector.multi_reduction <add>, %155, %cst_74 [0] : vector<32x32xf32> to vector<32xf32>
    %159 = vector.shape_cast %158 : vector<32xf32> to vector<1x32xf32>
    %cst_75 = arith.constant 3.125000e-02 : f32
    %160 = vector.broadcast %cst_75 : f32 to vector<1x32xf32>
    %161 = arith.mulf %159, %160 : vector<1x32xf32>
    %162 = vector.broadcast %161 : vector<1x32xf32> to vector<32x32xf32>
    %163 = arith.subf %155, %162 : vector<32x32xf32>
    %164 = arith.mulf %163, %163 : vector<32x32xf32>
    %cst_76 = arith.constant dense<0.000000e+00> : vector<32xf32>
    %165 = vector.multi_reduction <add>, %164, %cst_76 [0] : vector<32x32xf32> to vector<32xf32>
    %166 = vector.shape_cast %165 : vector<32xf32> to vector<1x32xf32>
    %cst_77 = arith.constant 3.125000e-02 : f32
    %167 = vector.broadcast %cst_77 : f32 to vector<1x32xf32>
    %168 = arith.mulf %166, %167 : vector<1x32xf32>
    %cst_78 = arith.constant 0.000000e+00 : f32
    %169 = vector.broadcast %cst_78 : f32 to vector<1x32xf32>
    %170 = arith.maximumf %168, %169 : vector<1x32xf32>
    %cst_79 = arith.constant 9.99999974E-6 : f32
    %171 = vector.broadcast %cst_79 : f32 to vector<1x32xf32>
    %172 = arith.addf %170, %171 : vector<1x32xf32>
    %173 = math.rsqrt %172 : vector<1x32xf32>
    %174 = vector.broadcast %173 : vector<1x32xf32> to vector<32x32xf32>
    %175 = arith.mulf %163, %174 : vector<32x32xf32>
    %cst_80 = arith.constant 0.000000e+00 : f32
    %176 = vector.broadcast %cst_80 : f32 to vector<32x32xf32>
    %177 = arith.maximumf %175, %176 : vector<32x32xf32>
    %c1_i32_81 = arith.constant 1 : i32
    %178 = arith.addi %c1_i32_73, %c1_i32_81 : i32
    %179 = arith.index_cast %c1_i32_73 : i32 to index
    %c0_82 = arith.constant 0 : index
    %c0_83 = arith.constant 0 : index
    %180 = vector.load %arg9[%179, %c0_82, %c0_83] : memref<6x32x32xbf16, #tpu.memory_space<vmem>>, vector<1x32x32xbf16>
    %181 = vector.shape_cast %180 : vector<1x32x32xbf16> to vector<32x32xbf16>
    %182 = arith.index_cast %178 : i32 to index
    %c0_84 = arith.constant 0 : index
    %c0_85 = arith.constant 0 : index
    %183 = vector.load %arg10[%182, %c0_84, %c0_85] : memref<7x1x32xf32, #tpu.memory_space<vmem>>, vector<1x1x32xf32>
    %184 = vector.shape_cast %183 : vector<1x1x32xf32> to vector<1x32xf32>
    %185 = arith.index_cast %178 : i32 to index
    %c0_86 = arith.constant 0 : index
    %c0_87 = arith.constant 0 : index
    %186 = vector.load %arg11[%185, %c0_86, %c0_87] : memref<7x8x8xf32, #tpu.memory_space<vmem>>, vector<1x8x8xf32>
    %187 = vector.shape_cast %186 : vector<1x8x8xf32> to vector<8x8xf32>
    %188 = arith.index_cast %178 : i32 to index
    %c0_88 = arith.constant 0 : index
    %c0_89 = arith.constant 0 : index
    %189 = vector.load %arg12[%188, %c0_88, %c0_89] : memref<7x1x8xf32, #tpu.memory_space<vmem>>, vector<1x1x8xf32>
    %190 = vector.shape_cast %189 : vector<1x1x8xf32> to vector<1x8xf32>
    %191 = arith.index_cast %178 : i32 to index
    %c0_90 = arith.constant 0 : index
    %c0_91 = arith.constant 0 : index
    %192 = vector.load %arg13[%191, %c0_90, %c0_91] : memref<7x1x8xf32, #tpu.memory_space<vmem>>, vector<1x1x8xf32>
    %193 = vector.shape_cast %192 : vector<1x1x8xf32> to vector<1x8xf32>
    %194 = arith.index_cast %178 : i32 to index
    %c0_92 = arith.constant 0 : index
    %c0_93 = arith.constant 0 : index
    %195 = vector.load %arg14[%194, %c0_92, %c0_93] : memref<7x1x1xf32, #tpu.memory_space<vmem>>, vector<1x1x1xf32>
    %196 = vector.shape_cast %195 : vector<1x1x1xf32> to vector<1x1xf32>
    %197 = arith.truncf %187 : vector<8x8xf32> to vector<8x8xbf16>
    %cst_94 = arith.constant dense<0.000000e+00> : vector<64x8xf32>
    %198 = tpu.matmul %0, %197, %cst_94 {dimension_numbers = #tpu.dot_dimension_numbers<[1], [0], [0], [1], [0, 0, 1, 1], [], []>} : vector<64x8xbf16>, vector<8x8xbf16>, vector<64x8xf32> -> vector<64x8xf32>
    %199 = vector.broadcast %190 : vector<1x8xf32> to vector<64x8xf32>
    %200 = arith.addf %198, %199 : vector<64x8xf32>
    %cst_95 = arith.constant 0.000000e+00 : f32
    %201 = vector.broadcast %cst_95 : f32 to vector<64x8xf32>
    %202 = arith.maximumf %200, %201 : vector<64x8xf32>
    %203 = vector.broadcast %193 : vector<1x8xf32> to vector<64x8xf32>
    %204 = arith.mulf %202, %203 : vector<64x8xf32>
    %cst_96 = arith.constant dense<0.000000e+00> : vector<64xf32>
    %205 = vector.multi_reduction <add>, %204, %cst_96 [1] : vector<64x8xf32> to vector<64xf32>
    %206 = vector.shape_cast %205 : vector<64xf32> to vector<64x1xf32>
    %207 = vector.broadcast %196 : vector<1x1xf32> to vector<64x1xf32>
    %208 = arith.addf %206, %207 : vector<64x1xf32>
    %209 = arith.negf %208 : vector<64x1xf32>
    %210 = math.exp %209 : vector<64x1xf32>
    %cst_97 = arith.constant 1.000000e+00 : f32
    %211 = vector.broadcast %cst_97 : f32 to vector<64x1xf32>
    %212 = arith.addf %211, %210 : vector<64x1xf32>
    %213 = arith.divf %211, %212 : vector<64x1xf32>
    %214 = arith.truncf %177 : vector<32x32xf32> to vector<32x32xbf16>
    %cst_98 = arith.constant dense<0.000000e+00> : vector<32x32xf32>
    %215 = tpu.matmul %214, %181, %cst_98 {dimension_numbers = #tpu.dot_dimension_numbers<[1], [0], [0], [1], [0, 0, 1, 1], [], []>} : vector<32x32xbf16>, vector<32x32xbf16>, vector<32x32xf32> -> vector<32x32xf32>
    %216 = arith.truncf %213 : vector<64x1xf32> to vector<64x1xbf16>
    %cst_99 = arith.constant dense<0.000000e+00> : vector<32x1xf32>
    %217 = tpu.matmul %1, %216, %cst_99 {dimension_numbers = #tpu.dot_dimension_numbers<[1], [0], [0], [1], [0, 0, 1, 1], [], []>} : vector<32x64xbf16>, vector<64x1xbf16>, vector<32x1xf32> -> vector<32x1xf32>
    %218 = arith.addf %217, %3 : vector<32x1xf32>
    %cst_100 = arith.constant 0.000000e+00 : f32
    %219 = vector.broadcast %cst_100 : f32 to vector<32x1xf32>
    %220 = arith.cmpf ogt, %218, %219 : vector<32x1xf32>
    %cst_101 = arith.constant 9.99999996E-13 : f32
    %221 = vector.broadcast %cst_101 : f32 to vector<32x1xf32>
    %222 = arith.maximumf %218, %221 : vector<32x1xf32>
    %223 = math.rsqrt %222 : vector<32x1xf32>
    %cst_102 = arith.constant 0.000000e+00 : f32
    %224 = vector.broadcast %cst_102 : f32 to vector<32x1xf32>
    %225 = arith.select %220, %223, %224 : vector<32x1xi1>, vector<32x1xf32>
    %226 = vector.broadcast %225 : vector<32x1xf32> to vector<32x32xf32>
    %227 = arith.mulf %226, %215 : vector<32x32xf32>
    %228 = arith.truncf %227 : vector<32x32xf32> to vector<32x32xbf16>
    %cst_103 = arith.constant dense<0.000000e+00> : vector<64x32xf32>
    %229 = tpu.matmul %2, %228, %cst_103 {dimension_numbers = #tpu.dot_dimension_numbers<[1], [0], [0], [1], [0, 0, 1, 1], [], []>} : vector<64x32xbf16>, vector<32x32xbf16>, vector<64x32xf32> -> vector<64x32xf32>
    %230 = vector.broadcast %213 : vector<64x1xf32> to vector<64x32xf32>
    %231 = arith.mulf %230, %229 : vector<64x32xf32>
    %232 = arith.truncf %231 : vector<64x32xf32> to vector<64x32xbf16>
    %cst_104 = arith.constant dense<0.000000e+00> : vector<32x32xf32>
    %233 = tpu.matmul %1, %232, %cst_104 {dimension_numbers = #tpu.dot_dimension_numbers<[1], [0], [0], [1], [0, 0, 1, 1], [], []>} : vector<32x64xbf16>, vector<64x32xbf16>, vector<32x32xf32> -> vector<32x32xf32>
    %234 = vector.broadcast %3 : vector<32x1xf32> to vector<32x32xf32>
    %235 = arith.mulf %234, %227 : vector<32x32xf32>
    %236 = arith.addf %233, %235 : vector<32x32xf32>
    %237 = vector.broadcast %225 : vector<32x1xf32> to vector<32x32xf32>
    %238 = arith.mulf %237, %236 : vector<32x32xf32>
    %239 = vector.broadcast %184 : vector<1x32xf32> to vector<32x32xf32>
    %240 = arith.addf %238, %239 : vector<32x32xf32>
    %c1_i32_105 = arith.constant 1 : i32
    %c0_i32_106 = arith.constant 0 : i32
    %241 = arith.cmpi eq, %c1_i32_105, %c0_i32_106 : i32
    %c1_i32_107 = arith.constant 1 : i32
    %242 = arith.select %241, %c1_i32_107, %c1_i32_105 : i32
    %243 = arith.remsi %178, %242 : i32
    %c0_i32_108 = arith.constant 0 : i32
    %244 = arith.cmpi ne, %243, %c0_i32_108 : i32
    %c0_i32_109 = arith.constant 0 : i32
    %245 = arith.cmpi slt, %243, %c0_i32_109 : i32
    %c0_i32_110 = arith.constant 0 : i32
    %246 = arith.cmpi slt, %242, %c0_i32_110 : i32
    %247 = arith.xori %245, %246 : i1
    %248 = arith.andi %247, %244 : i1
    %249 = arith.addi %243, %242 : i32
    %250 = arith.select %248, %249, %243 : i32
    %c0_i32_111 = arith.constant 0 : i32
    %251 = arith.cmpi eq, %250, %c0_i32_111 : i32
    %252 = arith.addf %240, %157 : vector<32x32xf32>
    %253 = arith.select %251, %252, %240 : vector<32x32xf32>
    %254 = arith.addf %157, %253 : vector<32x32xf32>
    %255 = arith.select %251, %254, %157 : vector<32x32xf32>
    %c2_i32 = arith.constant 2 : i32
    %cst_112 = arith.constant dense<0.000000e+00> : vector<32xf32>
    %256 = vector.multi_reduction <add>, %253, %cst_112 [0] : vector<32x32xf32> to vector<32xf32>
    %257 = vector.shape_cast %256 : vector<32xf32> to vector<1x32xf32>
    %cst_113 = arith.constant 3.125000e-02 : f32
    %258 = vector.broadcast %cst_113 : f32 to vector<1x32xf32>
    %259 = arith.mulf %257, %258 : vector<1x32xf32>
    %260 = vector.broadcast %259 : vector<1x32xf32> to vector<32x32xf32>
    %261 = arith.subf %253, %260 : vector<32x32xf32>
    %262 = arith.mulf %261, %261 : vector<32x32xf32>
    %cst_114 = arith.constant dense<0.000000e+00> : vector<32xf32>
    %263 = vector.multi_reduction <add>, %262, %cst_114 [0] : vector<32x32xf32> to vector<32xf32>
    %264 = vector.shape_cast %263 : vector<32xf32> to vector<1x32xf32>
    %cst_115 = arith.constant 3.125000e-02 : f32
    %265 = vector.broadcast %cst_115 : f32 to vector<1x32xf32>
    %266 = arith.mulf %264, %265 : vector<1x32xf32>
    %cst_116 = arith.constant 0.000000e+00 : f32
    %267 = vector.broadcast %cst_116 : f32 to vector<1x32xf32>
    %268 = arith.maximumf %266, %267 : vector<1x32xf32>
    %cst_117 = arith.constant 9.99999974E-6 : f32
    %269 = vector.broadcast %cst_117 : f32 to vector<1x32xf32>
    %270 = arith.addf %268, %269 : vector<1x32xf32>
    %271 = math.rsqrt %270 : vector<1x32xf32>
    %272 = vector.broadcast %271 : vector<1x32xf32> to vector<32x32xf32>
    %273 = arith.mulf %261, %272 : vector<32x32xf32>
    %cst_118 = arith.constant 0.000000e+00 : f32
    %274 = vector.broadcast %cst_118 : f32 to vector<32x32xf32>
    %275 = arith.maximumf %273, %274 : vector<32x32xf32>
    %c1_i32_119 = arith.constant 1 : i32
    %276 = arith.addi %c2_i32, %c1_i32_119 : i32
    %277 = arith.index_cast %c2_i32 : i32 to index
    %c0_120 = arith.constant 0 : index
    %c0_121 = arith.constant 0 : index
    %278 = vector.load %arg9[%277, %c0_120, %c0_121] : memref<6x32x32xbf16, #tpu.memory_space<vmem>>, vector<1x32x32xbf16>
    %279 = vector.shape_cast %278 : vector<1x32x32xbf16> to vector<32x32xbf16>
    %280 = arith.index_cast %276 : i32 to index
    %c0_122 = arith.constant 0 : index
    %c0_123 = arith.constant 0 : index
    %281 = vector.load %arg10[%280, %c0_122, %c0_123] : memref<7x1x32xf32, #tpu.memory_space<vmem>>, vector<1x1x32xf32>
    %282 = vector.shape_cast %281 : vector<1x1x32xf32> to vector<1x32xf32>
    %283 = arith.index_cast %276 : i32 to index
    %c0_124 = arith.constant 0 : index
    %c0_125 = arith.constant 0 : index
    %284 = vector.load %arg11[%283, %c0_124, %c0_125] : memref<7x8x8xf32, #tpu.memory_space<vmem>>, vector<1x8x8xf32>
    %285 = vector.shape_cast %284 : vector<1x8x8xf32> to vector<8x8xf32>
    %286 = arith.index_cast %276 : i32 to index
    %c0_126 = arith.constant 0 : index
    %c0_127 = arith.constant 0 : index
    %287 = vector.load %arg12[%286, %c0_126, %c0_127] : memref<7x1x8xf32, #tpu.memory_space<vmem>>, vector<1x1x8xf32>
    %288 = vector.shape_cast %287 : vector<1x1x8xf32> to vector<1x8xf32>
    %289 = arith.index_cast %276 : i32 to index
    %c0_128 = arith.constant 0 : index
    %c0_129 = arith.constant 0 : index
    %290 = vector.load %arg13[%289, %c0_128, %c0_129] : memref<7x1x8xf32, #tpu.memory_space<vmem>>, vector<1x1x8xf32>
    %291 = vector.shape_cast %290 : vector<1x1x8xf32> to vector<1x8xf32>
    %292 = arith.index_cast %276 : i32 to index
    %c0_130 = arith.constant 0 : index
    %c0_131 = arith.constant 0 : index
    %293 = vector.load %arg14[%292, %c0_130, %c0_131] : memref<7x1x1xf32, #tpu.memory_space<vmem>>, vector<1x1x1xf32>
    %294 = vector.shape_cast %293 : vector<1x1x1xf32> to vector<1x1xf32>
    %295 = arith.truncf %285 : vector<8x8xf32> to vector<8x8xbf16>
    %cst_132 = arith.constant dense<0.000000e+00> : vector<64x8xf32>
    %296 = tpu.matmul %0, %295, %cst_132 {dimension_numbers = #tpu.dot_dimension_numbers<[1], [0], [0], [1], [0, 0, 1, 1], [], []>} : vector<64x8xbf16>, vector<8x8xbf16>, vector<64x8xf32> -> vector<64x8xf32>
    %297 = vector.broadcast %288 : vector<1x8xf32> to vector<64x8xf32>
    %298 = arith.addf %296, %297 : vector<64x8xf32>
    %cst_133 = arith.constant 0.000000e+00 : f32
    %299 = vector.broadcast %cst_133 : f32 to vector<64x8xf32>
    %300 = arith.maximumf %298, %299 : vector<64x8xf32>
    %301 = vector.broadcast %291 : vector<1x8xf32> to vector<64x8xf32>
    %302 = arith.mulf %300, %301 : vector<64x8xf32>
    %cst_134 = arith.constant dense<0.000000e+00> : vector<64xf32>
    %303 = vector.multi_reduction <add>, %302, %cst_134 [1] : vector<64x8xf32> to vector<64xf32>
    %304 = vector.shape_cast %303 : vector<64xf32> to vector<64x1xf32>
    %305 = vector.broadcast %294 : vector<1x1xf32> to vector<64x1xf32>
    %306 = arith.addf %304, %305 : vector<64x1xf32>
    %307 = arith.negf %306 : vector<64x1xf32>
    %308 = math.exp %307 : vector<64x1xf32>
    %cst_135 = arith.constant 1.000000e+00 : f32
    %309 = vector.broadcast %cst_135 : f32 to vector<64x1xf32>
    %310 = arith.addf %309, %308 : vector<64x1xf32>
    %311 = arith.divf %309, %310 : vector<64x1xf32>
    %312 = arith.truncf %275 : vector<32x32xf32> to vector<32x32xbf16>
    %cst_136 = arith.constant dense<0.000000e+00> : vector<32x32xf32>
    %313 = tpu.matmul %312, %279, %cst_136 {dimension_numbers = #tpu.dot_dimension_numbers<[1], [0], [0], [1], [0, 0, 1, 1], [], []>} : vector<32x32xbf16>, vector<32x32xbf16>, vector<32x32xf32> -> vector<32x32xf32>
    %314 = arith.truncf %311 : vector<64x1xf32> to vector<64x1xbf16>
    %cst_137 = arith.constant dense<0.000000e+00> : vector<32x1xf32>
    %315 = tpu.matmul %1, %314, %cst_137 {dimension_numbers = #tpu.dot_dimension_numbers<[1], [0], [0], [1], [0, 0, 1, 1], [], []>} : vector<32x64xbf16>, vector<64x1xbf16>, vector<32x1xf32> -> vector<32x1xf32>
    %316 = arith.addf %315, %3 : vector<32x1xf32>
    %cst_138 = arith.constant 0.000000e+00 : f32
    %317 = vector.broadcast %cst_138 : f32 to vector<32x1xf32>
    %318 = arith.cmpf ogt, %316, %317 : vector<32x1xf32>
    %cst_139 = arith.constant 9.99999996E-13 : f32
    %319 = vector.broadcast %cst_139 : f32 to vector<32x1xf32>
    %320 = arith.maximumf %316, %319 : vector<32x1xf32>
    %321 = math.rsqrt %320 : vector<32x1xf32>
    %cst_140 = arith.constant 0.000000e+00 : f32
    %322 = vector.broadcast %cst_140 : f32 to vector<32x1xf32>
    %323 = arith.select %318, %321, %322 : vector<32x1xi1>, vector<32x1xf32>
    %324 = vector.broadcast %323 : vector<32x1xf32> to vector<32x32xf32>
    %325 = arith.mulf %324, %313 : vector<32x32xf32>
    %326 = arith.truncf %325 : vector<32x32xf32> to vector<32x32xbf16>
    %cst_141 = arith.constant dense<0.000000e+00> : vector<64x32xf32>
    %327 = tpu.matmul %2, %326, %cst_141 {dimension_numbers = #tpu.dot_dimension_numbers<[1], [0], [0], [1], [0, 0, 1, 1], [], []>} : vector<64x32xbf16>, vector<32x32xbf16>, vector<64x32xf32> -> vector<64x32xf32>
    %328 = vector.broadcast %311 : vector<64x1xf32> to vector<64x32xf32>
    %329 = arith.mulf %328, %327 : vector<64x32xf32>
    %330 = arith.truncf %329 : vector<64x32xf32> to vector<64x32xbf16>
    %cst_142 = arith.constant dense<0.000000e+00> : vector<32x32xf32>
    %331 = tpu.matmul %1, %330, %cst_142 {dimension_numbers = #tpu.dot_dimension_numbers<[1], [0], [0], [1], [0, 0, 1, 1], [], []>} : vector<32x64xbf16>, vector<64x32xbf16>, vector<32x32xf32> -> vector<32x32xf32>
    %332 = vector.broadcast %3 : vector<32x1xf32> to vector<32x32xf32>
    %333 = arith.mulf %332, %325 : vector<32x32xf32>
    %334 = arith.addf %331, %333 : vector<32x32xf32>
    %335 = vector.broadcast %323 : vector<32x1xf32> to vector<32x32xf32>
    %336 = arith.mulf %335, %334 : vector<32x32xf32>
    %337 = vector.broadcast %282 : vector<1x32xf32> to vector<32x32xf32>
    %338 = arith.addf %336, %337 : vector<32x32xf32>
    %c1_i32_143 = arith.constant 1 : i32
    %c0_i32_144 = arith.constant 0 : i32
    %339 = arith.cmpi eq, %c1_i32_143, %c0_i32_144 : i32
    %c1_i32_145 = arith.constant 1 : i32
    %340 = arith.select %339, %c1_i32_145, %c1_i32_143 : i32
    %341 = arith.remsi %276, %340 : i32
    %c0_i32_146 = arith.constant 0 : i32
    %342 = arith.cmpi ne, %341, %c0_i32_146 : i32
    %c0_i32_147 = arith.constant 0 : i32
    %343 = arith.cmpi slt, %341, %c0_i32_147 : i32
    %c0_i32_148 = arith.constant 0 : i32
    %344 = arith.cmpi slt, %340, %c0_i32_148 : i32
    %345 = arith.xori %343, %344 : i1
    %346 = arith.andi %345, %342 : i1
    %347 = arith.addi %341, %340 : i32
    %348 = arith.select %346, %347, %341 : i32
    %c0_i32_149 = arith.constant 0 : i32
    %349 = arith.cmpi eq, %348, %c0_i32_149 : i32
    %350 = arith.addf %338, %255 : vector<32x32xf32>
    %351 = arith.select %349, %350, %338 : vector<32x32xf32>
    %352 = arith.addf %255, %351 : vector<32x32xf32>
    %353 = arith.select %349, %352, %255 : vector<32x32xf32>
    %c3_i32 = arith.constant 3 : i32
    %cst_150 = arith.constant dense<0.000000e+00> : vector<32xf32>
    %354 = vector.multi_reduction <add>, %351, %cst_150 [0] : vector<32x32xf32> to vector<32xf32>
    %355 = vector.shape_cast %354 : vector<32xf32> to vector<1x32xf32>
    %cst_151 = arith.constant 3.125000e-02 : f32
    %356 = vector.broadcast %cst_151 : f32 to vector<1x32xf32>
    %357 = arith.mulf %355, %356 : vector<1x32xf32>
    %358 = vector.broadcast %357 : vector<1x32xf32> to vector<32x32xf32>
    %359 = arith.subf %351, %358 : vector<32x32xf32>
    %360 = arith.mulf %359, %359 : vector<32x32xf32>
    %cst_152 = arith.constant dense<0.000000e+00> : vector<32xf32>
    %361 = vector.multi_reduction <add>, %360, %cst_152 [0] : vector<32x32xf32> to vector<32xf32>
    %362 = vector.shape_cast %361 : vector<32xf32> to vector<1x32xf32>
    %cst_153 = arith.constant 3.125000e-02 : f32
    %363 = vector.broadcast %cst_153 : f32 to vector<1x32xf32>
    %364 = arith.mulf %362, %363 : vector<1x32xf32>
    %cst_154 = arith.constant 0.000000e+00 : f32
    %365 = vector.broadcast %cst_154 : f32 to vector<1x32xf32>
    %366 = arith.maximumf %364, %365 : vector<1x32xf32>
    %cst_155 = arith.constant 9.99999974E-6 : f32
    %367 = vector.broadcast %cst_155 : f32 to vector<1x32xf32>
    %368 = arith.addf %366, %367 : vector<1x32xf32>
    %369 = math.rsqrt %368 : vector<1x32xf32>
    %370 = vector.broadcast %369 : vector<1x32xf32> to vector<32x32xf32>
    %371 = arith.mulf %359, %370 : vector<32x32xf32>
    %cst_156 = arith.constant 0.000000e+00 : f32
    %372 = vector.broadcast %cst_156 : f32 to vector<32x32xf32>
    %373 = arith.maximumf %371, %372 : vector<32x32xf32>
    %c1_i32_157 = arith.constant 1 : i32
    %374 = arith.addi %c3_i32, %c1_i32_157 : i32
    %375 = arith.index_cast %c3_i32 : i32 to index
    %c0_158 = arith.constant 0 : index
    %c0_159 = arith.constant 0 : index
    %376 = vector.load %arg9[%375, %c0_158, %c0_159] : memref<6x32x32xbf16, #tpu.memory_space<vmem>>, vector<1x32x32xbf16>
    %377 = vector.shape_cast %376 : vector<1x32x32xbf16> to vector<32x32xbf16>
    %378 = arith.index_cast %374 : i32 to index
    %c0_160 = arith.constant 0 : index
    %c0_161 = arith.constant 0 : index
    %379 = vector.load %arg10[%378, %c0_160, %c0_161] : memref<7x1x32xf32, #tpu.memory_space<vmem>>, vector<1x1x32xf32>
    %380 = vector.shape_cast %379 : vector<1x1x32xf32> to vector<1x32xf32>
    %381 = arith.index_cast %374 : i32 to index
    %c0_162 = arith.constant 0 : index
    %c0_163 = arith.constant 0 : index
    %382 = vector.load %arg11[%381, %c0_162, %c0_163] : memref<7x8x8xf32, #tpu.memory_space<vmem>>, vector<1x8x8xf32>
    %383 = vector.shape_cast %382 : vector<1x8x8xf32> to vector<8x8xf32>
    %384 = arith.index_cast %374 : i32 to index
    %c0_164 = arith.constant 0 : index
    %c0_165 = arith.constant 0 : index
    %385 = vector.load %arg12[%384, %c0_164, %c0_165] : memref<7x1x8xf32, #tpu.memory_space<vmem>>, vector<1x1x8xf32>
    %386 = vector.shape_cast %385 : vector<1x1x8xf32> to vector<1x8xf32>
    %387 = arith.index_cast %374 : i32 to index
    %c0_166 = arith.constant 0 : index
    %c0_167 = arith.constant 0 : index
    %388 = vector.load %arg13[%387, %c0_166, %c0_167] : memref<7x1x8xf32, #tpu.memory_space<vmem>>, vector<1x1x8xf32>
    %389 = vector.shape_cast %388 : vector<1x1x8xf32> to vector<1x8xf32>
    %390 = arith.index_cast %374 : i32 to index
    %c0_168 = arith.constant 0 : index
    %c0_169 = arith.constant 0 : index
    %391 = vector.load %arg14[%390, %c0_168, %c0_169] : memref<7x1x1xf32, #tpu.memory_space<vmem>>, vector<1x1x1xf32>
    %392 = vector.shape_cast %391 : vector<1x1x1xf32> to vector<1x1xf32>
    %393 = arith.truncf %383 : vector<8x8xf32> to vector<8x8xbf16>
    %cst_170 = arith.constant dense<0.000000e+00> : vector<64x8xf32>
    %394 = tpu.matmul %0, %393, %cst_170 {dimension_numbers = #tpu.dot_dimension_numbers<[1], [0], [0], [1], [0, 0, 1, 1], [], []>} : vector<64x8xbf16>, vector<8x8xbf16>, vector<64x8xf32> -> vector<64x8xf32>
    %395 = vector.broadcast %386 : vector<1x8xf32> to vector<64x8xf32>
    %396 = arith.addf %394, %395 : vector<64x8xf32>
    %cst_171 = arith.constant 0.000000e+00 : f32
    %397 = vector.broadcast %cst_171 : f32 to vector<64x8xf32>
    %398 = arith.maximumf %396, %397 : vector<64x8xf32>
    %399 = vector.broadcast %389 : vector<1x8xf32> to vector<64x8xf32>
    %400 = arith.mulf %398, %399 : vector<64x8xf32>
    %cst_172 = arith.constant dense<0.000000e+00> : vector<64xf32>
    %401 = vector.multi_reduction <add>, %400, %cst_172 [1] : vector<64x8xf32> to vector<64xf32>
    %402 = vector.shape_cast %401 : vector<64xf32> to vector<64x1xf32>
    %403 = vector.broadcast %392 : vector<1x1xf32> to vector<64x1xf32>
    %404 = arith.addf %402, %403 : vector<64x1xf32>
    %405 = arith.negf %404 : vector<64x1xf32>
    %406 = math.exp %405 : vector<64x1xf32>
    %cst_173 = arith.constant 1.000000e+00 : f32
    %407 = vector.broadcast %cst_173 : f32 to vector<64x1xf32>
    %408 = arith.addf %407, %406 : vector<64x1xf32>
    %409 = arith.divf %407, %408 : vector<64x1xf32>
    %410 = arith.truncf %373 : vector<32x32xf32> to vector<32x32xbf16>
    %cst_174 = arith.constant dense<0.000000e+00> : vector<32x32xf32>
    %411 = tpu.matmul %410, %377, %cst_174 {dimension_numbers = #tpu.dot_dimension_numbers<[1], [0], [0], [1], [0, 0, 1, 1], [], []>} : vector<32x32xbf16>, vector<32x32xbf16>, vector<32x32xf32> -> vector<32x32xf32>
    %412 = arith.truncf %409 : vector<64x1xf32> to vector<64x1xbf16>
    %cst_175 = arith.constant dense<0.000000e+00> : vector<32x1xf32>
    %413 = tpu.matmul %1, %412, %cst_175 {dimension_numbers = #tpu.dot_dimension_numbers<[1], [0], [0], [1], [0, 0, 1, 1], [], []>} : vector<32x64xbf16>, vector<64x1xbf16>, vector<32x1xf32> -> vector<32x1xf32>
    %414 = arith.addf %413, %3 : vector<32x1xf32>
    %cst_176 = arith.constant 0.000000e+00 : f32
    %415 = vector.broadcast %cst_176 : f32 to vector<32x1xf32>
    %416 = arith.cmpf ogt, %414, %415 : vector<32x1xf32>
    %cst_177 = arith.constant 9.99999996E-13 : f32
    %417 = vector.broadcast %cst_177 : f32 to vector<32x1xf32>
    %418 = arith.maximumf %414, %417 : vector<32x1xf32>
    %419 = math.rsqrt %418 : vector<32x1xf32>
    %cst_178 = arith.constant 0.000000e+00 : f32
    %420 = vector.broadcast %cst_178 : f32 to vector<32x1xf32>
    %421 = arith.select %416, %419, %420 : vector<32x1xi1>, vector<32x1xf32>
    %422 = vector.broadcast %421 : vector<32x1xf32> to vector<32x32xf32>
    %423 = arith.mulf %422, %411 : vector<32x32xf32>
    %424 = arith.truncf %423 : vector<32x32xf32> to vector<32x32xbf16>
    %cst_179 = arith.constant dense<0.000000e+00> : vector<64x32xf32>
    %425 = tpu.matmul %2, %424, %cst_179 {dimension_numbers = #tpu.dot_dimension_numbers<[1], [0], [0], [1], [0, 0, 1, 1], [], []>} : vector<64x32xbf16>, vector<32x32xbf16>, vector<64x32xf32> -> vector<64x32xf32>
    %426 = vector.broadcast %409 : vector<64x1xf32> to vector<64x32xf32>
    %427 = arith.mulf %426, %425 : vector<64x32xf32>
    %428 = arith.truncf %427 : vector<64x32xf32> to vector<64x32xbf16>
    %cst_180 = arith.constant dense<0.000000e+00> : vector<32x32xf32>
    %429 = tpu.matmul %1, %428, %cst_180 {dimension_numbers = #tpu.dot_dimension_numbers<[1], [0], [0], [1], [0, 0, 1, 1], [], []>} : vector<32x64xbf16>, vector<64x32xbf16>, vector<32x32xf32> -> vector<32x32xf32>
    %430 = vector.broadcast %3 : vector<32x1xf32> to vector<32x32xf32>
    %431 = arith.mulf %430, %423 : vector<32x32xf32>
    %432 = arith.addf %429, %431 : vector<32x32xf32>
    %433 = vector.broadcast %421 : vector<32x1xf32> to vector<32x32xf32>
    %434 = arith.mulf %433, %432 : vector<32x32xf32>
    %435 = vector.broadcast %380 : vector<1x32xf32> to vector<32x32xf32>
    %436 = arith.addf %434, %435 : vector<32x32xf32>
    %c1_i32_181 = arith.constant 1 : i32
    %c0_i32_182 = arith.constant 0 : i32
    %437 = arith.cmpi eq, %c1_i32_181, %c0_i32_182 : i32
    %c1_i32_183 = arith.constant 1 : i32
    %438 = arith.select %437, %c1_i32_183, %c1_i32_181 : i32
    %439 = arith.remsi %374, %438 : i32
    %c0_i32_184 = arith.constant 0 : i32
    %440 = arith.cmpi ne, %439, %c0_i32_184 : i32
    %c0_i32_185 = arith.constant 0 : i32
    %441 = arith.cmpi slt, %439, %c0_i32_185 : i32
    %c0_i32_186 = arith.constant 0 : i32
    %442 = arith.cmpi slt, %438, %c0_i32_186 : i32
    %443 = arith.xori %441, %442 : i1
    %444 = arith.andi %443, %440 : i1
    %445 = arith.addi %439, %438 : i32
    %446 = arith.select %444, %445, %439 : i32
    %c0_i32_187 = arith.constant 0 : i32
    %447 = arith.cmpi eq, %446, %c0_i32_187 : i32
    %448 = arith.addf %436, %353 : vector<32x32xf32>
    %449 = arith.select %447, %448, %436 : vector<32x32xf32>
    %450 = arith.addf %353, %449 : vector<32x32xf32>
    %451 = arith.select %447, %450, %353 : vector<32x32xf32>
    %c4_i32 = arith.constant 4 : i32
    %cst_188 = arith.constant dense<0.000000e+00> : vector<32xf32>
    %452 = vector.multi_reduction <add>, %449, %cst_188 [0] : vector<32x32xf32> to vector<32xf32>
    %453 = vector.shape_cast %452 : vector<32xf32> to vector<1x32xf32>
    %cst_189 = arith.constant 3.125000e-02 : f32
    %454 = vector.broadcast %cst_189 : f32 to vector<1x32xf32>
    %455 = arith.mulf %453, %454 : vector<1x32xf32>
    %456 = vector.broadcast %455 : vector<1x32xf32> to vector<32x32xf32>
    %457 = arith.subf %449, %456 : vector<32x32xf32>
    %458 = arith.mulf %457, %457 : vector<32x32xf32>
    %cst_190 = arith.constant dense<0.000000e+00> : vector<32xf32>
    %459 = vector.multi_reduction <add>, %458, %cst_190 [0] : vector<32x32xf32> to vector<32xf32>
    %460 = vector.shape_cast %459 : vector<32xf32> to vector<1x32xf32>
    %cst_191 = arith.constant 3.125000e-02 : f32
    %461 = vector.broadcast %cst_191 : f32 to vector<1x32xf32>
    %462 = arith.mulf %460, %461 : vector<1x32xf32>
    %cst_192 = arith.constant 0.000000e+00 : f32
    %463 = vector.broadcast %cst_192 : f32 to vector<1x32xf32>
    %464 = arith.maximumf %462, %463 : vector<1x32xf32>
    %cst_193 = arith.constant 9.99999974E-6 : f32
    %465 = vector.broadcast %cst_193 : f32 to vector<1x32xf32>
    %466 = arith.addf %464, %465 : vector<1x32xf32>
    %467 = math.rsqrt %466 : vector<1x32xf32>
    %468 = vector.broadcast %467 : vector<1x32xf32> to vector<32x32xf32>
    %469 = arith.mulf %457, %468 : vector<32x32xf32>
    %cst_194 = arith.constant 0.000000e+00 : f32
    %470 = vector.broadcast %cst_194 : f32 to vector<32x32xf32>
    %471 = arith.maximumf %469, %470 : vector<32x32xf32>
    %c1_i32_195 = arith.constant 1 : i32
    %472 = arith.addi %c4_i32, %c1_i32_195 : i32
    %473 = arith.index_cast %c4_i32 : i32 to index
    %c0_196 = arith.constant 0 : index
    %c0_197 = arith.constant 0 : index
    %474 = vector.load %arg9[%473, %c0_196, %c0_197] : memref<6x32x32xbf16, #tpu.memory_space<vmem>>, vector<1x32x32xbf16>
    %475 = vector.shape_cast %474 : vector<1x32x32xbf16> to vector<32x32xbf16>
    %476 = arith.index_cast %472 : i32 to index
    %c0_198 = arith.constant 0 : index
    %c0_199 = arith.constant 0 : index
    %477 = vector.load %arg10[%476, %c0_198, %c0_199] : memref<7x1x32xf32, #tpu.memory_space<vmem>>, vector<1x1x32xf32>
    %478 = vector.shape_cast %477 : vector<1x1x32xf32> to vector<1x32xf32>
    %479 = arith.index_cast %472 : i32 to index
    %c0_200 = arith.constant 0 : index
    %c0_201 = arith.constant 0 : index
    %480 = vector.load %arg11[%479, %c0_200, %c0_201] : memref<7x8x8xf32, #tpu.memory_space<vmem>>, vector<1x8x8xf32>
    %481 = vector.shape_cast %480 : vector<1x8x8xf32> to vector<8x8xf32>
    %482 = arith.index_cast %472 : i32 to index
    %c0_202 = arith.constant 0 : index
    %c0_203 = arith.constant 0 : index
    %483 = vector.load %arg12[%482, %c0_202, %c0_203] : memref<7x1x8xf32, #tpu.memory_space<vmem>>, vector<1x1x8xf32>
    %484 = vector.shape_cast %483 : vector<1x1x8xf32> to vector<1x8xf32>
    %485 = arith.index_cast %472 : i32 to index
    %c0_204 = arith.constant 0 : index
    %c0_205 = arith.constant 0 : index
    %486 = vector.load %arg13[%485, %c0_204, %c0_205] : memref<7x1x8xf32, #tpu.memory_space<vmem>>, vector<1x1x8xf32>
    %487 = vector.shape_cast %486 : vector<1x1x8xf32> to vector<1x8xf32>
    %488 = arith.index_cast %472 : i32 to index
    %c0_206 = arith.constant 0 : index
    %c0_207 = arith.constant 0 : index
    %489 = vector.load %arg14[%488, %c0_206, %c0_207] : memref<7x1x1xf32, #tpu.memory_space<vmem>>, vector<1x1x1xf32>
    %490 = vector.shape_cast %489 : vector<1x1x1xf32> to vector<1x1xf32>
    %491 = arith.truncf %481 : vector<8x8xf32> to vector<8x8xbf16>
    %cst_208 = arith.constant dense<0.000000e+00> : vector<64x8xf32>
    %492 = tpu.matmul %0, %491, %cst_208 {dimension_numbers = #tpu.dot_dimension_numbers<[1], [0], [0], [1], [0, 0, 1, 1], [], []>} : vector<64x8xbf16>, vector<8x8xbf16>, vector<64x8xf32> -> vector<64x8xf32>
    %493 = vector.broadcast %484 : vector<1x8xf32> to vector<64x8xf32>
    %494 = arith.addf %492, %493 : vector<64x8xf32>
    %cst_209 = arith.constant 0.000000e+00 : f32
    %495 = vector.broadcast %cst_209 : f32 to vector<64x8xf32>
    %496 = arith.maximumf %494, %495 : vector<64x8xf32>
    %497 = vector.broadcast %487 : vector<1x8xf32> to vector<64x8xf32>
    %498 = arith.mulf %496, %497 : vector<64x8xf32>
    %cst_210 = arith.constant dense<0.000000e+00> : vector<64xf32>
    %499 = vector.multi_reduction <add>, %498, %cst_210 [1] : vector<64x8xf32> to vector<64xf32>
    %500 = vector.shape_cast %499 : vector<64xf32> to vector<64x1xf32>
    %501 = vector.broadcast %490 : vector<1x1xf32> to vector<64x1xf32>
    %502 = arith.addf %500, %501 : vector<64x1xf32>
    %503 = arith.negf %502 : vector<64x1xf32>
    %504 = math.exp %503 : vector<64x1xf32>
    %cst_211 = arith.constant 1.000000e+00 : f32
    %505 = vector.broadcast %cst_211 : f32 to vector<64x1xf32>
    %506 = arith.addf %505, %504 : vector<64x1xf32>
    %507 = arith.divf %505, %506 : vector<64x1xf32>
    %508 = arith.truncf %471 : vector<32x32xf32> to vector<32x32xbf16>
    %cst_212 = arith.constant dense<0.000000e+00> : vector<32x32xf32>
    %509 = tpu.matmul %508, %475, %cst_212 {dimension_numbers = #tpu.dot_dimension_numbers<[1], [0], [0], [1], [0, 0, 1, 1], [], []>} : vector<32x32xbf16>, vector<32x32xbf16>, vector<32x32xf32> -> vector<32x32xf32>
    %510 = arith.truncf %507 : vector<64x1xf32> to vector<64x1xbf16>
    %cst_213 = arith.constant dense<0.000000e+00> : vector<32x1xf32>
    %511 = tpu.matmul %1, %510, %cst_213 {dimension_numbers = #tpu.dot_dimension_numbers<[1], [0], [0], [1], [0, 0, 1, 1], [], []>} : vector<32x64xbf16>, vector<64x1xbf16>, vector<32x1xf32> -> vector<32x1xf32>
    %512 = arith.addf %511, %3 : vector<32x1xf32>
    %cst_214 = arith.constant 0.000000e+00 : f32
    %513 = vector.broadcast %cst_214 : f32 to vector<32x1xf32>
    %514 = arith.cmpf ogt, %512, %513 : vector<32x1xf32>
    %cst_215 = arith.constant 9.99999996E-13 : f32
    %515 = vector.broadcast %cst_215 : f32 to vector<32x1xf32>
    %516 = arith.maximumf %512, %515 : vector<32x1xf32>
    %517 = math.rsqrt %516 : vector<32x1xf32>
    %cst_216 = arith.constant 0.000000e+00 : f32
    %518 = vector.broadcast %cst_216 : f32 to vector<32x1xf32>
    %519 = arith.select %514, %517, %518 : vector<32x1xi1>, vector<32x1xf32>
    %520 = vector.broadcast %519 : vector<32x1xf32> to vector<32x32xf32>
    %521 = arith.mulf %520, %509 : vector<32x32xf32>
    %522 = arith.truncf %521 : vector<32x32xf32> to vector<32x32xbf16>
    %cst_217 = arith.constant dense<0.000000e+00> : vector<64x32xf32>
    %523 = tpu.matmul %2, %522, %cst_217 {dimension_numbers = #tpu.dot_dimension_numbers<[1], [0], [0], [1], [0, 0, 1, 1], [], []>} : vector<64x32xbf16>, vector<32x32xbf16>, vector<64x32xf32> -> vector<64x32xf32>
    %524 = vector.broadcast %507 : vector<64x1xf32> to vector<64x32xf32>
    %525 = arith.mulf %524, %523 : vector<64x32xf32>
    %526 = arith.truncf %525 : vector<64x32xf32> to vector<64x32xbf16>
    %cst_218 = arith.constant dense<0.000000e+00> : vector<32x32xf32>
    %527 = tpu.matmul %1, %526, %cst_218 {dimension_numbers = #tpu.dot_dimension_numbers<[1], [0], [0], [1], [0, 0, 1, 1], [], []>} : vector<32x64xbf16>, vector<64x32xbf16>, vector<32x32xf32> -> vector<32x32xf32>
    %528 = vector.broadcast %3 : vector<32x1xf32> to vector<32x32xf32>
    %529 = arith.mulf %528, %521 : vector<32x32xf32>
    %530 = arith.addf %527, %529 : vector<32x32xf32>
    %531 = vector.broadcast %519 : vector<32x1xf32> to vector<32x32xf32>
    %532 = arith.mulf %531, %530 : vector<32x32xf32>
    %533 = vector.broadcast %478 : vector<1x32xf32> to vector<32x32xf32>
    %534 = arith.addf %532, %533 : vector<32x32xf32>
    %c1_i32_219 = arith.constant 1 : i32
    %c0_i32_220 = arith.constant 0 : i32
    %535 = arith.cmpi eq, %c1_i32_219, %c0_i32_220 : i32
    %c1_i32_221 = arith.constant 1 : i32
    %536 = arith.select %535, %c1_i32_221, %c1_i32_219 : i32
    %537 = arith.remsi %472, %536 : i32
    %c0_i32_222 = arith.constant 0 : i32
    %538 = arith.cmpi ne, %537, %c0_i32_222 : i32
    %c0_i32_223 = arith.constant 0 : i32
    %539 = arith.cmpi slt, %537, %c0_i32_223 : i32
    %c0_i32_224 = arith.constant 0 : i32
    %540 = arith.cmpi slt, %536, %c0_i32_224 : i32
    %541 = arith.xori %539, %540 : i1
    %542 = arith.andi %541, %538 : i1
    %543 = arith.addi %537, %536 : i32
    %544 = arith.select %542, %543, %537 : i32
    %c0_i32_225 = arith.constant 0 : i32
    %545 = arith.cmpi eq, %544, %c0_i32_225 : i32
    %546 = arith.addf %534, %451 : vector<32x32xf32>
    %547 = arith.select %545, %546, %534 : vector<32x32xf32>
    %548 = arith.addf %451, %547 : vector<32x32xf32>
    %549 = arith.select %545, %548, %451 : vector<32x32xf32>
    %c5_i32 = arith.constant 5 : i32
    %cst_226 = arith.constant dense<0.000000e+00> : vector<32xf32>
    %550 = vector.multi_reduction <add>, %547, %cst_226 [0] : vector<32x32xf32> to vector<32xf32>
    %551 = vector.shape_cast %550 : vector<32xf32> to vector<1x32xf32>
    %cst_227 = arith.constant 3.125000e-02 : f32
    %552 = vector.broadcast %cst_227 : f32 to vector<1x32xf32>
    %553 = arith.mulf %551, %552 : vector<1x32xf32>
    %554 = vector.broadcast %553 : vector<1x32xf32> to vector<32x32xf32>
    %555 = arith.subf %547, %554 : vector<32x32xf32>
    %556 = arith.mulf %555, %555 : vector<32x32xf32>
    %cst_228 = arith.constant dense<0.000000e+00> : vector<32xf32>
    %557 = vector.multi_reduction <add>, %556, %cst_228 [0] : vector<32x32xf32> to vector<32xf32>
    %558 = vector.shape_cast %557 : vector<32xf32> to vector<1x32xf32>
    %cst_229 = arith.constant 3.125000e-02 : f32
    %559 = vector.broadcast %cst_229 : f32 to vector<1x32xf32>
    %560 = arith.mulf %558, %559 : vector<1x32xf32>
    %cst_230 = arith.constant 0.000000e+00 : f32
    %561 = vector.broadcast %cst_230 : f32 to vector<1x32xf32>
    %562 = arith.maximumf %560, %561 : vector<1x32xf32>
    %cst_231 = arith.constant 9.99999974E-6 : f32
    %563 = vector.broadcast %cst_231 : f32 to vector<1x32xf32>
    %564 = arith.addf %562, %563 : vector<1x32xf32>
    %565 = math.rsqrt %564 : vector<1x32xf32>
    %566 = vector.broadcast %565 : vector<1x32xf32> to vector<32x32xf32>
    %567 = arith.mulf %555, %566 : vector<32x32xf32>
    %cst_232 = arith.constant 0.000000e+00 : f32
    %568 = vector.broadcast %cst_232 : f32 to vector<32x32xf32>
    %569 = arith.maximumf %567, %568 : vector<32x32xf32>
    %c1_i32_233 = arith.constant 1 : i32
    %570 = arith.addi %c5_i32, %c1_i32_233 : i32
    %571 = arith.index_cast %c5_i32 : i32 to index
    %c0_234 = arith.constant 0 : index
    %c0_235 = arith.constant 0 : index
    %572 = vector.load %arg9[%571, %c0_234, %c0_235] : memref<6x32x32xbf16, #tpu.memory_space<vmem>>, vector<1x32x32xbf16>
    %573 = vector.shape_cast %572 : vector<1x32x32xbf16> to vector<32x32xbf16>
    %574 = arith.index_cast %570 : i32 to index
    %c0_236 = arith.constant 0 : index
    %c0_237 = arith.constant 0 : index
    %575 = vector.load %arg10[%574, %c0_236, %c0_237] : memref<7x1x32xf32, #tpu.memory_space<vmem>>, vector<1x1x32xf32>
    %576 = vector.shape_cast %575 : vector<1x1x32xf32> to vector<1x32xf32>
    %577 = arith.index_cast %570 : i32 to index
    %c0_238 = arith.constant 0 : index
    %c0_239 = arith.constant 0 : index
    %578 = vector.load %arg11[%577, %c0_238, %c0_239] : memref<7x8x8xf32, #tpu.memory_space<vmem>>, vector<1x8x8xf32>
    %579 = vector.shape_cast %578 : vector<1x8x8xf32> to vector<8x8xf32>
    %580 = arith.index_cast %570 : i32 to index
    %c0_240 = arith.constant 0 : index
    %c0_241 = arith.constant 0 : index
    %581 = vector.load %arg12[%580, %c0_240, %c0_241] : memref<7x1x8xf32, #tpu.memory_space<vmem>>, vector<1x1x8xf32>
    %582 = vector.shape_cast %581 : vector<1x1x8xf32> to vector<1x8xf32>
    %583 = arith.index_cast %570 : i32 to index
    %c0_242 = arith.constant 0 : index
    %c0_243 = arith.constant 0 : index
    %584 = vector.load %arg13[%583, %c0_242, %c0_243] : memref<7x1x8xf32, #tpu.memory_space<vmem>>, vector<1x1x8xf32>
    %585 = vector.shape_cast %584 : vector<1x1x8xf32> to vector<1x8xf32>
    %586 = arith.index_cast %570 : i32 to index
    %c0_244 = arith.constant 0 : index
    %c0_245 = arith.constant 0 : index
    %587 = vector.load %arg14[%586, %c0_244, %c0_245] : memref<7x1x1xf32, #tpu.memory_space<vmem>>, vector<1x1x1xf32>
    %588 = vector.shape_cast %587 : vector<1x1x1xf32> to vector<1x1xf32>
    %589 = arith.truncf %579 : vector<8x8xf32> to vector<8x8xbf16>
    %cst_246 = arith.constant dense<0.000000e+00> : vector<64x8xf32>
    %590 = tpu.matmul %0, %589, %cst_246 {dimension_numbers = #tpu.dot_dimension_numbers<[1], [0], [0], [1], [0, 0, 1, 1], [], []>} : vector<64x8xbf16>, vector<8x8xbf16>, vector<64x8xf32> -> vector<64x8xf32>
    %591 = vector.broadcast %582 : vector<1x8xf32> to vector<64x8xf32>
    %592 = arith.addf %590, %591 : vector<64x8xf32>
    %cst_247 = arith.constant 0.000000e+00 : f32
    %593 = vector.broadcast %cst_247 : f32 to vector<64x8xf32>
    %594 = arith.maximumf %592, %593 : vector<64x8xf32>
    %595 = vector.broadcast %585 : vector<1x8xf32> to vector<64x8xf32>
    %596 = arith.mulf %594, %595 : vector<64x8xf32>
    %cst_248 = arith.constant dense<0.000000e+00> : vector<64xf32>
    %597 = vector.multi_reduction <add>, %596, %cst_248 [1] : vector<64x8xf32> to vector<64xf32>
    %598 = vector.shape_cast %597 : vector<64xf32> to vector<64x1xf32>
    %599 = vector.broadcast %588 : vector<1x1xf32> to vector<64x1xf32>
    %600 = arith.addf %598, %599 : vector<64x1xf32>
    %601 = arith.negf %600 : vector<64x1xf32>
    %602 = math.exp %601 : vector<64x1xf32>
    %cst_249 = arith.constant 1.000000e+00 : f32
    %603 = vector.broadcast %cst_249 : f32 to vector<64x1xf32>
    %604 = arith.addf %603, %602 : vector<64x1xf32>
    %605 = arith.divf %603, %604 : vector<64x1xf32>
    %606 = arith.truncf %569 : vector<32x32xf32> to vector<32x32xbf16>
    %cst_250 = arith.constant dense<0.000000e+00> : vector<32x32xf32>
    %607 = tpu.matmul %606, %573, %cst_250 {dimension_numbers = #tpu.dot_dimension_numbers<[1], [0], [0], [1], [0, 0, 1, 1], [], []>} : vector<32x32xbf16>, vector<32x32xbf16>, vector<32x32xf32> -> vector<32x32xf32>
    %608 = arith.truncf %605 : vector<64x1xf32> to vector<64x1xbf16>
    %cst_251 = arith.constant dense<0.000000e+00> : vector<32x1xf32>
    %609 = tpu.matmul %1, %608, %cst_251 {dimension_numbers = #tpu.dot_dimension_numbers<[1], [0], [0], [1], [0, 0, 1, 1], [], []>} : vector<32x64xbf16>, vector<64x1xbf16>, vector<32x1xf32> -> vector<32x1xf32>
    %610 = arith.addf %609, %3 : vector<32x1xf32>
    %cst_252 = arith.constant 0.000000e+00 : f32
    %611 = vector.broadcast %cst_252 : f32 to vector<32x1xf32>
    %612 = arith.cmpf ogt, %610, %611 : vector<32x1xf32>
    %cst_253 = arith.constant 9.99999996E-13 : f32
    %613 = vector.broadcast %cst_253 : f32 to vector<32x1xf32>
    %614 = arith.maximumf %610, %613 : vector<32x1xf32>
    %615 = math.rsqrt %614 : vector<32x1xf32>
    %cst_254 = arith.constant 0.000000e+00 : f32
    %616 = vector.broadcast %cst_254 : f32 to vector<32x1xf32>
    %617 = arith.select %612, %615, %616 : vector<32x1xi1>, vector<32x1xf32>
    %618 = vector.broadcast %617 : vector<32x1xf32> to vector<32x32xf32>
    %619 = arith.mulf %618, %607 : vector<32x32xf32>
    %620 = arith.truncf %619 : vector<32x32xf32> to vector<32x32xbf16>
    %cst_255 = arith.constant dense<0.000000e+00> : vector<64x32xf32>
    %621 = tpu.matmul %2, %620, %cst_255 {dimension_numbers = #tpu.dot_dimension_numbers<[1], [0], [0], [1], [0, 0, 1, 1], [], []>} : vector<64x32xbf16>, vector<32x32xbf16>, vector<64x32xf32> -> vector<64x32xf32>
    %622 = vector.broadcast %605 : vector<64x1xf32> to vector<64x32xf32>
    %623 = arith.mulf %622, %621 : vector<64x32xf32>
    %624 = arith.truncf %623 : vector<64x32xf32> to vector<64x32xbf16>
    %cst_256 = arith.constant dense<0.000000e+00> : vector<32x32xf32>
    %625 = tpu.matmul %1, %624, %cst_256 {dimension_numbers = #tpu.dot_dimension_numbers<[1], [0], [0], [1], [0, 0, 1, 1], [], []>} : vector<32x64xbf16>, vector<64x32xbf16>, vector<32x32xf32> -> vector<32x32xf32>
    %626 = vector.broadcast %3 : vector<32x1xf32> to vector<32x32xf32>
    %627 = arith.mulf %626, %619 : vector<32x32xf32>
    %628 = arith.addf %625, %627 : vector<32x32xf32>
    %629 = vector.broadcast %617 : vector<32x1xf32> to vector<32x32xf32>
    %630 = arith.mulf %629, %628 : vector<32x32xf32>
    %631 = vector.broadcast %576 : vector<1x32xf32> to vector<32x32xf32>
    %632 = arith.addf %630, %631 : vector<32x32xf32>
    %c1_i32_257 = arith.constant 1 : i32
    %c0_i32_258 = arith.constant 0 : i32
    %633 = arith.cmpi eq, %c1_i32_257, %c0_i32_258 : i32
    %c1_i32_259 = arith.constant 1 : i32
    %634 = arith.select %633, %c1_i32_259, %c1_i32_257 : i32
    %635 = arith.remsi %570, %634 : i32
    %c0_i32_260 = arith.constant 0 : i32
    %636 = arith.cmpi ne, %635, %c0_i32_260 : i32
    %c0_i32_261 = arith.constant 0 : i32
    %637 = arith.cmpi slt, %635, %c0_i32_261 : i32
    %c0_i32_262 = arith.constant 0 : i32
    %638 = arith.cmpi slt, %634, %c0_i32_262 : i32
    %639 = arith.xori %637, %638 : i1
    %640 = arith.andi %639, %636 : i1
    %641 = arith.addi %635, %634 : i32
    %642 = arith.select %640, %641, %635 : i32
    %c0_i32_263 = arith.constant 0 : i32
    %643 = arith.cmpi eq, %642, %c0_i32_263 : i32
    %644 = arith.addf %632, %549 : vector<32x32xf32>
    %645 = arith.select %643, %644, %632 : vector<32x32xf32>
    %646 = arith.addf %549, %645 : vector<32x32xf32>
    %647 = arith.select %643, %646, %549 : vector<32x32xf32>
    %c6_i32 = arith.constant 6 : i32
    %cst_264 = arith.constant 0.000000e+00 : f32
    %648 = vector.broadcast %cst_264 : f32 to vector<32x32xf32>
    %649 = arith.maximumf %645, %648 : vector<32x32xf32>
    %c0_265 = arith.constant 0 : index
    %c0_266 = arith.constant 0 : index
    %650 = vector.load %arg5[%c0_265, %c0_266] : memref<2x32xbf16, #tpu.memory_space<vmem>>, vector<2x32xbf16>
    %651 = arith.truncf %649 : vector<32x32xf32> to vector<32x32xbf16>
    %cst_267 = arith.constant dense<0.000000e+00> : vector<2x32xf32>
    %652 = tpu.matmul %650, %651, %cst_267 {dimension_numbers = #tpu.dot_dimension_numbers<[1], [0], [0], [1], [0, 0, 1, 1], [], []>} : vector<2x32xbf16>, vector<32x32xbf16>, vector<2x32xf32> -> vector<2x32xf32>
    %c0_268 = arith.constant 0 : index
    %c0_269 = arith.constant 0 : index
    %653 = vector.load %arg6[%c0_268, %c0_269] : memref<32x4xf32, #tpu.memory_space<vmem>>, vector<32x4xf32>
    %654 = arith.truncf %652 : vector<2x32xf32> to vector<2x32xbf16>
    %655 = arith.truncf %653 : vector<32x4xf32> to vector<32x4xbf16>
    %cst_270 = arith.constant dense<0.000000e+00> : vector<2x4xf32>
    %656 = tpu.matmul %654, %655, %cst_270 {dimension_numbers = #tpu.dot_dimension_numbers<[1], [0], [0], [1], [0, 0, 1, 1], [], []>} : vector<2x32xbf16>, vector<32x4xbf16>, vector<2x4xf32> -> vector<2x4xf32>
    %c0_271 = arith.constant 0 : index
    %c0_272 = arith.constant 0 : index
    %657 = vector.load %arg7[%c0_271, %c0_272] : memref<1x4xf32, #tpu.memory_space<vmem>>, vector<1x4xf32>
    %658 = vector.broadcast %657 : vector<1x4xf32> to vector<2x4xf32>
    %659 = arith.addf %656, %658 : vector<2x4xf32>
    %c0_273 = arith.constant 0 : index
    %c0_274 = arith.constant 0 : index
    %660 = vector.load %arg15[%c0_273, %c0_274] : memref<2x4xf32, #tpu.memory_space<vmem>>, vector<2x4xf32>
    tpu.vector_store %arg15[%c0_273, %c0_274], %659 {strides = array<i32>} : memref<2x4xf32, #tpu.memory_space<vmem>>, vector<2x4xf32>,
    return
  }
}

</mosaic_0001>

<bundles_post_ra>
// kernel: forward.1
= control target key start
LH: loop header
LB: loop body
LE: loop exit
PB: predicated region body
PF: predicated region fallthrough
CT: control target
= control target key end

     0   :  { %vm8176_vm0 = vcmask 1043456   ;;  %vm8175_vm1 = vcmask 64512   ;;  %s8159_s0 = inlined_call_operand.vmem [shape: f32[32,8], index: 0, kind: input, shape index: {}]   ;;  %s8160_s1 = inlined_call_operand.vmem [shape: bf16[64,8], index: 1, kind: input, shape index: {}]   ;;  %s8161_s2 = inlined_call_operand.vmem [shape: bf16[32,64], index: 2, kind: input, shape index: {}]   ;;  %s8162_s3 = inlined_call_operand.vmem [shape: bf16[64,32], index: 3, kind: input, shape index: {}]   ;;  %s8163_s4 = inlined_call_operand.vmem [shape: f32[32,1], index: 4, kind: input, shape index: {}]   ;;  %s8164_s5 = inlined_call_operand.vmem [shape: bf16[2,32], index: 5, kind: input, shape index: {}]   ;;  %s8165_s6 = inlined_call_operand.vmem [shape: f32[32,4], index: 6, kind: input, shape index: {}]   ;;  %s8166_s7 = inlined_call_operand.vmem [shape: f32[1,4], index: 7, kind: input, shape index: {}]   ;;  %s8167_s8 = inlined_call_operand.vmem [shape: bf16[8,32], index: 8, kind: input, shape index: {}]   ;;  %s8168_s9 = inlined_call_operand.vmem [shape: bf16[6,32,32], index: 9, kind: input, shape index: {}]   ;;  %s8169_s10 = inlined_call_operand.vmem [shape: f32[7,1,32], index: 10, kind: input, shape index: {}]   ;;  %s8170_s11 = inlined_call_operand.vmem [shape: f32[7,8,8], index: 11, kind: input, shape index: {}]   ;;  %s8171_s12 = inlined_call_operand.vmem [shape: f32[7,1,8], index: 12, kind: input, shape index: {}]   ;;  %s8172_s13 = inlined_call_operand.vmem [shape: f32[7,1,8], index: 13, kind: input, shape index: {}]   ;;  %s8173_s14 = inlined_call_operand.vmem [shape: f32[7,1,1], index: 14, kind: input, shape index: {}]   ;;  %s8174_s15 = inlined_call_operand.hbm [shape: f32[2,4], index: 15, kind: output, shape index: {}]  }
   0x1   :  { %v82_v0 = vld [vmem:[%s8170_s11] sm:$0xff] }
   0x2   :  { %v86_v1 = vpack.c.bf16 %v82_v0, %v82_v0  ;;  %v4997_v2 = vld [vmem:[%s8160_s1] sm:$0xff] }
   0x4   :  { %v125_v3 = vsel %vm8176_vm0, %v86_v1, 0 }
   0x5   :  { %134 = vmatpush.bf16.msra.mxu0 %v125_v3 }
   0x8   :  { %4213 = vmatmul.msk.bf16.vlgmr.msra.gmra.mxu0 %vm8175_vm1, %v4997_v2 }
   0x9   :  { %20 = vsyncpa [#allocation3], 0  ;;  %v5005_v4 = vld [vmem:[%s8160_s1 + $0x8] sm:$0xff]  ;;  %v5012_v5 = vld [vmem:[%s8160_s1 + $0x10] sm:$0xff]  ;;  %s4910_s25 = smov [#allocation2]   ;;  %s4188_s29 = sshll.u32 %s8174_s15, 4  ;;  %s4189_s29 = int_to_ptr.hbm [resolvable:$true] %s4188_s29 }
   0xa   :  { %v5019_v6 = vld [vmem:[%s8160_s1 + $0x18] sm:$0xff]  ;;  %v4520_v9 = vld [vmem:[%s8171_s12] ss:$0 sm:$0xff]  ;;  %s4186_s26 = sshll.u32 %s4910_s25, 4  ;;  %s4187_s26 = int_to_ptr.vmem [resolvable:$true] %s4186_s26 }
   0xb   :  { %v4521_v13 = vld [vmem:[%s8172_s13] ss:$0 sm:$0xff] }
   0xc   :  { %v4522_v50 = vld [vmem:[%s8173_s14] ss:$0 sm:$0xff] }
  0x18   :  { %4214 = vmatmul.msk.bf16.gmra.mxu0 %vm8175_vm1, %v5005_v4 }
  0x28   :  { %4215 = vmatmul.msk.bf16.gmra.mxu0 %vm8175_vm1, %v5012_v5 }
  0x38   :  { %4216 = vmatmul.msk.bf16.gmra.mxu0 %vm8175_vm1, %v5019_v6 }
  0x85   :  { %v136_v7 = vpop.f32.mrf.mxu0 }
  0x86   :  { %v137_v42 = vadd.f32 %v4520_v9, %v136_v7 }
  0x88   :  { %v156_v45 = vmax.f32 %v137_v42, 0.0 }
  0x8a   :  { %v167_v47 = vmul.f32 %v4521_v13, %v156_v45 }
  0x8c   :  { %v175_v48 = vsel %vm8175_vm1, %v167_v47, 0.0 }
  0x8d   :  { %v138_v8 = vpop.f32.mrf.mxu0 }
  0x8e   :  { %v139_v28 = vadd.f32 %v4520_v9, %v138_v8 }
  0x90   :  { %v157_v31 = vmax.f32 %v139_v28, 0.0 }
  0x92   :  { %v168_v36 = vmul.f32 %v4521_v13, %v157_v31 }
  0x94   :  { %v178_v39 = vsel %vm8175_vm1, %v168_v36, 0.0 }
  0x95   :  { %v141_v10 = vpop.f32.mrf.mxu0 }
  0x96   :  { %v142_v11 = vadd.f32 %v4520_v9, %v141_v10 }
  0x98   :  { %v158_v12 = vmax.f32 %v142_v11, 0.0 }
  0x9a   :  { %v169_v14 = vmul.f32 %v4521_v13, %v158_v12 }
  0x9c   :  { %v181_v15 = vsel %vm8175_vm1, %v169_v14, 0.0 }
  0x9d   :  { %v143_v16 = vpop.f32.mrf.mxu0  ;;  %182 = vadd.xlane.f32.xlu2 %v181_v15 }
  0x9e   :  { %v144_v17 = vadd.f32 %v4520_v9, %v143_v16 }
  0xa0   :  { %v159_v18 = vmax.f32 %v144_v17, 0.0 }
  0xa2   :  { %v170_v19 = vmul.f32 %v4521_v13, %v159_v18 }
  0xa4   :  { %v184_v20 = vsel %vm8175_vm1, %v170_v19, 0.0 }
  0xa5   :  { %v146_v21 = vpop.f32.mrf.mxu0  ;;  %185 = vadd.xlane.f32.xlu2 %v184_v20 }
  0xa6   :  { %v147_v22 = vadd.f32 %v4520_v9, %v146_v21 }
  0xa8   :  { %v160_v23 = vmax.f32 %v147_v22, 0.0 }
  0xaa   :  { %v171_v24 = vmul.f32 %v4521_v13, %v160_v23 }
  0xac   :  { %v187_v25 = vsel %vm8175_vm1, %v171_v24, 0.0 }
  0xad   :  { %v148_v26 = vpop.f32.mrf.mxu0  ;;  %188 = vadd.xlane.f32.xlu1 %v187_v25 }
  0xae   :  { %v149_v27 = vadd.f32 %v4520_v9, %v148_v26 }
  0xb0   :  { %v161_v29 = vmax.f32 %v149_v27, 0.0 }
  0xb2   :  { %v172_v30 = vmul.f32 %v4521_v13, %v161_v29 }
  0xb4   :  { %v190_v32 = vsel %vm8175_vm1, %v172_v30, 0.0 }
  0xb5   :  { %v151_v33 = vpop.f32.mrf.mxu0  ;;  %191 = vadd.xlane.f32.xlu1 %v190_v32 }
  0xb6   :  { %v152_v34 = vadd.f32 %v4520_v9, %v151_v33 }
  0xb8   :  { %v162_v35 = vmax.f32 %v152_v34, 0.0 }
  0xba   :  { %v173_v37 = vmul.f32 %v4521_v13, %v162_v35 }
  0xbc   :  { %v193_v38 = vsel %vm8175_vm1, %v173_v37, 0.0 }
  0xbd   :  { %v153_v40 = vpop.f32.mrf.mxu0  ;;  %194 = vadd.xlane.f32.xlu0 %v193_v38  ;;  %179 = vadd.xlane.f32.xlu1 %v178_v39 }
  0xbe   :  { %v154_v41 = vadd.f32 %v4520_v9, %v153_v40 }
  0xc0   :  { %v163_v43 = vmax.f32 %v154_v41, 0.0 }
  0xc2   :  { %v174_v44 = vmul.f32 %v4521_v13, %v163_v43 }
  0xc4   :  { %v196_v46 = vsel %vm8175_vm1, %v174_v44, 0.0 }
  0xc5   :  { %197 = vadd.xlane.f32.xlu0 %v196_v46 }
  0xcd   :  { %176 = vadd.xlane.f32.xlu0 %v175_v48 }
 0x110   :  { %v183_v49 = vpop.xlane.xlu2 %182 }
 0x111   :  { %v204_v52 = vadd.f32 %v4522_v50, %v183_v49 }
 0x113   :  { %v4219_v55 = vmul.f32 -1.442695, %v204_v52 }
 0x115   :  { %4549 = vpow2.f32 %v4219_v55 }
 0x118   :  { %v186_v53 = vpop.xlane.xlu2 %185 }
 0x119   :  { %v205_v56 = vadd.f32 %v4522_v50, %v186_v53 }
 0x11b   :  { %v4220_v60 = vmul.f32 -1.442695, %v205_v56  ;;  %v4550_v62 = vpop.eup %4549 }
 0x11c   :  { %v5040_v8 = vadd.f32 1.0, %v4550_v62 }
 0x11e   :  { %v281_v46 = vand.u32 2147483647, %v5040_v8  ;;  %v283_v47 = vand.u32 2147483648, %v5040_v8  ;;  %vm277_vm11 = vweird.f32 %v5040_v8 }
 0x120   :  { %v189_v51 = vpop.xlane.xlu1 %188 }
 0x121   :  { %v206_v54 = vadd.f32 %v4522_v50, %v189_v51 }
 0x123   :  { %v4221_v57 = vmul.f32 -1.442695, %v206_v54 }
 0x125   :  { %4551 = vpow2.f32 %v4221_v57 }
 0x128   :  { %v192_v58 = vpop.xlane.xlu1 %191 }
 0x129   :  { %v207_v59 = vadd.f32 %v4522_v50, %v192_v58 }
 0x12b   :  { %v4222_v61 = vmul.f32 -1.442695, %v207_v59  ;;  %v4552_v7 = vpop.eup %4551 }
 0x12c   :  { %v5042_v13 = vadd.f32 1.0, %v4552_v7 }
 0x12d   :  { %4553 = vpow2.f32 %v4222_v61 }
 0x12e   :  { %4555 = vpow2.f32 %v4220_v60  ;;  %v311_v51 = vand.u32 2147483647, %v5042_v13  ;;  %vm307_vm2 = vweird.f32 %v5042_v13  ;;  %v313_v58 = vand.u32 2147483648, %v5042_v13 }
 0x130   :  { %v195_v63 = vpop.xlane.xlu0 %194  ;;  %v180_v0 = vpop.xlane.xlu1 %179  ;;  %vm5111_vm9 = vcmp.eq.f32.partialorder %v311_v51, 8.507059e+37 }
 0x131   :  { %v208_v1 = vadd.f32 %v4522_v50, %v195_v63  ;;  %v203_v3 = vadd.f32 %v4522_v50, %v180_v0 }
 0x133   :  { %v4223_v9 = vmul.f32 -1.442695, %v208_v1  ;;  %v4218_v10 = vmul.f32 -1.442695, %v203_v3  ;;  %v4554_v11 = vpop.eup %4553 }
 0x134   :  { %v4556_v12 = vpop.eup %4555  ;;  %v5045_v14 = vadd.f32 1.0, %v4554_v11 }
 0x135   :  { %4557 = vpow2.f32 %v4223_v9  ;;  %v5047_v15 = vadd.f32 1.0, %v4556_v12 }
 0x136   :  { %4559 = vrcp.f32 %v5040_v8  ;;  %v328_v61 = vand.u32 2147483648, %v5045_v14  ;;  %vm322_vm15 = vweird.f32 %v5045_v14 }
 0x137   :  { %4561 = vpow2.f32 %v4218_v10  ;;  %v296_v48 = vand.u32 2147483647, %v5047_v15  ;;  %v298_v53 = vand.u32 2147483648, %v5047_v15  ;;  %vm292_vm7 = vweird.f32 %v5047_v15 }
 0x138   :  { %v198_v16 = vpop.xlane.xlu0 %197  ;;  %4563 = vrcp.f32 %v5042_v13 }
 0x139   :  { %v209_v17 = vadd.f32 %v4522_v50, %v198_v16  ;;  %4565 = vrcp.f32 %v5045_v14  ;;  %v5267_v16 = vld [vmem:[%s8163_s4] sm:$0xff] }
 0x13a   :  { %4567 = vrcp.f32 %v5047_v15 }
 0x13b   :  { %v4558_v18 = vpop.eup %4557  ;;  %v4224_v19 = vmul.f32 -1.442695, %v209_v17 }
 0x13c   :  { %v5051_v20 = vpop.eup %4559  ;;  %v5054_v21 = vadd.f32 1.0, %v4558_v18  ;;  %v326_v18 = vand.u32 2147483647, %v5045_v14 }
 0x13d   :  { %v4562_v22 = vpop.eup %4561  ;;  %4569 = vpow2.f32 %v4224_v19  ;;  %v273_v24 = vmul.f32 %v5051_v20, %v5040_v8  ;;  %vm278_vm6 = vweird.f32 %v5051_v20  ;;  %v329_v19 = vor.u32 1.1754944e-38, %v328_v61 }
 0x13e   :  { %4571 = vrcp.f32 %v5054_v21  ;;  %v5057_v23 = vpop.eup %4563  ;;  %v5061_v25 = vadd.f32 1.0, %v4562_v22  ;;  %vm337_vm10 = vweird.f32 %v5054_v21  ;;  %v343_v3 = vand.u32 2147483648, %v5054_v21 }
 0x13f   :  { %v5063_v27 = vpop.eup %4565  ;;  %v303_v30 = vmul.f32 %v5057_v23, %v5042_v13  ;;  %v274_v33 = vsub.f32 1.0, %v273_v24  ;;  %vm308_vm4 = vweird.f32 %v5057_v23  ;;  %v341_v10 = vand.u32 2147483647, %v5054_v21 }
 0x140   :  { %v177_v26 = vpop.xlane.xlu0 %176  ;;  %v5065_v29 = vpop.eup %4567  ;;  %4573 = vrcp.f32 %v5061_v25  ;;  %v318_v36 = vmul.f32 %v5063_v27, %v5045_v14  ;;  %vm323_vm5 = vweird.f32 %v5063_v27  ;;  %vm5128_vm13 = vmor %vm307_vm2, %vm308_vm4  ;;  %v284_v61 = vor.u32 1.1754944e-38, %v283_v47 }
 0x141   :  { %v202_v28 = vadd.f32 %v4522_v50, %v177_v26  ;;  %v288_v38 = vmul.f32 %v5065_v29, %v5047_v15  ;;  %v304_v39 = vsub.f32 1.0, %v303_v30  ;;  %v275_v41 = vmul.f32 %v5051_v20, %v274_v33  ;;  %vm5145_vm4 = vmor %vm322_vm15, %vm323_vm5 }
 0x142   :  { %v319_v42 = vsub.f32 1.0, %v318_v36  ;;  %vm293_vm3 = vweird.f32 %v5065_v29  ;;  %v344_v30 = vor.u32 1.1754944e-38, %v343_v3  ;;  %vm282_vm15 = vcmp.eq.f32.partialorder %v281_v46, 8.507059e+37 }
 0x143   :  { %v4570_v31 = vpop.eup %4569  ;;  %v4217_v32 = vmul.f32 -1.442695, %v202_v28  ;;  %v289_v43 = vsub.f32 1.0, %v288_v38  ;;  %v305_v45 = vmul.f32 %v5057_v23, %v304_v39  ;;  %v5091_v52 = vadd.f32 %v5051_v20, %v275_v41 }
 0x144   :  { %v5069_v34 = vpop.eup %4571  ;;  %v5072_v35 = vadd.f32 1.0, %v4570_v31  ;;  %v320_v56 = vmul.f32 %v5063_v27, %v319_v42 }
 0x145   :  { %4575 = vpow2.f32 %v4217_v32  ;;  %v333_v37 = vmul.f32 %v5069_v34, %v5054_v21  ;;  %v290_v59 = vmul.f32 %v5065_v29, %v289_v43  ;;  %v306_v60 = vadd.f32 %v5057_v23, %v305_v45 }
 0x146   :  { %4577 = vrcp.f32 %v5072_v35  ;;  %v5082_v44 = vpop.eup %4573  ;;  %vm338_vm8 = vweird.f32 %v5069_v34  ;;  %v358_v7 = vand.u32 2147483648, %v5072_v35  ;;  %v321_v9 = vadd.f32 %v5063_v27, %v320_v56 }
 0x147   :  { %v334_v40 = vsub.f32 1.0, %v333_v37  ;;  %v258_v1 = vmul.f32 %v5082_v44, %v5061_v25  ;;  %v356_v12 = vand.u32 2147483647, %v5072_v35  ;;  %vm5132_vm14 = vmor %vm337_vm10, %vm338_vm8  ;;  %v291_v21 = vadd.f32 %v5065_v29, %v290_v59 }
 0x148   :  { %vm352_vm2 = vweird.f32 %v5072_v35  ;;  %v359_v14 = vor.u32 1.1754944e-38, %v358_v7  ;;  %v310_v31 = vsel %vm5128_vm13, %v5057_v23, %v306_v60  ;;  %v325_v32 = vsel %vm5145_vm4, %v5063_v27, %v321_v9  ;;  %vm5169_vm13 = vmor %vm292_vm7, %vm293_vm3  ;;  %v5246_v7 = vld [vmem:[%s8161_s2] sm:$0xff]  ;;  %v78_v9 = vld [vmem:[%s8159_s0 + $0x10] sm:$0xff] }
 0x149   :  { %v335_v50 = vmul.f32 %v5069_v34, %v334_v40  ;;  %v259_v26 = vsub.f32 1.0, %v258_v1  ;;  %vm342_vm10 = vcmp.eq.f32.partialorder %v341_v10, 8.507059e+37  ;;  %vm357_vm5 = vcmp.eq.f32.partialorder %v356_v12, 8.507059e+37  ;;  %vm5202_vm3 = vmor %vm277_vm11, %vm278_vm6  ;;  %v79_v10 = vld [vmem:[%s8159_s0 + $0x18] sm:$0xff] }
 0x14a   :  { %v314_v37 = vor.u32 1.1754944e-38, %v313_v58  ;;  %v295_v42 = vsel %vm5169_vm13, %v5065_v29, %v291_v21  ;;  %v299_v45 = vor.u32 1.1754944e-38, %v298_v53  ;;  %v77_v29 = vld [vmem:[%s8159_s0 + $0x8] sm:$0xff]  ;;  %v280_v56 = vsel %vm5202_vm3, %v5051_v20, %v5091_v52 }
 0x14b   :  { %v4576_v49 = vpop.eup %4575  ;;  %v336_v62 = vadd.f32 %v5069_v34, %v335_v50  ;;  %v260_v40 = vmul.f32 %v5082_v44, %v259_v26  ;;  %v76_v50 = vld [vmem:[%s8159_s0] sm:$0xff]  ;;  %vm263_vm6 = vweird.f32 %v5082_v44  ;;  %v268_v20 = vand.u32 2147483648, %v5061_v25  ;;  %v5273_v21 = vld [vmem:[%s8163_s4 + $0x8] sm:$0xff] }
 0x14c   :  { %v4578_v54 = vpop.eup %4577  ;;  %v5094_v55 = vadd.f32 1.0, %v4576_v49  ;;  %v5176_v41 = vsel %vm5111_vm9, %v314_v37, %v310_v31  ;;  %v80_v49 = vld [vmem:[%s8167_s8] sm:$0xf]  ;;  %v362_v53 = vpack.c.bf16 %v77_v29, %v76_v50  ;;  %v4909_v12 = vmov 0  }
 0x14d   :  { %v348_v57 = vmul.f32 %v4578_v54, %v5072_v35  ;;  %vm353_vm12 = vweird.f32 %v4578_v54  ;;  %v340_v22 = vsel %vm5132_vm14, %v5069_v34, %v336_v62  ;;  %vm5183_vm14 = vcmp.eq.f32.partialorder %v296_v48, 8.507059e+37  ;;  %4519 = vset.pattern.permute.xlu1 %v4909_v12  ;;  %4517 = vset.pattern.permute.xlu2 %v4909_v12 }
 0x14e   :  { %4579 = vrcp.f32 %v5094_v55  ;;  %vm354_vm8 = vmor %vm352_vm2, %vm353_vm12  ;;  %v5157_v35 = vsel %vm342_vm10, %v344_v30, %v340_v22  ;;  %vm327_vm12 = vcmp.eq.f32.partialorder %v326_v18, 8.507059e+37  ;;  %v371_v51 = vsel %vm8176_vm0, %v80_v49, 0  ;;  %4518 = vset.pattern.permute.xlu0 %v4909_v12 }
 0x14f   :  { %v349_v63 = vsub.f32 1.0, %v348_v57  ;;  %v5163_v39 = vsel %vm327_vm12, %v329_v19, %v325_v32  ;;  %v253_v57 = vand.u32 2147483648, %v5094_v55  ;;  %380 = vmatpush.bf16.msra.mxu1 %v371_v51  ;;  %vm247_vm9 = vweird.f32 %v5094_v55 }
 0x150   :  { %v251_v59 = vand.u32 2147483647, %v5094_v55  ;;  %v261_v60 = vadd.f32 %v5082_v44, %v260_v40  ;;  %v5222_v62 = vsel %vm5183_vm14, %v299_v45, %v295_v42  ;;  %vm262_vm2 = vweird.f32 %v5061_v25 }
 0x151   :  { %v350_v11 = vmul.f32 %v4578_v54, %v349_v63  ;;  %v5230_v63 = vsel %vm282_vm15, %v284_v61, %v280_v56  ;;  %v254_v47 = vor.u32 1.1754944e-38, %v253_v57  ;;  %vm264_vm4 = vmor %vm262_vm2, %vm263_vm6  ;;  %v269_v1 = vor.u32 1.1754944e-38, %v268_v20 }
 0x152   :  { %4225 = vmatmul.msk.bf16.vlgmr.msra.gmra.mxu1 %vm8175_vm1, %v362_v53  ;;  %v393_v0 = vpack.c.bf16 %v5222_v62, %v5230_v63  ;;  %v265_v8 = vsel %vm264_vm4, %v5082_v44, %v261_v60  ;;  %v5253_v44 = vld [vmem:[%s8161_s2 + $0x8] sm:$0xff] }
 0x153   :  { %v351_v13 = vadd.f32 %v4578_v54, %v350_v11  ;;  %v363_v11 = vpack.c.bf16 %v79_v10, %v78_v9 }
 0x154   :  { %v4580_v28 = vpop.eup %4579 }
 0x155   :  { %v355_v33 = vsel %vm354_vm8, %v4578_v54, %v351_v13  ;;  %v243_v34 = vmul.f32 %v4580_v28, %v5094_v55  ;;  %vm248_vm7 = vweird.f32 %v4580_v28  ;;  %v394_v54 = vpack.c.bf16 %v5163_v39, %v5176_v41 }
 0x156   :  { %v5159_v36 = vsel %vm357_vm5, %v359_v14, %v355_v33  ;;  %vm249_vm11 = vmor %vm247_vm9, %vm248_vm7  ;;  %v266_v55 = vand.u32 2147483647, %v5061_v25  ;;  %vm252_vm8 = vcmp.eq.f32.partialorder %v251_v59, 8.507059e+37  ;;  %vm8177_vm5 = vcmask 523264   ;;  %v5282_v14 = vld [vmem:[%s8163_s4 + $0x10] sm:$0xff] }
 0x157   :  { %v395_v38 = vpack.c.bf16 %v5159_v36, %v5157_v35  ;;  %v244_v27 = vsub.f32 1.0, %v243_v34 }
 0x158   :  { %vm267_vm10 = vcmp.eq.f32.partialorder %v266_v55, 8.507059e+37 }
 0x159   :  { %417 = vmatpush.bf16.msra.mxu2 %v395_v38  ;;  %v245_v48 = vmul.f32 %v4580_v28, %v244_v27  ;;  %v5239_v25 = vsel %vm267_vm10, %v269_v1, %v265_v8  ;;  %v5288_v27 = vld [vmem:[%s8163_s4 + $0x18] sm:$0xff] }
 0x15b   :  { %v246_v58 = vadd.f32 %v4580_v28, %v245_v48 }
 0x15d   :  { %418 = vmatpush.bf16.msra.mxu2 %v394_v54  ;;  %v250_v52 = vsel %vm249_vm11, %v4580_v28, %v246_v58 }
 0x15e   :  { %v5237_v46 = vsel %vm252_vm8, %v254_v47, %v250_v52 }
 0x15f   :  { %v392_v3 = vpack.c.bf16 %v5239_v25, %v5237_v46 }
 0x161   :  { %419 = vmatpush.bf16.msra.mxu2 %v393_v0 }
 0x162   :  { %4226 = vmatmul.msk.bf16.gmra.mxu1 %vm8175_vm1, %v363_v11 }
 0x165   :  { %420 = vmatpush.bf16.msra.mxu2 %v392_v3 }
 0x168   :  { %4235 = vmatmul.msk.bf16.vlgmr.msra.gmra.mxu2 %vm8177_vm5, %v5246_v7 }
 0x178   :  { %4236 = vmatmul.msk.bf16.gmra.mxu2 %vm8177_vm5, %v5253_v44 }
 0x1eb   :  { %v422_v17 = vpop.f32.mrf.mxu2 }
 0x1ec   :  { %v423_v18 = vadd.f32 %v422_v17, %v5267_v16 }
 0x1ee   :  { %v436_v19 = vmax.f32 %v423_v18, 1e-12  ;;  %vm432_vm3 = vcmp.gt.f32.partialorder %v423_v18, 0.0 }
 0x1f0   :  { %4581 = vrsqrt.f32 %v436_v19  ;;  %vm446_vm13 = vweird.f32 %v436_v19 }
 0x1f3   :  { %v424_v22 = vpop.f32.mrf.mxu2 }
 0x1f4   :  { %v5276_v13 = vadd.f32 %v424_v22, %v5273_v21 }
 0x1f6   :  { %v4582_v24 = vpop.eup %4581  ;;  %v437_v26 = vmax.f32 %v5276_v13, 1e-12 }
 0x1f7   :  { %v441_v28 = vmul.f32 %v4582_v24, %v436_v19  ;;  %vm447_vm12 = vweird.f32 %v4582_v24 }
 0x1f8   :  { %4583 = vrsqrt.f32 %v437_v26  ;;  %vm448_vm14 = vmor %vm446_vm13, %vm447_vm12  ;;  %vm456_vm4 = vweird.f32 %v437_v26 }
 0x1f9   :  { %v442_v30 = vmul.f32 %v4582_v24, %v441_v28  ;;  %v5331_v28 = vld [vmem:[%s8162_s3] sm:$0xff] }
 0x1fb   :  { %v443_v31 = vmul.f32 0.5, %v442_v30  ;;  %v427_v32 = vpop.f32.mrf.mxu2  ;;  %v5336_v30 = vld [vmem:[%s8162_s3 + $0x8] sm:$0xff] }
 0x1fc   :  { %v428_v33 = vadd.f32 %v427_v32, %v5282_v14  ;;  %v4500_v32 = vld [vmem:[%s8162_s3 + $0x18] sm:$0xff] }
 0x1fd   :  { %v444_v34 = vsub.f32 1.5, %v443_v31  ;;  %v5345_v31 = vld [vmem:[%s8162_s3 + $0x10] sm:$0xff] }
 0x1fe   :  { %v438_v37 = vmax.f32 %v428_v33, 1e-12  ;;  %v4584_v23 = vpop.eup %4583  ;;  %vm434_vm11 = vcmp.gt.f32.partialorder %v428_v33, 0.0 }
 0x1ff   :  { %v445_v38 = vmul.f32 %v4582_v24, %v444_v34  ;;  %v451_v43 = vmul.f32 %v4584_v23, %v437_v26  ;;  %vm457_vm15 = vweird.f32 %v4584_v23 }
 0x200   :  { %4585 = vrsqrt.f32 %v438_v37  ;;  %vm466_vm6 = vweird.f32 %v438_v37  ;;  %vm458_vm8 = vmor %vm456_vm4, %vm457_vm15 }
 0x201   :  { %v449_v40 = vsel %vm448_vm14, %v4582_v24, %v445_v38  ;;  %v452_v48 = vmul.f32 %v4584_v23, %v451_v43  ;;  %vm433_vm14 = vcmp.gt.f32.partialorder %v5276_v13, 0.0 }
 0x202   :  { %v480_v42 = vsel %vm432_vm3, %v449_v40, 0.0  ;;  %vm530_vm3 = vcmask 261120  }
 0x203   :  { %v429_v45 = vpop.f32.mrf.mxu2  ;;  %486 = vperm.xlu1 %4519, %v480_v42   ;;  %v453_v54 = vmul.f32 0.5, %v452_v48 }
 0x204   :  { %v430_v49 = vadd.f32 %v429_v45, %v5288_v27 }
 0x205   :  { %v454_v60 = vsub.f32 1.5, %v453_v54 }
 0x206   :  { %v4586_v50 = vpop.eup %4585  ;;  %v439_v29 = vmax.f32 %v430_v49, 1e-12  ;;  %vm435_vm13 = vcmp.gt.f32.partialorder %v430_v49, 0.0 }
 0x207   :  { %v461_v15 = vmul.f32 %v4586_v50, %v438_v37  ;;  %vm467_vm7 = vweird.f32 %v4586_v50  ;;  %v455_v47 = vmul.f32 %v4584_v23, %v454_v60 }
 0x208   :  { %4587 = vrsqrt.f32 %v439_v29  ;;  %vm468_vm9 = vmor %vm466_vm6, %vm467_vm7  ;;  %vm476_vm10 = vweird.f32 %v439_v29 }
 0x209   :  { %v462_v51 = vmul.f32 %v4586_v50, %v461_v15  ;;  %v459_v8 = vsel %vm458_vm8, %v4584_v23, %v455_v47 }
 0x20a   :  { %v481_v9 = vsel %vm433_vm14, %v459_v8, 0.0 }
 0x20b   :  { %v463_v53 = vmul.f32 0.5, %v462_v51  ;;  %609 = vperm.xlu1 %4519, %v5159_v36  }
 0x20d   :  { %v464_v56 = vsub.f32 1.5, %v463_v53 }
 0x20e   :  { %v4588_v57 = vpop.eup %4587 }
 0x20f   :  { %v471_v58 = vmul.f32 %v4588_v57, %v439_v29  ;;  %v465_v59 = vmul.f32 %v4586_v50, %v464_v56  ;;  %vm477_vm2 = vweird.f32 %v4588_v57 }
 0x210   :  { %vm478_vm12 = vmor %vm476_vm10, %vm477_vm2 }
 0x211   :  { %v469_v61 = vsel %vm468_vm9, %v4586_v50, %v465_v59  ;;  %v472_v20 = vmul.f32 %v4588_v57, %v471_v58 }
 0x212   :  { %v482_v52 = vsel %vm434_vm11, %v469_v61, 0.0 }
 0x213   :  { %496 = vperm.xlu2 %4517, %v482_v52   ;;  %599 = vperm.xlu1 %4519, %v5163_v39   ;;  %v473_v55 = vmul.f32 0.5, %v472_v20  ;;  %v382_v39 = vpop.f32.mrf.mxu1 }
 0x215   :  { %v474_v36 = vsub.f32 1.5, %v473_v55 }
 0x217   :  { %v475_v0 = vmul.f32 %v4588_v57, %v474_v36 }
 0x219   :  { %v479_v1 = vsel %vm478_vm12, %v4588_v57, %v475_v0 }
 0x21a   :  { %v483_v3 = vsel %vm435_vm13, %v479_v1, 0.0 }
 0x21b   :  { %501 = vperm.xlu0 %4518, %v483_v3   ;;  %491 = vperm.xlu2 %4517, %v481_v9   ;;  %v384_v10 = vpop.f32.mrf.mxu1 }
 0x21c   :  { %574 = vperm.xlu1 %4519, %v5237_v46  }
 0x223   :  { %584 = vperm.xlu0 %4518, %v5230_v63   ;;  %604 = vperm.xlu2 %4517, %v5157_v35   ;;  %v387_v12 = vpop.f32.mrf.mxu1  ;;  %v4260_v35 = vld [vmem:[%s8170_s11 + $0x8] sm:$0xff] }
 0x224   :  { %v748_v13 = vpack.c.bf16 %v4260_v35, %v4260_v35 }
 0x226   :  { %v753_v26 = vsel %vm8176_vm0, %v748_v13, 0 }
 0x22b   :  { %579 = vperm.xlu0 %4518, %v5239_v25   ;;  %594 = vperm.xlu2 %4517, %v5176_v41   ;;  %v389_v18 = vpop.f32.mrf.mxu1 }
 0x233   :  { %589 = vperm.xlu2 %4517, %v5222_v62  }
 0x26d   :  { %v5300_v11 = vpop.permute.xlu2 %496 }
 0x26e   :  { %v5312_v41 = vmul.f32 %v5300_v11, %v387_v12 }
 0x275   :  { %v5302_v17 = vpop.permute.xlu2 %491  ;;  %v5304_v19 = vpop.permute.xlu1 %486 }
 0x276   :  { %v5318_v63 = vmul.f32 %v5302_v17, %v384_v10  ;;  %v5321_v25 = vmul.f32 %v5304_v19, %v382_v39 }
 0x278   :  { %v508_v24 = vpack.c.bf16 %v5318_v63, %v5321_v25 }
 0x27d   :  { %v605_v29 = vpop.permute.xlu2 %604  ;;  %v610_v51 = vpop.permute.xlu1 %609 }
 0x285   :  { %v595_v59 = vpop.permute.xlu2 %594  ;;  %v600_v8 = vpop.permute.xlu1 %599 }
 0x28d   :  { %v5306_v46 = vpop.permute.xlu0 %501  ;;  %v590_v12 = vpop.permute.xlu2 %589 }
 0x28e   :  { %v5315_v62 = vmul.f32 %v5306_v46, %v389_v18 }
 0x290   :  { %v509_v22 = vpack.c.bf16 %v5315_v62, %v5312_v41 }
 0x292   :  { %549 = vmatpush.bf16.msrb.mxu2 %v509_v22  ;;  %4513 = vmatpush.bf16.msra.mxu3 %v509_v22 }
 0x295   :  { %v585_v61 = vpop.permute.xlu0 %584 }
 0x296   :  { %550 = vmatpush.bf16.msrb.mxu2 %v508_v24  ;;  %4514 = vmatpush.bf16.msra.mxu3 %v508_v24 }
 0x299   :  { %4253 = vmatmul.msk.bf16.vlgmr.msrb.gmra.mxu2 %vm530_vm3, %v5331_v28  ;;  %4254 = vmatmul.msk.bf16.vlgmr.msra.gmra.mxu3 %vm530_vm3, %v5336_v30 }
 0x29a   :  { %762 = vmatpush.bf16.msra.mxu2 %v753_v26 }
 0x2a9   :  { %4255 = vmatmul.msk.bf16.gmra.mxu3 %vm530_vm3, %v5345_v31  ;;  %4264 = vmatmul.msk.bf16.vlgmr.msra.gmra.mxu2 %vm8175_vm1, %v4997_v2  ;;  %v5364_v2 = vld [vmem:[%s8171_s12 + $0x1] ss:$0 sm:$0xff] }
 0x2b9   :  { %4256 = vmatmul.msk.bf16.gmra.mxu3 %vm530_vm3, %v4500_v32  ;;  %4265 = vmatmul.msk.bf16.gmra.mxu2 %vm8175_vm1, %v5005_v4  ;;  %v5370_v4 = vld [vmem:[%s8172_s13 + $0x1] ss:$0 sm:$0xff]  ;;  %v580_v32 = vpop.permute.xlu0 %579 }
 0x2c9   :  { %4266 = vmatmul.msk.bf16.gmra.mxu2 %vm8175_vm1, %v5012_v5 }
 0x2d9   :  { %4267 = vmatmul.msk.bf16.gmra.mxu2 %vm8175_vm1, %v5019_v6 }
 0x31c   :  { %v552_v33 = vpop.f32.mrf.mxu2  ;;  %v557_v34 = vpop.f32.mrf.mxu3 }
 0x31d   :  { %v614_v24 = vmul.f32 %v585_v61, %v557_v34 }
 0x324   :  { %v554_v37 = vpop.f32.mrf.mxu2  ;;  %v559_v38 = vpop.f32.mrf.mxu3 }
 0x325   :  { %v615_v18 = vmul.f32 %v590_v12, %v559_v38 }
 0x32c   :  { %v562_v23 = vpop.f32.mrf.mxu3  ;;  %v764_v40 = vpop.f32.mrf.mxu2 }
 0x32d   :  { %v765_v42 = vadd.f32 %v5364_v2, %v764_v40  ;;  %v616_v39 = vmul.f32 %v595_v59, %v562_v23  ;;  %v613_v40 = vmul.f32 %v580_v32, %v554_v37 }
 0x32f   :  { %v784_v5 = vmax.f32 %v765_v42, 0.0 }
 0x331   :  { %v795_v6 = vmul.f32 %v5370_v4, %v784_v5  ;;  %v621_v5 = vpack.c.bf16 %v615_v18, %v614_v24 }
 0x333   :  { %v803_v43 = vsel %vm8175_vm1, %v795_v6, 0.0  ;;  %v575_v6 = vpop.permute.xlu1 %574 }
 0x334   :  { %v564_v45 = vpop.f32.mrf.mxu3  ;;  %v766_v49 = vpop.f32.mrf.mxu2  ;;  %804 = vadd.xlane.f32.xlu0 %v803_v43  ;;  %v612_v23 = vmul.f32 %v575_v6, %v552_v33 }
 0x335   :  { %v767_v50 = vadd.f32 %v5364_v2, %v766_v49  ;;  %v617_v1 = vmul.f32 %v600_v8, %v564_v45 }
 0x336   :  { %v620_v45 = vpack.c.bf16 %v613_v40, %v612_v23 }
 0x337   :  { %v785_v15 = vmax.f32 %v767_v50, 0.0  ;;  %v622_v22 = vpack.c.bf16 %v617_v1, %v616_v39 }
 0x339   :  { %v796_v48 = vmul.f32 %v5370_v4, %v785_v15 }
 0x33b   :  { %v806_v53 = vsel %vm8175_vm1, %v796_v48, 0.0 }
 0x33c   :  { %v567_v54 = vpop.f32.mrf.mxu3  ;;  %v769_v56 = vpop.f32.mrf.mxu2  ;;  %807 = vadd.xlane.f32.xlu1 %v806_v53 }
 0x33d   :  { %v770_v57 = vadd.f32 %v5364_v2, %v769_v56  ;;  %v618_v47 = vmul.f32 %v605_v29, %v567_v54 }
 0x33f   :  { %v786_v58 = vmax.f32 %v770_v57, 0.0 }
 0x341   :  { %v797_v60 = vmul.f32 %v5370_v4, %v786_v58 }
 0x343   :  { %v809_v20 = vsel %vm8175_vm1, %v797_v60, 0.0 }
 0x344   :  { %v569_v52 = vpop.f32.mrf.mxu3  ;;  %v771_v55 = vpop.f32.mrf.mxu2  ;;  %810 = vadd.xlane.f32.xlu1 %v809_v20  ;;  %v4525_v20 = vld [vmem:[%s8173_s14 + $0x1] ss:$0 sm:$0xff] }
 0x345   :  { %v619_v36 = vmul.f32 %v610_v51, %v569_v52  ;;  %v772_v0 = vadd.f32 %v5364_v2, %v771_v55 }
 0x347   :  { %v787_v3 = vmax.f32 %v772_v0, 0.0  ;;  %v623_v9 = vpack.c.bf16 %v619_v36, %v618_v47 }
 0x349   :  { %652 = vmatpush.bf16.msrb.mxu1 %v623_v9  ;;  %v798_v10 = vmul.f32 %v5370_v4, %v787_v3 }
 0x34b   :  { %v812_v35 = vsel %vm8175_vm1, %v798_v10, 0.0 }
 0x34c   :  { %v774_v13 = vpop.f32.mrf.mxu2  ;;  %813 = vadd.xlane.f32.xlu2 %v812_v35 }
 0x34d   :  { %v775_v26 = vadd.f32 %v5364_v2, %v774_v13  ;;  %653 = vmatpush.bf16.msrb.mxu1 %v622_v22 }
 0x34f   :  { %v788_v42 = vmax.f32 %v775_v26, 0.0 }
 0x351   :  { %654 = vmatpush.bf16.msrb.mxu1 %v621_v5  ;;  %v799_v43 = vmul.f32 %v5370_v4, %v788_v42 }
 0x353   :  { %v815_v38 = vsel %vm8175_vm1, %v799_v43, 0.0 }
 0x354   :  { %v776_v49 = vpop.f32.mrf.mxu2  ;;  %816 = vadd.xlane.f32.xlu0 %v815_v38 }
 0x355   :  { %v777_v50 = vadd.f32 %v5364_v2, %v776_v49  ;;  %655 = vmatpush.bf16.msrb.mxu1 %v620_v45 }
 0x357   :  { %v789_v34 = vmax.f32 %v777_v50, 0.0 }
 0x358   :  { %4257 = vmatmul.msk.bf16.vlgmr.msrb.gmra.mxu1 %vm8177_vm5, %v5246_v7 }
 0x359   :  { %v800_v37 = vmul.f32 %v5370_v4, %v789_v34 }
 0x35b   :  { %v818_v29 = vsel %vm8175_vm1, %v800_v37, 0.0 }
 0x35c   :  { %v779_v33 = vpop.f32.mrf.mxu2  ;;  %819 = vadd.xlane.f32.xlu2 %v818_v29 }
 0x35d   :  { %v780_v15 = vadd.f32 %v5364_v2, %v779_v33 }
 0x35f   :  { %v790_v48 = vmax.f32 %v780_v15, 0.0 }
 0x361   :  { %v801_v51 = vmul.f32 %v5370_v4, %v790_v48 }
 0x363   :  { %v821_v53 = vsel %vm8175_vm1, %v801_v51, 0.0 }
 0x364   :  { %v781_v54 = vpop.f32.mrf.mxu2  ;;  %822 = vadd.xlane.f32.xlu2 %v821_v53 }
 0x365   :  { %v782_v56 = vadd.f32 %v5364_v2, %v781_v54 }
 0x367   :  { %v791_v57 = vmax.f32 %v782_v56, 0.0 }
 0x368   :  { %631 = vperm.xlu0 %4518, %v5273_v21   ;;  %4258 = vmatmul.msk.bf16.gmra.mxu1 %vm8177_vm5, %v5253_v44 }
 0x369   :  { %v802_v58 = vmul.f32 %v5370_v4, %v791_v57 }
 0x36b   :  { %v824_v59 = vsel %vm8175_vm1, %v802_v58, 0.0 }
 0x36c   :  { %825 = vadd.xlane.f32.xlu1 %v824_v59 }
 0x370   :  { %641 = vperm.xlu0 %4518, %v5288_v27  }
 0x37c   :  { %626 = vperm.xlu2 %4517, %v5267_v16  }
 0x385   :  { %636 = vperm.xlu1 %4519, %v5282_v14  }
 0x3a7   :  { %v805_v61 = vpop.xlane.xlu0 %804 }
 0x3a8   :  { %v830_v4 = vadd.f32 %v4525_v20, %v805_v61 }
 0x3aa   :  { %v4268_v3 = vmul.f32 -1.442695, %v830_v4 }
 0x3af   :  { %v808_v60 = vpop.xlane.xlu1 %807 }
 0x3b0   :  { %v831_v36 = vadd.f32 %v4525_v20, %v808_v60 }
 0x3b2   :  { %v4269_v9 = vmul.f32 -1.442695, %v831_v36 }
 0x3b7   :  { %v811_v2 = vpop.xlane.xlu1 %810 }
 0x3b8   :  { %v832_v55 = vadd.f32 %v4525_v20, %v811_v2 }
 0x3ba   :  { %v4270_v0 = vmul.f32 -1.442695, %v832_v55 }
 0x3bc   :  { %4589 = vpow2.f32 %v4270_v0 }
 0x3bf   :  { %v814_v52 = vpop.xlane.xlu2 %813 }
 0x3c0   :  { %v833_v47 = vadd.f32 %v4525_v20, %v814_v52 }
 0x3c2   :  { %v4271_v1 = vmul.f32 -1.442695, %v833_v47  ;;  %v4590_v22 = vpop.eup %4589 }
 0x3c3   :  { %v5406_v32 = vadd.f32 1.0, %v4590_v22 }
 0x3c4   :  { %4591 = vpow2.f32 %v4271_v1 }
 0x3c5   :  { %4593 = vpow2.f32 %v4268_v3 }
 0x3c6   :  { %4595 = vpow2.f32 %v4269_v9 }
 0x3c7   :  { %v817_v8 = vpop.xlane.xlu0 %816 }
 0x3c8   :  { %v834_v39 = vadd.f32 %v4525_v20, %v817_v8 }
 0x3ca   :  { %v4272_v18 = vmul.f32 -1.442695, %v834_v39  ;;  %v4592_v24 = vpop.eup %4591 }
 0x3cb   :  { %v4594_v26 = vpop.eup %4593  ;;  %v5408_v6 = vadd.f32 1.0, %v4592_v24 }
 0x3cc   :  { %v4596_v42 = vpop.eup %4595  ;;  %v5410_v23 = vadd.f32 1.0, %v4594_v26 }
 0x3cd   :  { %v5412_v45 = vadd.f32 1.0, %v4596_v42  ;;  %vm920_vm8 = vweird.f32 %v5408_v6 }
 0x3cf   :  { %v820_v10 = vpop.xlane.xlu2 %819  ;;  %v894_v26 = vand.u32 2147483647, %v5412_v45  ;;  %vm890_vm14 = vweird.f32 %v5412_v45 }
 0x3d0   :  { %v835_v12 = vadd.f32 %v4525_v20, %v820_v10 }
 0x3d2   :  { %v4273_v35 = vmul.f32 -1.442695, %v835_v12 }
 0x3d4   :  { %4597 = vpow2.f32 %v4273_v35 }
 0x3d5   :  { %v657_v13 = vpop.f32.mrf.mxu1  ;;  %4599 = vpow2.f32 %v4272_v18 }
 0x3d6   :  { %4601 = vrcp.f32 %v5406_v32 }
 0x3d7   :  { %v823_v40 = vpop.xlane.xlu2 %822 }
 0x3d8   :  { %v836_v5 = vadd.f32 %v4525_v20, %v823_v40 }
 0x3da   :  { %v4274_v43 = vmul.f32 -1.442695, %v836_v5  ;;  %v4598_v38 = vpop.eup %4597  ;;  %v5441_v61 = vpop.permute.xlu0 %631 }
 0x3db   :  { %v4600_v49 = vpop.eup %4599  ;;  %v5417_v50 = vadd.f32 1.0, %v4598_v38  ;;  %v645_v12 = vmul.f32 %v5441_v61, %v5318_v63  ;;  %v896_v63 = vand.u32 2147483648, %v5412_v45  ;;  %v909_v38 = vand.u32 2147483647, %v5406_v32 }
 0x3dc   :  { %4603 = vpow2.f32 %v4274_v43  ;;  %v5420_v34 = vadd.f32 1.0, %v4600_v49  ;;  %v5422_v15 = vpop.eup %4601  ;;  %v924_v49 = vand.u32 2147483647, %v5408_v6 }
 0x3dd   :  { %4605 = vrcp.f32 %v5408_v6  ;;  %v659_v37 = vpop.f32.mrf.mxu1  ;;  %v901_v58 = vmul.f32 %v5422_v15, %v5406_v32  ;;  %vm950_vm6 = vweird.f32 %v5417_v50 }
 0x3de   :  { %4607 = vrcp.f32 %v5410_v23  ;;  %v660_v43 = vadd.f32 %v659_v37, %v645_v12  ;;  %v941_v37 = vand.u32 2147483648, %v5420_v34  ;;  %vm935_vm9 = vweird.f32 %v5420_v34 }
 0x3df   :  { %4609 = vrcp.f32 %v5412_v45  ;;  %v826_v29 = vpop.xlane.xlu1 %825  ;;  %v5447_v52 = vpop.permute.xlu2 %626  ;;  %v902_v4 = vsub.f32 1.0, %v901_v58  ;;  %v926_v58 = vand.u32 2147483648, %v5408_v6  ;;  %v956_v12 = vand.u32 2147483648, %v5417_v50 }
 0x3e0   :  { %v837_v33 = vadd.f32 %v4525_v20, %v826_v29  ;;  %4611 = vrcp.f32 %v5417_v50  ;;  %v644_v3 = vmul.f32 %v5447_v52, %v5321_v25 }
 0x3e1   :  { %4613 = vrcp.f32 %v5420_v34  ;;  %v903_v22 = vmul.f32 %v5422_v15, %v902_v4 }
 0x3e2   :  { %v4604_v48 = vpop.eup %4603  ;;  %v4275_v51 = vmul.f32 -1.442695, %v837_v33  ;;  %v658_v40 = vadd.f32 %v657_v13, %v644_v3  ;;  %v5480_v33 = vpop.permute.xlu0 %641  ;;  %v668_v3 = vmul.f32 %v660_v43, %v5302_v17 }
 0x3e3   :  { %v5425_v53 = vpop.eup %4605  ;;  %v5428_v54 = vadd.f32 1.0, %v4604_v48  ;;  %v5484_v13 = vadd.f32 %v5422_v15, %v903_v22 }
 0x3e4   :  { %v5430_v56 = vpop.eup %4607  ;;  %4615 = vpow2.f32 %v4275_v51  ;;  %v916_v59 = vmul.f32 %v5425_v53, %v5408_v6  ;;  %v939_v51 = vand.u32 2147483647, %v5420_v34  ;;  %v667_v4 = vmul.f32 %v658_v40, %v5304_v19  ;;  %v4526_v19 = vld [vmem:[%s8169_s10] ss:$0 sm:$0xff] }
 0x3e5   :  { %v5432_v57 = vpop.eup %4609  ;;  %4617 = vrcp.f32 %v5428_v54  ;;  %v871_v60 = vmul.f32 %v5430_v56, %v5410_v23  ;;  %v5451_v47 = vpop.f32.mrf.mxu1  ;;  %vm921_vm11 = vweird.f32 %v5425_v53  ;;  %vm965_vm15 = vweird.f32 %v5428_v54 }
 0x3e6   :  { %v5443_v2 = vpop.eup %4611  ;;  %v886_v20 = vmul.f32 %v5432_v57, %v5412_v45  ;;  %v917_v0 = vsub.f32 1.0, %v916_v59  ;;  %v971_v17 = vand.u32 2147483648, %v5428_v54  ;;  %v5520_v43 = vadd.f32 %v4526_v19, %v667_v4 }
 0x3e7   :  { %v5449_v55 = vpop.eup %4613  ;;  %v946_v1 = vmul.f32 %v5443_v2, %v5417_v50  ;;  %v872_v39 = vsub.f32 1.0, %v871_v60  ;;  %vm951_vm10 = vweird.f32 %v5443_v2  ;;  %v879_v6 = vand.u32 2147483647, %v5410_v23 }
 0x3e8   :  { %v887_v18 = vsub.f32 1.0, %v886_v20  ;;  %v931_v35 = vmul.f32 %v5449_v55, %v5420_v34  ;;  %v918_v25 = vmul.f32 %v5425_v53, %v917_v0  ;;  %vm936_vm7 = vweird.f32 %v5449_v55 }
 0x3e9   :  { %v947_v42 = vsub.f32 1.0, %v946_v1  ;;  %v5472_v5 = vmul.f32 %v5430_v56, %v872_v39  ;;  %v954_v1 = vand.u32 2147483647, %v5417_v50 }
 0x3ea   :  { %v4616_v36 = vpop.eup %4615  ;;  %v5478_v29 = vmul.f32 %v5432_v57, %v887_v18  ;;  %v932_v48 = vsub.f32 1.0, %v931_v35  ;;  %v5491_v60 = vadd.f32 %v5425_v53, %v918_v25  ;;  %v969_v18 = vand.u32 2147483647, %v5428_v54 }
 0x3eb   :  { %v5453_v8 = vpop.eup %4617  ;;  %v5459_v9 = vadd.f32 1.0, %v4616_v36  ;;  %v948_v0 = vmul.f32 %v5443_v2, %v947_v42  ;;  %vm5539_vm5 = vcmp.eq.f32.partialorder %v954_v1, 8.507059e+37 }
 0x3ec   :  { %v961_v10 = vmul.f32 %v5453_v8, %v5428_v54  ;;  %v933_v35 = vmul.f32 %v5449_v55, %v932_v48  ;;  %vm966_vm2 = vweird.f32 %v5453_v8  ;;  %vm970_vm13 = vcmp.eq.f32.partialorder %v969_v18, 8.507059e+37 }
 0x3ed   :  { %4619 = vrcp.f32 %v5459_v9  ;;  %v664_v36 = vpop.f32.mrf.mxu1  ;;  %v986_v40 = vand.u32 2147483648, %v5459_v9  ;;  %v949_v42 = vadd.f32 %v5443_v2, %v948_v0  ;;  %vm5533_vm1 = vmor %vm965_vm15, %vm966_vm2  ;;  %vm980_vm0 = vweird.f32 %v5459_v9 }
 0x3ee   :  { %v962_v24 = vsub.f32 1.0, %v961_v10  ;;  %v647_v10 = vmul.f32 %v5480_v33, %v5315_v62  ;;  %vm5552_vm15 = vmor %vm950_vm6, %vm951_vm10  ;;  %vm876_vm2 = vweird.f32 %v5430_v56  ;;  %v889_v4 = vadd.f32 %v5432_v57, %v5478_v29  ;;  %v4501_v29 = vld [vmem:[%s8168_s9] sm:$0xff] }
 0x3ef   :  { %v953_v50 = vsel %vm5552_vm15, %v5443_v2, %v949_v42  ;;  %vm8218_vm6 = vweird.f32 %v5422_v15  ;;  %vm895_vm15 = vcmp.eq.f32.partialorder %v894_v26, 8.507059e+37 }
 0x3f0   :  { %v963_v59 = vmul.f32 %v5453_v8, %v962_v24  ;;  %v665_v62 = vadd.f32 %v664_v36, %v647_v10  ;;  %v984_v36 = vand.u32 2147483647, %v5459_v9 }
 0x3f2   :  { %v964_v24 = vadd.f32 %v5453_v8, %v963_v59  ;;  %v670_v10 = vmul.f32 %v665_v62, %v5306_v46  ;;  %v972_v46 = vor.u32 1.1754944e-38, %v971_v17 }
 0x3f3   :  { %v4620_v20 = vpop.eup %4619 }
 0x3f4   :  { %v976_v39 = vmul.f32 %v4620_v20, %v5459_v9  ;;  %vm981_vm12 = vweird.f32 %v4620_v20  ;;  %v968_v54 = vsel %vm5533_vm1, %v5453_v8, %v964_v24  ;;  %v678_v8 = vsel %vm530_vm3, %v5520_v43, 0.0 }
 0x3f5   :  { %vm982_vm4 = vmor %vm980_vm0, %vm981_vm12  ;;  %vm985_vm1 = vcmp.eq.f32.partialorder %v984_v36, 8.507059e+37  ;;  %v5567_v24 = vsel %vm970_vm13, %v972_v46, %v968_v54  ;;  %vm910_vm12 = vcmp.eq.f32.partialorder %v909_v38, 8.507059e+37  ;;  %vm875_vm13 = vweird.f32 %v5410_v23 }
 0x3f6   :  { %v977_v22 = vsub.f32 1.0, %v976_v39  ;;  %v5527_v39 = vadd.f32 %v4526_v19, %v668_v3  ;;  %vm5575_vm0 = vmor %vm935_vm9, %vm936_vm7  ;;  %vm8219_vm9 = vweird.f32 %v5406_v32 }
 0x3f7   :  { %v5515_v25 = vpop.permute.xlu1 %636  ;;  %vm5599_vm7 = vmor %vm920_vm8, %vm921_vm11  ;;  %vm8222_vm8 = vweird.f32 %v5432_v57 }
 0x3f8   :  { %v646_v48 = vmul.f32 %v5515_v25, %v5312_v41  ;;  %v978_v59 = vmul.f32 %v4620_v20, %v977_v22  ;;  %v934_v41 = vadd.f32 %v5449_v55, %v933_v35  ;;  %v679_v62 = vsel %vm530_vm3, %v5527_v39, 0.0  ;;  %vm5622_vm11 = vmor %vm8219_vm9, %vm8218_vm6 }
 0x3f9   :  { %v680_v36 = vadd.f32 %v679_v62, %v678_v8  ;;  %vm5650_vm10 = vmor %vm890_vm14, %vm8222_vm8  ;;  %vm8227_vm9 = vcmask 1043456  }
 0x3fa   :  { %v663_v3 = vadd.f32 %v5451_v47, %v646_v48  ;;  %v979_v22 = vadd.f32 %v4620_v20, %v978_v59  ;;  %v987_v47 = vor.u32 1.1754944e-38, %v986_v40  ;;  %v938_v42 = vsel %vm5575_vm0, %v5449_v55, %v934_v41  ;;  %v4502_v55 = vld [vmem:[%s8168_s9 + $0x8] sm:$0xff]  ;;  %vm877_vm14 = vmor %vm875_vm13, %vm876_vm2 }
 0x3fb   :  { %v942_v48 = vor.u32 1.1754944e-38, %v941_v37  ;;  %v923_v37 = vsel %vm5599_vm7, %v5425_v53, %v5491_v60  ;;  %v874_v53 = vadd.f32 %v5430_v56, %v5472_v5  ;;  %1016 = vmatpush.bf16.msrb.mxu0 %v4502_v55  ;;  %vm8225_vm2 = vcmask 523264  }
 0x3fc   :  { %v669_v1 = vmul.f32 %v663_v3, %v5300_v11  ;;  %v983_v35 = vsel %vm982_vm4, %v4620_v20, %v979_v22  ;;  %v957_v11 = vor.u32 1.1754944e-38, %v956_v12  ;;  %v5579_v20 = vadd.f32 %v4526_v19, %v670_v10  ;;  %vm8226_vm0 = vmmov %vm8225_vm2 }
 0x3fd   :  { %v5569_v18 = vsel %vm985_vm1, %v987_v47, %v983_v35  ;;  %v911_v12 = vand.u32 2147483648, %v5406_v32  ;;  %vm925_vm4 = vcmp.eq.f32.partialorder %v924_v49, 8.507059e+37  ;;  %v881_v22 = vand.u32 2147483648, %v5410_v23 }
 0x3fe   :  { %8215 = vst [vmem:[#allocation5_spill] sm:$0xff] %v5579_v20  ;;  %v5581_v40 = vadd.f32 %v4526_v19, %v669_v1  ;;  %v1032_v2 = vpack.c.bf16 %v5569_v18, %v5567_v24  ;;  %v5592_v59 = vsel %vm5539_vm5, %v957_v11, %v953_v50  ;;  %vm940_vm5 = vcmp.eq.f32.partialorder %v939_v51, 8.507059e+37 }
 0x3ff   :  { %v5616_v0 = vsel %vm940_vm5, %v942_v48, %v938_v42  ;;  %v927_v51 = vor.u32 1.1754944e-38, %v926_v58  ;;  %v683_v10 = vsel %vm530_vm3, %v5579_v20, 0.0  ;;  %v908_v58 = vsel %vm5622_vm11, %v5422_v15, %v5484_v13  ;;  %1017 = vmatpush.bf16.msrb.mxu0 %v4501_v29 }
 0x400   :  { %1037 = vmatpush.bf16.msra.mxu1 %v1032_v2  ;;  %v681_v41 = vsel %vm530_vm3, %v5581_v40, 0.0  ;;  %v1031_v3 = vpack.c.bf16 %v5592_v59, %v5616_v0  ;;  %v912_v5 = vor.u32 1.1754944e-38, %v911_v12  ;;  %v893_v15 = vsel %vm5650_vm10, %v5432_v57, %v889_v4 }
 0x401   :  { %v682_v60 = vadd.f32 %v681_v41, %v680_v36  ;;  %v5643_v54 = vsel %vm925_vm4, %v927_v51, %v923_v37  ;;  %v897_v13 = vor.u32 1.1754944e-38, %v896_v63  ;;  %v878_v38 = vsel %vm877_vm14, %v5430_v56, %v874_v53 }
 0x402   :  { %v5661_v49 = vsel %vm910_vm12, %v912_v5, %v908_v58  ;;  %v882_v23 = vor.u32 1.1754944e-38, %v881_v22  ;;  %vm880_vm1 = vcmp.eq.f32.partialorder %v879_v6, 8.507059e+37  ;;  %vm8228_vm11 = vcmask 64512  }
 0x403   :  { %v684_v46 = vadd.f32 %v683_v10, %v682_v60  ;;  %v1030_v32 = vpack.c.bf16 %v5643_v54, %v5661_v49  ;;  %v5672_v57 = vsel %vm895_vm15, %v897_v13, %v893_v15  ;;  %vm8229_vm13 = vmmov %vm8228_vm11 }
 0x404   :  { %1038 = vmatpush.bf16.msra.mxu1 %v1031_v3  ;;  %v5674_v1 = vsel %vm880_vm1, %v882_v23, %v878_v38 }
 0x405   :  { %v685_v47 = vrot.slane %v684_v46, 4  ;;  %v1029_v63 = vpack.c.bf16 %v5672_v57, %v5674_v1 }
 0x407   :  { %v686_v8 = vadd.f32 %v685_v47, %v684_v46 }
 0x408   :  { %1039 = vmatpush.bf16.msra.mxu1 %v1030_v32 }
 0x409   :  { %v687_v35 = vrot.slane %v686_v8, 2 }
 0x40b   :  { %v688_v50 = vadd.f32 %v687_v35, %v686_v8 }
 0x40c   :  { %1040 = vmatpush.bf16.msra.mxu1 %v1029_v63 }
 0x40d   :  { %v689_v62 = vrot.slane %v688_v50, 1 }
 0x40f   :  { %4286 = vmatmul.msk.bf16.vlgmr.msra.gmra.mxu1 %vm8225_vm2, %v5246_v7  ;;  %v690_v45 = vadd.f32 %v689_v62, %v688_v50 }
 0x411   :  { %v691_v56 = vmul.f32 0.03125, %v690_v45 }
 0x413   :  { %v692_v26 = vsub.f32 %v5520_v43, %v691_v56  ;;  %v693_v17 = vsub.f32 %v5527_v39, %v691_v56  ;;  %v694_v11 = vsub.f32 %v5581_v40, %v691_v56  ;;  %v695_v2 = vsub.f32 %v5579_v20, %v691_v56 }
 0x415   :  { %v696_v42 = vmul.f32 %v692_v26, %v692_v26  ;;  %v697_v48 = vmul.f32 %v693_v17, %v693_v17  ;;  %v698_v12 = vmul.f32 %v694_v11, %v694_v11  ;;  %v699_v19 = vmul.f32 %v695_v2, %v695_v2 }
 0x417   :  { %v700_v55 = vsel %vm530_vm3, %v696_v42, 0.0  ;;  %v701_v36 = vsel %vm530_vm3, %v697_v48, 0.0  ;;  %v703_v7 = vsel %vm530_vm3, %v698_v12, 0.0  ;;  %v705_v41 = vsel %vm530_vm3, %v699_v19, 0.0 }
 0x418   :  { %v702_v37 = vadd.f32 %v701_v36, %v700_v55 }
 0x41a   :  { %v704_v4 = vadd.f32 %v703_v7, %v702_v37 }
 0x41c   :  { %v706_v34 = vadd.f32 %v705_v41, %v704_v4 }
 0x41e   :  { %v707_v51 = vrot.slane %v706_v34, 4 }
 0x41f   :  { %4287 = vmatmul.msk.bf16.gmra.mxu1 %vm8226_vm0, %v5253_v44 }
 0x420   :  { %v708_v53 = vadd.f32 %v707_v51, %v706_v34 }
 0x422   :  { %v709_v29 = vrot.slane %v708_v53, 2 }
 0x424   :  { %v710_v60 = vadd.f32 %v709_v29, %v708_v53 }
 0x426   :  { %v711_v10 = vrot.slane %v710_v60, 1 }
 0x428   :  { %v712_v3 = vadd.f32 %v711_v10, %v710_v60 }
 0x42a   :  { %v713_v58 = vmul.f32 0.03125, %v712_v3 }
 0x42c   :  { %v714_v5 = vmax.f32 %v713_v58, 0.0 }
 0x42e   :  { %v715_v22 = vadd.f32 1e-05, %v714_v5 }
 0x430   :  { %4621 = vrsqrt.f32 %v715_v22  ;;  %vm722_vm5 = vweird.f32 %v715_v22 }
 0x436   :  { %v4622_v9 = vpop.eup %4621 }
 0x437   :  { %v717_v46 = vmul.f32 %v4622_v9, %v715_v22  ;;  %vm723_vm7 = vweird.f32 %v4622_v9 }
 0x438   :  { %vm724_vm6 = vmor %vm722_vm5, %vm723_vm7 }
 0x439   :  { %v718_v6 = vmul.f32 %v4622_v9, %v717_v46 }
 0x43b   :  { %v719_v15 = vmul.f32 0.5, %v718_v6 }
 0x43d   :  { %v720_v13 = vsub.f32 1.5, %v719_v15 }
 0x43f   :  { %v721_v47 = vmul.f32 %v4622_v9, %v720_v13 }
 0x441   :  { %v725_v32 = vsel %vm724_vm6, %v4622_v9, %v721_v47 }
 0x442   :  { %v726_v44 = vmul.f32 %v725_v32, %v692_v26  ;;  %v727_v38 = vmul.f32 %v725_v32, %v693_v17  ;;  %v728_v63 = vmul.f32 %v725_v32, %v694_v11  ;;  %v729_v50 = vmul.f32 %v725_v32, %v695_v2  ;;  %v4299_v26 = vld [vmem:[%s8170_s11 + $0x10] sm:$0xff] }
 0x443   :  { %v1324_v17 = vpack.c.bf16 %v4299_v26, %v4299_v26  ;;  %v5733_v26 = vld [vmem:[%s8160_s1 + $0x18] sm:$0xff] }
 0x444   :  { %v730_v23 = vmax.f32 %v726_v44, 0.0  ;;  %v731_v8 = vmax.f32 %v727_v38, 0.0  ;;  %v732_v62 = vmax.f32 %v728_v63, 0.0  ;;  %v733_v45 = vmax.f32 %v729_v50, 0.0 }
 0x445   :  { %v1329_v19 = vsel %vm8227_vm9, %v1324_v17, 0  ;;  %vm8230_vm9 = vmmov %vm8228_vm11 }
 0x446   :  { %v990_v35 = vpack.c.bf16 %v731_v8, %v730_v23  ;;  %v991_v56 = vpack.c.bf16 %v733_v45, %v732_v62  ;;  %1338 = vmatpush.bf16.msrb.mxu1 %v1329_v19  ;;  %v5722_v45 = vld [vmem:[%s8160_s1 + $0x10] sm:$0xff] }
 0x448   :  { %4284 = vmatmul.msk.bf16.vlgmr.msrb.gmra.mxu0 %vm530_vm3, %v990_v35 }
 0x458   :  { %4285 = vmatmul.msk.bf16.gmra.mxu0 %vm530_vm3, %v991_v56 }
 0x48c   :  { %v1042_v42 = vpop.f32.mrf.mxu1 }
 0x48d   :  { %v1043_v48 = vadd.f32 %v1042_v42, %v5267_v16  ;;  %v5704_v16 = vld [vmem:[%s8160_s1] sm:$0xff] }
 0x48e   :  { %4303 = vmatmul.msk.bf16.vlgmr.msrb.gmra.mxu1 %vm8228_vm11, %v5704_v16 }
 0x48f   :  { %v1056_v12 = vmax.f32 %v1043_v48, 1e-12  ;;  %vm1052_vm12 = vcmp.gt.f32.partialorder %v1043_v48, 0.0 }
 0x491   :  { %4623 = vrsqrt.f32 %v1056_v12  ;;  %vm1066_vm8 = vweird.f32 %v1056_v12 }
 0x494   :  { %v1044_v55 = vpop.f32.mrf.mxu1 }
 0x495   :  { %v5698_v11 = vadd.f32 %v1044_v55, %v5273_v21 }
 0x497   :  { %v4624_v2 = vpop.eup %4623  ;;  %v1057_v36 = vmax.f32 %v5698_v11, 1e-12 }
 0x498   :  { %v1061_v37 = vmul.f32 %v4624_v2, %v1056_v12  ;;  %vm1067_vm4 = vweird.f32 %v4624_v2 }
 0x499   :  { %4625 = vrsqrt.f32 %v1057_v36  ;;  %vm1068_vm10 = vmor %vm1066_vm8, %vm1067_vm4  ;;  %vm1076_vm5 = vweird.f32 %v1057_v36 }
 0x49a   :  { %v1062_v7 = vmul.f32 %v4624_v2, %v1061_v37 }
 0x49c   :  { %v1063_v4 = vmul.f32 0.5, %v1062_v7  ;;  %v1047_v41 = vpop.f32.mrf.mxu1 }
 0x49d   :  { %v1048_v34 = vadd.f32 %v1047_v41, %v5282_v14  ;;  %v5713_v14 = vld [vmem:[%s8160_s1 + $0x8] sm:$0xff] }
 0x49e   :  { %v1064_v21 = vsub.f32 1.5, %v1063_v4  ;;  %4304 = vmatmul.msk.bf16.gmra.mxu1 %vm8229_vm13, %v5713_v14  ;;  %vm8232_vm13 = vmmov %vm8230_vm9 }
 0x49f   :  { %v1058_v51 = vmax.f32 %v1048_v34, 1e-12  ;;  %v4626_v29 = vpop.eup %4625  ;;  %vm1054_vm2 = vcmp.gt.f32.partialorder %v1048_v34, 0.0 }
 0x4a0   :  { %v1065_v53 = vmul.f32 %v4624_v2, %v1064_v21  ;;  %v1071_v3 = vmul.f32 %v4626_v29, %v1057_v36  ;;  %vm1077_vm0 = vweird.f32 %v4626_v29 }
 0x4a1   :  { %4627 = vrsqrt.f32 %v1058_v51  ;;  %vm1086_vm15 = vweird.f32 %v1058_v51  ;;  %vm1078_vm6 = vmor %vm1076_vm5, %vm1077_vm0 }
 0x4a2   :  { %v1069_v60 = vsel %vm1068_vm10, %v4624_v2, %v1065_v53  ;;  %v1072_v6 = vmul.f32 %v4626_v29, %v1071_v3  ;;  %vm1053_vm10 = vcmp.gt.f32.partialorder %v5698_v11, 0.0 }
 0x4a3   :  { %v1100_v10 = vsel %vm1052_vm12, %v1069_v60, 0.0  ;;  %vm8231_vm12 = vmmov %vm8230_vm9 }
 0x4a4   :  { %v1049_v58 = vpop.f32.mrf.mxu1  ;;  %1106 = vperm.xlu0 %4518, %v1100_v10   ;;  %v1073_v47 = vmul.f32 0.5, %v1072_v6 }
 0x4a5   :  { %v1050_v5 = vadd.f32 %v1049_v58, %v5288_v27 }
 0x4a6   :  { %v1074_v23 = vsub.f32 1.5, %v1073_v47 }
 0x4a7   :  { %v4628_v22 = vpop.eup %4627  ;;  %v1059_v9 = vmax.f32 %v1050_v5, 1e-12  ;;  %vm1055_vm8 = vcmp.gt.f32.partialorder %v1050_v5, 0.0 }
 0x4a8   :  { %v1081_v46 = vmul.f32 %v4628_v22, %v1058_v51  ;;  %vm1087_vm14 = vweird.f32 %v4628_v22  ;;  %v1075_v62 = vmul.f32 %v4626_v29, %v1074_v23 }
 0x4a9   :  { %4629 = vrsqrt.f32 %v1059_v9  ;;  %vm1088_vm1 = vmor %vm1086_vm15, %vm1087_vm14  ;;  %vm1096_vm11 = vweird.f32 %v1059_v9 }
 0x4aa   :  { %v1082_v15 = vmul.f32 %v4628_v22, %v1081_v46  ;;  %v1079_v42 = vsel %vm1078_vm6, %v4626_v29, %v1075_v62  ;;  %v4527_v29 = vld [vmem:[%s8171_s12 + $0x2] ss:$0 sm:$0xff]  ;;  %vm8233_vm14 = vmmov %vm8230_vm9 }
 0x4ab   :  { %v1101_v12 = vsel %vm1053_vm10, %v1079_v42, 0.0  ;;  %v4528_v46 = vld [vmem:[%s8172_s13 + $0x2] ss:$0 sm:$0xff]  ;;  %vm8234_vm15 = vmmov %vm8230_vm9 }
 0x4ac   :  { %v1083_v13 = vmul.f32 0.5, %v1082_v15  ;;  %1196 = vperm.xlu0 %4518, %v5569_v18  }
 0x4ae   :  { %v1084_v32 = vsub.f32 1.5, %v1083_v13  ;;  %4305 = vmatmul.msk.bf16.gmra.mxu1 %vm8230_vm9, %v5722_v45 }
 0x4af   :  { %v4630_v27 = vpop.eup %4629 }
 0x4b0   :  { %v1091_v44 = vmul.f32 %v4630_v27, %v1059_v9  ;;  %v1085_v38 = vmul.f32 %v4628_v22, %v1084_v32  ;;  %vm1097_vm7 = vweird.f32 %v4630_v27 }
 0x4b1   :  { %vm1098_vm4 = vmor %vm1096_vm11, %vm1097_vm7 }
 0x4b2   :  { %v1089_v8 = vsel %vm1088_vm1, %v4628_v22, %v1085_v38  ;;  %v1092_v35 = vmul.f32 %v4630_v27, %v1091_v44  ;;  %vm8235_vm1 = vmmov %vm8230_vm9 }
 0x4b3   :  { %v1102_v63 = vsel %vm1054_vm2, %v1089_v8, 0.0  ;;  %vm8236_vm2 = vmmov %vm8235_vm1 }
 0x4b4   :  { %1116 = vperm.xlu2 %4517, %v1102_v63   ;;  %1171 = vperm.xlu0 %4518, %v5661_v49   ;;  %v1093_v50 = vmul.f32 0.5, %v1092_v35  ;;  %vm8237_vm0 = vmmov %vm8235_vm1 }
 0x4b5   :  { %vm8238_vm7 = vmmov %vm8237_vm0 }
 0x4b6   :  { %v1094_v18 = vsub.f32 1.5, %v1093_v50  ;;  %vm8239_vm5 = vmmov %vm8237_vm0 }
 0x4b8   :  { %v1095_v56 = vmul.f32 %v4630_v27, %v1094_v18 }
 0x4ba   :  { %v1099_v49 = vsel %vm1098_vm4, %v4630_v27, %v1095_v56 }
 0x4bb   :  { %v1103_v48 = vsel %vm1055_vm8, %v1099_v49, 0.0 }
 0x4bc   :  { %1121 = vperm.xlu1 %4519, %v1103_v48   ;;  %1111 = vperm.xlu2 %4517, %v1101_v12  }
 0x4bd   :  { %1166 = vperm.xlu0 %4518, %v5672_v57  }
 0x4be   :  { %4306 = vmatmul.msk.bf16.gmra.mxu1 %vm8231_vm12, %v5733_v26 }
 0x4c4   :  { %1191 = vperm.xlu1 %4519, %v5567_v24   ;;  %1181 = vperm.xlu2 %4517, %v5616_v0  }
 0x4c5   :  { %v1019_v17 = vpop.f32.mrf.mxu0 }
 0x4cc   :  { %1186 = vperm.xlu1 %4519, %v5592_v59   ;;  %1176 = vperm.xlu2 %4517, %v5643_v54  }
 0x4cd   :  { %v1021_v19 = vpop.f32.mrf.mxu0 }
 0x4d4   :  { %1161 = vperm.xlu1 %4519, %v5674_v1  }
 0x4d5   :  { %v1024_v55 = vpop.f32.mrf.mxu0 }
 0x4dd   :  { %v1026_v36 = vpop.f32.mrf.mxu0 }
 0x50b   :  { %v1340_v57 = vpop.f32.mrf.mxu1 }
 0x50c   :  { %v1341_v8 = vadd.f32 %v4527_v29, %v1340_v57 }
 0x50e   :  { %v5740_v0 = vpop.permute.xlu2 %1116  ;;  %v1360_v18 = vmax.f32 %v1341_v8, 0.0 }
 0x50f   :  { %v5749_v59 = vmul.f32 %v5740_v0, %v1024_v55 }
 0x510   :  { %v1371_v12 = vmul.f32 %v4528_v46, %v1360_v18 }
 0x513   :  { %v1342_v24 = vpop.f32.mrf.mxu1 }
 0x514   :  { %v1343_v49 = vadd.f32 %v4527_v29, %v1342_v24  ;;  %v5787_v24 = vld [vmem:[%s8162_s3 + $0x18] sm:$0xff] }
 0x516   :  { %v5742_v37 = vpop.permute.xlu2 %1111  ;;  %v5744_v7 = vpop.permute.xlu0 %1106 }
 0x517   :  { %v5755_v1 = vmul.f32 %v5742_v37, %v1021_v19  ;;  %v5758_v41 = vmul.f32 %v5744_v7, %v1019_v17  ;;  %v1361_v17 = vmax.f32 %v1343_v49, 0.0  ;;  %v1379_v19 = vsel %vm8238_vm7, %v1371_v12, 0.0 }
 0x519   :  { %v1128_v51 = vpack.c.bf16 %v5755_v1, %v5758_v41  ;;  %v1372_v55 = vmul.f32 %v4528_v46, %v1361_v17 }
 0x51b   :  { %v1345_v11 = vpop.f32.mrf.mxu1 }
 0x51c   :  { %v1346_v32 = vadd.f32 %v4527_v29, %v1345_v11  ;;  %v1382_v11 = vsel %vm8239_vm5, %v1372_v55, 0.0 }
 0x51e   :  { %v1362_v63 = vmax.f32 %v1346_v32, 0.0 }
 0x520   :  { %v1373_v48 = vmul.f32 %v4528_v46, %v1362_v63 }
 0x522   :  { %v1385_v57 = vsel %vm8237_vm0, %v1373_v48, 0.0 }
 0x523   :  { %v1347_v2 = vpop.f32.mrf.mxu1 }
 0x524   :  { %v1348_v58 = vadd.f32 %v4527_v29, %v1347_v2 }
 0x52b   :  { %v1350_v21 = vpop.f32.mrf.mxu1 }
 0x52c   :  { %v1351_v60 = vadd.f32 %v4527_v29, %v1350_v21 }
 0x52e   :  { %v5746_v4 = vpop.permute.xlu1 %1121  ;;  %v1364_v5 = vmax.f32 %v1351_v60, 0.0 }
 0x52f   :  { %v5752_v54 = vmul.f32 %v5746_v4, %v1026_v36  ;;  %v5793_v36 = vpop.permute.xlu0 %1196 }
 0x530   :  { %v1375_v47 = vmul.f32 %v4528_v46, %v1364_v5  ;;  %v4529_v5 = vld [vmem:[%s8173_s14 + $0x2] ss:$0 sm:$0xff] }
 0x531   :  { %v1129_v34 = vpack.c.bf16 %v5752_v54, %v5749_v59 }
 0x532   :  { %v1391_v38 = vsel %vm8233_vm14, %v1375_v47, 0.0 }
 0x533   :  { %1136 = vmatpush.bf16.msrb.mxu3 %v1129_v34  ;;  %v1352_v53 = vpop.f32.mrf.mxu1  ;;  %1392 = vadd.xlane.f32.xlu0 %v1391_v38 }
 0x534   :  { %v1353_v22 = vadd.f32 %v4527_v29, %v1352_v53 }
 0x536   :  { %v1365_v6 = vmax.f32 %v1353_v22, 0.0  ;;  %v5791_v2 = vpop.permute.xlu1 %1191 }
 0x537   :  { %1137 = vmatpush.bf16.msrb.mxu3 %v1128_v51  ;;  %v5799_v21 = vpop.permute.xlu0 %1171 }
 0x53a   :  { %4288 = vmatmul.msk.bf16.vlgmr.msrb.gmra.mxu3 %vm530_vm3, %v5331_v28  ;;  %v1363_v28 = vmax.f32 %v1348_v58, 0.0 }
 0x53b   :  { %v1355_v10 = vpop.f32.mrf.mxu1 }
 0x53c   :  { %v1356_v3 = vadd.f32 %v4527_v29, %v1355_v10  ;;  %v1374_v35 = vmul.f32 %v4528_v46, %v1363_v28 }
 0x53e   :  { %v1366_v9 = vmax.f32 %v1356_v3, 0.0  ;;  %v1388_v42 = vsel %vm8236_vm2, %v1374_v35, 0.0  ;;  %v5797_v34 = vpop.permute.xlu1 %1186 }
 0x53f   :  { %1389 = vadd.xlane.f32.xlu0 %v1388_v42  ;;  %v5807_v60 = vpop.permute.xlu0 %1166 }
 0x540   :  { %v1377_v13 = vmul.f32 %v4528_v46, %v1366_v9 }
 0x542   :  { %v1397_v44 = vsel %vm8232_vm13, %v1377_v13, 0.0 }
 0x543   :  { %v1357_v15 = vpop.f32.mrf.mxu1  ;;  %1398 = vadd.xlane.f32.xlu2 %v1397_v44 }
 0x544   :  { %v1358_v27 = vadd.f32 %v4527_v29, %v1357_v15 }
 0x546   :  { %v1367_v23 = vmax.f32 %v1358_v27, 0.0  ;;  %v5805_v29 = vpop.permute.xlu1 %1161 }
 0x548   :  { %v1378_v50 = vmul.f32 %v4528_v46, %v1367_v23 }
 0x54a   :  { %4289 = vmatmul.msk.bf16.gmra.mxu3 %vm530_vm3, %v5336_v30  ;;  %v1376_v30 = vmul.f32 %v4528_v46, %v1365_v6  ;;  %v1400_v62 = vsel %vm8234_vm15, %v1378_v50, 0.0 }
 0x54b   :  { %1401 = vadd.xlane.f32.xlu1 %v1400_v62 }
 0x54c   :  { %v1394_v56 = vsel %vm8235_vm1, %v1376_v30, 0.0 }
 0x54d   :  { %1395 = vadd.xlane.f32.xlu2 %v1394_v56 }
 0x553   :  { %1386 = vadd.xlane.f32.xlu1 %v1385_v57 }
 0x555   :  { %1380 = vadd.xlane.f32.xlu2 %v1379_v19 }
 0x55a   :  { %4290 = vmatmul.msk.bf16.gmra.mxu3 %vm530_vm3, %v5345_v31  ;;  %v5795_v31 = vpop.permute.xlu2 %1181 }
 0x55b   :  { %1383 = vadd.xlane.f32.xlu1 %v1382_v11 }
 0x562   :  { %v5803_v53 = vpop.permute.xlu2 %1176 }
 0x56a   :  { %4291 = vmatmul.msk.bf16.gmra.mxu3 %vm530_vm3, %v5787_v24 }
 0x5a6   :  { %v1393_v22 = vpop.xlane.xlu0 %1392 }
 0x5a7   :  { %v1410_v15 = vadd.f32 %v4529_v5, %v1393_v22 }
 0x5a9   :  { %v4311_v27 = vmul.f32 -1.442695, %v1410_v15 }
 0x5b2   :  { %v1390_v38 = vpop.xlane.xlu0 %1389 }
 0x5b3   :  { %v1409_v50 = vadd.f32 %v4529_v5, %v1390_v38 }
 0x5b5   :  { %v4310_v12 = vmul.f32 -1.442695, %v1409_v50 }
 0x5b6   :  { %v1399_v3 = vpop.xlane.xlu2 %1398 }
 0x5b7   :  { %v1412_v9 = vadd.f32 %v4529_v5, %v1399_v3 }
 0x5b9   :  { %v4313_v28 = vmul.f32 -1.442695, %v1412_v9 }
 0x5bb   :  { %4631 = vpow2.f32 %v4313_v28 }
 0x5bd   :  { %v5801_v51 = vpop.f32.mrf.mxu3 }
 0x5be   :  { %v1402_v58 = vpop.xlane.xlu1 %1401 }
 0x5bf   :  { %v1413_v46 = vadd.f32 %v4529_v5, %v1402_v58 }
 0x5c0   :  { %v1396_v47 = vpop.xlane.xlu2 %1395 }
 0x5c1   :  { %v4314_v6 = vmul.f32 -1.442695, %v1413_v46  ;;  %v1411_v44 = vadd.f32 %v4529_v5, %v1396_v47  ;;  %v4632_v23 = vpop.eup %4631 }
 0x5c2   :  { %v5818_v62 = vadd.f32 1.0, %v4632_v23 }
 0x5c3   :  { %4633 = vpow2.f32 %v4314_v6  ;;  %v4312_v8 = vmul.f32 -1.442695, %v1411_v44 }
 0x5c4   :  { %4635 = vpow2.f32 %v4311_v27  ;;  %vm1541_vm6 = vweird.f32 %v5818_v62 }
 0x5c5   :  { %v5809_v10 = vpop.f32.mrf.mxu3  ;;  %4637 = vpow2.f32 %v4312_v8 }
 0x5c6   :  { %v1387_v32 = vpop.xlane.xlu1 %1386  ;;  %4639 = vrcp.f32 %v5818_v62 }
 0x5c7   :  { %v1408_v63 = vadd.f32 %v4529_v5, %v1387_v32 }
 0x5c8   :  { %v1381_v18 = vpop.xlane.xlu2 %1380 }
 0x5c9   :  { %v4634_v30 = vpop.eup %4633  ;;  %v4309_v49 = vmul.f32 -1.442695, %v1408_v63  ;;  %v1406_v17 = vadd.f32 %v4529_v5, %v1381_v18 }
 0x5ca   :  { %v5820_v56 = vadd.f32 1.0, %v4634_v30  ;;  %v4636_v48 = vpop.eup %4635 }
 0x5cb   :  { %v5824_v55 = vadd.f32 1.0, %v4636_v48  ;;  %v4638_v11 = vpop.eup %4637  ;;  %v4307_v3 = vmul.f32 -1.442695, %v1406_v17  ;;  %v5858_v17 = vmul.f32 %v5807_v60, %v5809_v10  ;;  %v1547_v10 = vand.u32 2147483648, %v5818_v62 }
 0x5cc   :  { %4641 = vrcp.f32 %v5820_v56  ;;  %v5826_v22 = vpop.eup %4639  ;;  %v5829_v9 = vadd.f32 1.0, %v4638_v11  ;;  %v5866_v11 = vmul.f32 %v5805_v29, %v5801_v51  ;;  %vm1556_vm11 = vweird.f32 %v5820_v56 }
 0x5cd   :  { %v5814_v13 = vpop.f32.mrf.mxu3  ;;  %4643 = vpow2.f32 %v4309_v49  ;;  %v1537_v6 = vmul.f32 %v5826_v22, %v5818_v62  ;;  %vm1542_vm9 = vweird.f32 %v5826_v22  ;;  %v1545_v29 = vand.u32 2147483647, %v5818_v62 }
 0x5ce   :  { %v1384_v42 = vpop.xlane.xlu1 %1383  ;;  %4645 = vpow2.f32 %v4310_v12  ;;  %vm5878_vm8 = vmor %vm1541_vm6, %vm1542_vm9  ;;  %vm1511_vm13 = vweird.f32 %v5824_v55  ;;  %v1515_v51 = vand.u32 2147483647, %v5824_v55  ;;  %vm1526_vm1 = vweird.f32 %v5829_v9 }
 0x5cf   :  { %v1407_v57 = vadd.f32 %v4529_v5, %v1384_v42  ;;  %4647 = vrcp.f32 %v5824_v55  ;;  %v1538_v23 = vsub.f32 1.0, %v1537_v6  ;;  %v1562_v6 = vand.u32 2147483648, %v5820_v56 }
 0x5d0   :  { %4649 = vpow2.f32 %v4307_v3  ;;  %vm5908_vm12 = vcmp.eq.f32.partialorder %v1545_v29, 8.507059e+37  ;;  %vm5954_vm7 = vcmp.eq.f32.partialorder %v1515_v51, 8.507059e+37 }
 0x5d1   :  { %v4308_v58 = vmul.f32 -1.442695, %v1407_v57  ;;  %v1539_v49 = vmul.f32 %v5826_v22, %v1538_v23  ;;  %v1532_v23 = vand.u32 2147483648, %v5829_v9 }
 0x5d2   :  { %v5831_v46 = vpop.eup %4641 }
 0x5d3   :  { %v4644_v5 = vpop.eup %4643  ;;  %4651 = vpow2.f32 %v4308_v58  ;;  %v1552_v47 = vmul.f32 %v5831_v46, %v5820_v56  ;;  %vm1557_vm4 = vweird.f32 %v5831_v46  ;;  %v1540_v60 = vadd.f32 %v5826_v22, %v1539_v49 }
 0x5d4   :  { %v4646_v28 = vpop.eup %4645  ;;  %4653 = vrcp.f32 %v5829_v9  ;;  %v5838_v32 = vadd.f32 1.0, %v4644_v5  ;;  %vm5891_vm10 = vmor %vm1556_vm11, %vm1557_vm4  ;;  %v1560_v49 = vand.u32 2147483647, %v5820_v56 }
 0x5d5   :  { %v5816_v35 = vpop.f32.mrf.mxu3  ;;  %v5840_v27 = vpop.eup %4647  ;;  %v5842_v44 = vadd.f32 1.0, %v4646_v28  ;;  %v1553_v30 = vsub.f32 1.0, %v1552_v47 }
 0x5d6   :  { %v4650_v38 = vpop.eup %4649  ;;  %4655 = vrcp.f32 %v5838_v32  ;;  %v1507_v18 = vmul.f32 %v5840_v27, %v5824_v55  ;;  %vm1512_vm14 = vweird.f32 %v5840_v27  ;;  %vm5922_vm15 = vcmp.eq.f32.partialorder %v1560_v49, 8.507059e+37 }
 0x5d7   :  { %4657 = vrcp.f32 %v5842_v44  ;;  %v5848_v50 = vadd.f32 1.0, %v4650_v38  ;;  %v1554_v12 = vmul.f32 %v5831_v46, %v1553_v30  ;;  %v5889_v38 = vmul.f32 %v5799_v21, %v5814_v13  ;;  %vm5937_vm0 = vmor %vm1511_vm13, %vm1512_vm14 }
 0x5d8   :  { %v1508_v58 = vsub.f32 1.0, %v1507_v18  ;;  %v1544_v21 = vsel %vm5878_vm8, %v5826_v22, %v1540_v60  ;;  %v1548_v13 = vor.u32 1.1754944e-38, %v1547_v10  ;;  %vm1481_vm6 = vweird.f32 %v5838_v32 }
 0x5d9   :  { %v4652_v8 = vpop.eup %4651  ;;  %4659 = vrcp.f32 %v5848_v50  ;;  %v1555_v28 = vadd.f32 %v5831_v46, %v1554_v12  ;;  %vm1496_vm4 = vweird.f32 %v5842_v44  ;;  %vm1451_vm14 = vweird.f32 %v5848_v50 }
 0x5da   :  { %v5845_v63 = vpop.eup %4653  ;;  %v5852_v42 = vadd.f32 1.0, %v4652_v8  ;;  %v1509_v47 = vmul.f32 %v5840_v27, %v1508_v58 }
 0x5db   :  { %v1522_v57 = vmul.f32 %v5845_v63, %v5829_v9  ;;  %v1559_v56 = vsel %vm5891_vm10, %v5831_v46, %v1555_v28  ;;  %v1517_v46 = vand.u32 2147483648, %v5824_v55  ;;  %vm1527_vm2 = vweird.f32 %v5845_v63 }
 0x5dc   :  { %v5871_v3 = vpop.eup %4655  ;;  %4661 = vrcp.f32 %v5852_v42  ;;  %vm5960_vm5 = vmor %vm1526_vm1, %vm1527_vm2  ;;  %vm1466_vm2 = vweird.f32 %v5852_v42 }
 0x5dd   :  { %v1149_v19 = vpop.f32.mrf.mxu3  ;;  %v5876_v5 = vpop.eup %4657  ;;  %v1523_v8 = vsub.f32 1.0, %v1522_v57  ;;  %v1477_v18 = vmul.f32 %v5871_v3, %v5838_v32  ;;  %vm1482_vm9 = vweird.f32 %v5871_v3 }
 0x5de   :  { %v1203_v30 = vmul.f32 %v5795_v31, %v1149_v19  ;;  %v1492_v12 = vmul.f32 %v5876_v5, %v5842_v44  ;;  %v1563_v19 = vor.u32 1.1754944e-38, %v1562_v6  ;;  %v1510_v6 = vadd.f32 %v5840_v27, %v1509_v47  ;;  %vm5991_vm10 = vmor %vm1481_vm6, %vm1482_vm9 }
 0x5df   :  { %v5906_v57 = vpop.eup %4659  ;;  %v1524_v10 = vmul.f32 %v5845_v63, %v1523_v8  ;;  %v1478_v29 = vsub.f32 1.0, %v1477_v18  ;;  %v1202_v47 = vmul.f32 %v5803_v53, %v5816_v35  ;;  %vm1497_vm8 = vweird.f32 %v5876_v5 }
 0x5e0   :  { %v1493_v8 = vsub.f32 1.0, %v1492_v12  ;;  %v5952_v55 = vsel %vm5922_vm15, %v1563_v19, %v1559_v56  ;;  %v1533_v12 = vor.u32 1.1754944e-38, %v1532_v23  ;;  %v1485_v56 = vand.u32 2147483647, %v5838_v32  ;;  %vm6007_vm13 = vmor %vm1496_vm4, %vm1497_vm8 }
 0x5e1   :  { %v1525_v49 = vadd.f32 %v5845_v63, %v1524_v10  ;;  %v1479_v35 = vmul.f32 %v5871_v3, %v1478_v29  ;;  %v1500_v10 = vand.u32 2147483647, %v5842_v44  ;;  %v1208_v58 = vpack.c.bf16 %v1202_v47, %v5889_v38 }
 0x5e2   :  { %v1502_v29 = vand.u32 2147483648, %v5842_v44  ;;  %vm1452_vm15 = vweird.f32 %v5906_v57  ;;  %v1455_v47 = vand.u32 2147483647, %v5848_v50  ;;  %vm8267_vm6 = vcmask 523264  }
 0x5e3   :  { %v1480_v19 = vadd.f32 %v5871_v3, %v1479_v35  ;;  %vm6016_vm1 = vcmp.eq.f32.partialorder %v1500_v10, 8.507059e+37  ;;  %v1470_v35 = vand.u32 2147483647, %v5852_v42  ;;  %vm8268_vm4 = vmmov %vm8267_vm6 }
 0x5e4   :  { %v1503_v44 = vor.u32 1.1754944e-38, %v1502_v29  ;;  %vm1456_vm9 = vcmp.eq.f32.partialorder %v1455_v47, 8.507059e+37  ;;  %vm8269_vm8 = vmmov %vm8268_vm4 }
 0x5e5   :  { %v1151_v15 = vpop.f32.mrf.mxu3  ;;  %v1484_v23 = vsel %vm5991_vm10, %v5871_v3, %v1480_v19  ;;  %vm8270_vm10 = vmmov %vm8268_vm4 }
 0x5e6   :  { %v1204_v62 = vmul.f32 %v5797_v34, %v1151_v15  ;;  %v5916_v15 = vpop.eup %4661  ;;  %v1529_v34 = vsel %vm5960_vm5, %v5845_v63, %v1525_v49  ;;  %v1472_v49 = vand.u32 2147483648, %v5852_v42 }
 0x5e8   :  { %v1209_v18 = vpack.c.bf16 %v1204_v62, %v1203_v30  ;;  %v1514_v30 = vsel %vm5937_vm0, %v5840_v27, %v1510_v6  ;;  %v1518_v62 = vor.u32 1.1754944e-38, %v1517_v46  ;;  %v1487_v27 = vand.u32 2147483648, %v5838_v32 }
 0x5e9   :  { %vm1467_vm0 = vweird.f32 %v5916_v15  ;;  %v1212_v46 = vmul.f32 %v5755_v1, %v5441_v61 }
 0x5ea   :  { %v5985_v63 = vsel %vm5954_vm7, %v1518_v62, %v1514_v30  ;;  %v1488_v32 = vor.u32 1.1754944e-38, %v1487_v27  ;;  %vm6029_vm7 = vmor %vm1451_vm14, %vm1452_vm15  ;;  %v8264_v30 = vpack.c.bf16 %v5858_v17, %v5866_v11  ;;  %v6055_v17 = vld [vmem:[%s8161_s2] sm:$0xff] }
 0x5eb   :  { %vm6038_vm5 = vmor %vm1466_vm2, %vm1467_vm0 }
 0x5ed   :  { %v1154_v48 = vpop.f32.mrf.mxu3 }
 0x5ee   :  { %v1205_v22 = vmul.f32 %v5791_v2, %v1154_v48  ;;  %v1447_v2 = vmul.f32 %v5906_v57, %v5848_v50 }
 0x5f5   :  { %v1156_v31 = vpop.f32.mrf.mxu3 }
 0x5f6   :  { %v1206_v60 = vmul.f32 %v5793_v36, %v1156_v31  ;;  %v1462_v36 = vmul.f32 %v5916_v15, %v5852_v42  ;;  %v1530_v31 = vand.u32 2147483647, %v5829_v9 }
 0x5f8   :  { %v1210_v28 = vpack.c.bf16 %v1206_v60, %v1205_v22  ;;  %v5948_v22 = vsel %vm5908_vm12, %v1548_v13, %v1544_v21  ;;  %v1494_v21 = vmul.f32 %v5876_v5, %v1493_v8  ;;  %v1448_v13 = vsub.f32 1.0, %v1447_v2 }
 0x5f9   :  { %v1463_v9 = vsub.f32 1.0, %v1462_v36  ;;  %vm1531_vm11 = vcmp.eq.f32.partialorder %v1530_v31, 8.507059e+37  ;;  %v1608_v51 = vpack.c.bf16 %v5952_v55, %v5948_v22  ;;  %vm6001_vm12 = vcmp.eq.f32.partialorder %v1485_v56, 8.507059e+37 }
 0x5fa   :  { %1219 = vmatpush.bf16.msra.mxu0 %v1210_v28  ;;  %v5996_v28 = vsel %vm1531_vm11, %v1533_v12, %v1529_v34  ;;  %v1495_v38 = vadd.f32 %v5876_v5, %v1494_v21  ;;  %v1449_v6 = vmul.f32 %v5906_v57, %v1448_v13  ;;  %v6046_v62 = vsel %vm6001_vm12, %v1488_v32, %v1484_v23 }
 0x5fb   :  { %v1464_v2 = vmul.f32 %v5916_v15, %v1463_v9  ;;  %v1473_v21 = vor.u32 1.1754944e-38, %v1472_v49  ;;  %vm1471_vm11 = vcmp.eq.f32.partialorder %v1470_v35, 8.507059e+37  ;;  %v1214_v49 = vmul.f32 %v5752_v54, %v5480_v33  ;;  %v6122_v54 = vld [vmem:[%s8163_s4] sm:$0xff] }
 0x5fc   :  { %v1499_v31 = vsel %vm6007_vm13, %v5876_v5, %v1495_v38  ;;  %v1450_v3 = vadd.f32 %v5906_v57, %v1449_v6  ;;  %v1607_v5 = vpack.c.bf16 %v5996_v28, %v5985_v63  ;;  %8272 = vst [vmem:[#allocation7_spill] sm:$0xff] %v6122_v54 }
 0x5fd   :  { %v1465_v53 = vadd.f32 %v5916_v15, %v1464_v2  ;;  %v6050_v12 = vsel %vm6016_vm1, %v1503_v44, %v1499_v31 }
 0x5fe   :  { %1220 = vmatpush.bf16.msra.mxu0 %v1209_v18  ;;  %v1457_v18 = vand.u32 2147483648, %v5848_v50  ;;  %v1454_v11 = vsel %vm6029_vm7, %v5906_v57, %v1450_v3  ;;  %v1606_v9 = vpack.c.bf16 %v6050_v12, %v6046_v62  ;;  %v6076_v57 = vld [vmem:[%s8161_s2 + $0x8] sm:$0xff] }
 0x5ff   :  { %v1469_v13 = vsel %vm6038_vm5, %v5916_v15, %v1465_v53  ;;  %v1211_v15 = vmul.f32 %v5758_v41, %v5447_v52 }
 0x600   :  { %v1458_v42 = vor.u32 1.1754944e-38, %v1457_v18  ;;  %v6069_v56 = vsel %vm1471_vm11, %v1473_v21, %v1469_v13 }
 0x602   :  { %1221 = vmatpush.bf16.msra.mxu0 %v1208_v58  ;;  %v6067_v34 = vsel %vm1456_vm9, %v1458_v42, %v1454_v11 }
 0x603   :  { %v1605_v27 = vpack.c.bf16 %v6069_v56, %v6067_v34 }
 0x606   :  { %1222 = vmatpush.bf16.msra.mxu0 %v8264_v30 }
 0x609   :  { %4292 = vmatmul.msk.bf16.vlgmr.msra.gmra.mxu0 %vm8267_vm6, %v6055_v17 }
 0x60a   :  { %1613 = vmatpush.bf16.msrb.mxu0 %v1608_v51  ;;  %v4530_v51 = vld [vmem:[%s8169_s10 + $0x1] ss:$0 sm:$0xff] }
 0x60e   :  { %1614 = vmatpush.bf16.msrb.mxu0 %v1607_v5 }
 0x612   :  { %1615 = vmatpush.bf16.msrb.mxu0 %v1606_v9 }
 0x616   :  { %1616 = vmatpush.bf16.msrb.mxu0 %v1605_v27  ;;  %v6128_v27 = vld [vmem:[%s8163_s4 + $0x8] sm:$0xff] }
 0x617   :  { %8273 = vst [vmem:[#allocation8_spill] sm:$0xff] %v6128_v27 }
 0x619   :  { %4293 = vmatmul.msk.bf16.gmra.mxu0 %vm8268_vm4, %v6076_v57 }
 0x629   :  { %4325 = vmatmul.msk.bf16.vlgmr.msrb.gmra.mxu0 %vm8269_vm8, %v6055_v17 }
 0x639   :  { %4326 = vmatmul.msk.bf16.gmra.mxu0 %vm8270_vm10, %v6076_v57 }
 0x686   :  { %v1224_v19 = vpop.f32.mrf.mxu0 }
 0x687   :  { %v1225_v10 = vadd.f32 %v1224_v19, %v1211_v15 }
 0x689   :  { %v1234_v58 = vmul.f32 %v1225_v10, %v5744_v7  ;;  %v1213_v7 = vmul.f32 %v5749_v59, %v5515_v25 }
 0x68b   :  { %v1241_v38 = vadd.f32 %v4530_v51, %v1234_v58 }
 0x68d   :  { %v6094_v36 = vadd.f32 %v1241_v38, %v5520_v43 }
 0x68e   :  { %v1226_v29 = vpop.f32.mrf.mxu0 }
 0x68f   :  { %v1227_v6 = vadd.f32 %v1226_v29, %v1212_v46  ;;  %v1253_v23 = vsel %vm530_vm3, %v6094_v36, 0.0 }
 0x691   :  { %v1235_v2 = vmul.f32 %v1227_v6, %v5742_v37 }
 0x693   :  { %v1242_v41 = vadd.f32 %v4530_v51, %v1235_v2 }
 0x695   :  { %v6097_v32 = vadd.f32 %v1242_v41, %v5527_v39 }
 0x696   :  { %v1229_v48 = vpop.f32.mrf.mxu0 }
 0x697   :  { %v1254_v1 = vsel %vm530_vm3, %v6097_v32, 0.0  ;;  %v1230_v8 = vadd.f32 %v1229_v48, %v1213_v7  ;;  %v6140_v7 = vld [vmem:[%s8163_s4 + $0x10] sm:$0xff] }
 0x698   :  { %v1255_v44 = vadd.f32 %v1254_v1, %v1253_v23  ;;  %8274 = vst [vmem:[#allocation9_spill] sm:$0xff] %v6140_v7 }
 0x699   :  { %v1236_v37 = vmul.f32 %v1230_v8, %v5740_v0 }
 0x69b   :  { %v1243_v47 = vadd.f32 %v4530_v51, %v1236_v37 }
 0x69d   :  { %v6107_v18 = vadd.f32 %v1243_v47, %v5581_v40 }
 0x69e   :  { %v1231_v31 = vpop.f32.mrf.mxu0 }
 0x69f   :  { %v1256_v59 = vsel %vm530_vm3, %v6107_v18, 0.0  ;;  %v1232_v3 = vadd.f32 %v1231_v31, %v1214_v49 }
 0x6a0   :  { %v1257_v60 = vadd.f32 %v1256_v59, %v1255_v44 }
 0x6a1   :  { %v1237_v53 = vmul.f32 %v1232_v3, %v5746_v4 }
 0x6a3   :  { %v1244_v35 = vadd.f32 %v4530_v51, %v1237_v53 }
 0x6a5   :  { %v6115_v30 = vadd.f32 %v1244_v35, %v5579_v20 }
 0x6a6   :  { %v1618_v0 = vpop.f32.mrf.mxu0 }
 0x6a7   :  { %8271 = vst [vmem:[#allocation6_spill] sm:$0xff] %v6115_v30  ;;  %v1258_v50 = vsel %vm530_vm3, %v6115_v30, 0.0  ;;  %v1619_v5 = vadd.f32 %v6122_v54, %v1618_v0 }
 0x6a8   :  { %v1259_v42 = vadd.f32 %v1258_v50, %v1257_v60 }
 0x6a9   :  { %v1632_v21 = vmax.f32 %v1619_v5, 1e-12  ;;  %vm1628_vm15 = vcmp.gt.f32.partialorder %v1619_v5, 0.0 }
 0x6aa   :  { %v1260_v11 = vrot.slane %v1259_v42, 4 }
 0x6ab   :  { %4663 = vrsqrt.f32 %v1632_v21  ;;  %vm1642_vm12 = vweird.f32 %v1632_v21 }
 0x6ac   :  { %v1261_v4 = vadd.f32 %v1260_v11, %v1259_v42  ;;  %v4504_v11 = vld [vmem:[%s8168_s9 + $0x18] sm:$0xff] }
 0x6ad   :  { %1592 = vmatpush.bf16.msrb.mxu2 %v4504_v11 }
 0x6ae   :  { %v1262_v13 = vrot.slane %v1261_v4, 2  ;;  %v1620_v9 = vpop.f32.mrf.mxu0 }
 0x6af   :  { %v6131_v15 = vadd.f32 %v6128_v27, %v1620_v9 }
 0x6b0   :  { %v1263_v19 = vadd.f32 %v1262_v13, %v1261_v4  ;;  %v6178_v13 = vld [vmem:[%s8163_s4 + $0x18] sm:$0xff] }
 0x6b1   :  { %v4664_v10 = vpop.eup %4663  ;;  %v6134_v58 = vmax.f32 %v6131_v15, 1e-12  ;;  %8275 = vst [vmem:[#allocation10_spill] sm:$0xff] %v6178_v13  ;;  %vm1629_vm8 = vcmp.gt.f32.partialorder %v6131_v15, 0.0  ;;  %v4338_v15 = vld [vmem:[%s8170_s11 + $0x18] sm:$0xff] }
 0x6b2   :  { %v1264_v51 = vrot.slane %v1263_v19, 1  ;;  %v1637_v46 = vmul.f32 %v4664_v10, %v1632_v21  ;;  %vm1643_vm13 = vweird.f32 %v4664_v10 }
 0x6b3   :  { %4665 = vrsqrt.f32 %v6134_v58  ;;  %vm1644_vm14 = vmor %vm1642_vm12, %vm1643_vm13  ;;  %vm1652_vm5 = vweird.f32 %v6134_v58  ;;  %vm8278_vm13 = vcmask 1043456  }
 0x6b4   :  { %v1265_v29 = vadd.f32 %v1264_v51, %v1263_v19  ;;  %v1638_v38 = vmul.f32 %v4664_v10, %v1637_v46 }
 0x6b6   :  { %v1266_v6 = vmul.f32 0.03125, %v1265_v29  ;;  %v1639_v2 = vmul.f32 0.5, %v1638_v38  ;;  %v1623_v41 = vpop.f32.mrf.mxu0 }
 0x6b7   :  { %v6143_v48 = vadd.f32 %v6140_v7, %v1623_v41 }
 0x6b8   :  { %v6146_v23 = vsub.f32 %v6107_v18, %v1266_v6  ;;  %v6149_v1 = vsub.f32 %v6115_v30, %v1266_v6  ;;  %v1640_v8 = vsub.f32 1.5, %v1639_v2  ;;  %v6152_v44 = vsub.f32 %v6094_v36, %v1266_v6 }
 0x6b9   :  { %v6154_v37 = vpop.eup %4665  ;;  %v1634_v47 = vmax.f32 %v6143_v48, 1e-12  ;;  %v6158_v49 = vsub.f32 %v6097_v32, %v1266_v6  ;;  %vm1630_vm0 = vcmp.gt.f32.partialorder %v6143_v48, 0.0 }
 0x6ba   :  { %v1641_v31 = vmul.f32 %v4664_v10, %v1640_v8  ;;  %v1271_v59 = vmul.f32 %v6152_v44, %v6152_v44  ;;  %v1647_v60 = vmul.f32 %v6154_v37, %v6134_v58  ;;  %v1273_v35 = vmul.f32 %v6146_v23, %v6146_v23 }
 0x6bb   :  { %4667 = vrsqrt.f32 %v1634_v47  ;;  %v1272_v3 = vmul.f32 %v6158_v49, %v6158_v49  ;;  %v1274_v0 = vmul.f32 %v6149_v1, %v6149_v1  ;;  %vm1662_vm1 = vweird.f32 %v1634_v47 }
 0x6bc   :  { %v1645_v53 = vsel %vm1644_vm14, %v4664_v10, %v1641_v31  ;;  %v1275_v5 = vsel %vm530_vm3, %v1271_v59, 0.0  ;;  %v1278_v19 = vsel %vm530_vm3, %v1273_v35, 0.0  ;;  %v1648_v10 = vmul.f32 %v6154_v37, %v1647_v60 }
 0x6bd   :  { %v1676_v50 = vsel %vm1628_vm15, %v1645_v53, 0.0  ;;  %v1276_v42 = vsel %vm530_vm3, %v1272_v3, 0.0  ;;  %v1280_v29 = vsel %vm530_vm3, %v1274_v0, 0.0  ;;  %v4503_v3 = vld [vmem:[%s8168_s9 + $0x10] sm:$0xff]  ;;  %vm1653_vm6 = vweird.f32 %v6154_v37 }
 0x6be   :  { %v1625_v21 = vpop.f32.mrf.mxu0  ;;  %1682 = vperm.xlu1 %4519, %v1676_v50   ;;  %v1277_v4 = vadd.f32 %v1276_v42, %v1275_v5  ;;  %v1649_v8 = vmul.f32 0.5, %v1648_v10  ;;  %1593 = vmatpush.bf16.msrb.mxu2 %v4503_v3  ;;  %vm6192_vm9 = vmor %vm1652_vm5, %vm1653_vm6 }
 0x6bf   :  { %v1626_v9 = vadd.f32 %v6178_v13, %v1625_v21 }
 0x6c0   :  { %v1279_v51 = vadd.f32 %v1278_v19, %v1277_v4  ;;  %v1650_v35 = vsub.f32 1.5, %v1649_v8 }
 0x6c1   :  { %v4668_v46 = vpop.eup %4667  ;;  %v1635_v38 = vmax.f32 %v1626_v9, 1e-12  ;;  %vm1631_vm12 = vcmp.gt.f32.partialorder %v1626_v9, 0.0  ;;  %v1900_v9 = vpack.c.bf16 %v4338_v15, %v4338_v15 }
 0x6c2   :  { %v1657_v6 = vmul.f32 %v4668_v46, %v1634_v47  ;;  %v1281_v2 = vadd.f32 %v1280_v29, %v1279_v51  ;;  %vm1663_vm2 = vweird.f32 %v4668_v46  ;;  %v1651_v11 = vmul.f32 %v6154_v37, %v1650_v35 }
 0x6c3   :  { %4669 = vrsqrt.f32 %v1635_v38  ;;  %vm1664_vm7 = vmor %vm1662_vm1, %vm1663_vm2  ;;  %vm1672_vm11 = vweird.f32 %v1635_v38  ;;  %vm8279_vm1 = vcmask 64512  }
 0x6c4   :  { %v1658_v41 = vmul.f32 %v4668_v46, %v1657_v6  ;;  %v1282_v31 = vrot.slane %v1281_v2, 4 }
 0x6c6   :  { %v1659_v59 = vmul.f32 0.5, %v1658_v41  ;;  %1757 = vperm.xlu1 %4519, %v5985_v63   ;;  %v1283_v60 = vadd.f32 %v1282_v31, %v1281_v2 }
 0x6c8   :  { %v1660_v53 = vsub.f32 1.5, %v1659_v59  ;;  %v1284_v0 = vrot.slane %v1283_v60, 2 }
 0x6c9   :  { %v4670_v50 = vpop.eup %4669 }
 0x6ca   :  { %v1667_v5 = vmul.f32 %v4670_v50, %v1635_v38  ;;  %v1661_v42 = vmul.f32 %v4668_v46, %v1660_v53  ;;  %v1285_v63 = vadd.f32 %v1284_v0, %v1283_v60  ;;  %vm1673_vm4 = vweird.f32 %v4670_v50 }
 0x6cb   :  { %vm1674_vm10 = vmor %vm1672_vm11, %vm1673_vm4  ;;  %v1905_v60 = vsel %vm8278_vm13, %v1900_v9, 0 }
 0x6cc   :  { %v1665_v47 = vsel %vm1664_vm7, %v4668_v46, %v1661_v42  ;;  %v1668_v21 = vmul.f32 %v4670_v50, %v1667_v5  ;;  %v1286_v4 = vrot.slane %v1285_v63, 1  ;;  %v1655_v46 = vsel %vm6192_vm9, %v6154_v37, %v1651_v11  ;;  %1914 = vmatpush.bf16.msra.mxu0 %v1905_v60  ;;  %v4532_v60 = vld [vmem:[%s8172_s13 + $0x3] ss:$0 sm:$0xff] }
 0x6cd   :  { %v1678_v19 = vsel %vm1630_vm0, %v1665_v47, 0.0  ;;  %v1677_v41 = vsel %vm1629_vm8, %v1655_v46, 0.0  ;;  %vm8280_vm0 = vmmov %vm8279_vm1 }
 0x6ce   :  { %1692 = vperm.xlu0 %4518, %v1678_v19   ;;  %1752 = vperm.xlu1 %4519, %v6050_v12   ;;  %v1669_v48 = vmul.f32 0.5, %v1668_v21  ;;  %v1287_v58 = vadd.f32 %v1286_v4, %v1285_v63  ;;  %vm8281_vm7 = vmmov %vm8280_vm0 }
 0x6cf   :  { %4342 = vmatmul.msk.bf16.vlgmr.msra.gmra.mxu0 %vm8279_vm1, %v5704_v16  ;;  %vm8282_vm5 = vmmov %vm8280_vm0 }
 0x6d0   :  { %v1670_v51 = vsub.f32 1.5, %v1669_v48  ;;  %v1288_v29 = vmul.f32 0.03125, %v1287_v58  ;;  %vm8284_vm6 = vmmov %vm8280_vm0 }
 0x6d1   :  { %vm8285_vm9 = vmmov %vm8280_vm0 }
 0x6d2   :  { %v1671_v6 = vmul.f32 %v4670_v50, %v1670_v51  ;;  %v1289_v2 = vmax.f32 %v1288_v29, 0.0  ;;  %vm8287_vm11 = vmmov %vm8280_vm0 }
 0x6d3   :  { %vm8288_vm4 = vmmov %vm8280_vm0 }
 0x6d4   :  { %v1675_v8 = vsel %vm1674_vm10, %v4670_v50, %v1671_v6  ;;  %v1290_v31 = vadd.f32 1e-05, %v1289_v2  ;;  %vm8289_vm8 = vmmov %vm8280_vm0 }
 0x6d5   :  { %v1679_v12 = vsel %vm1631_vm12, %v1675_v8, 0.0  ;;  %v6255_v8 = vld [vmem:[%s8162_s3] sm:$0xff]  ;;  %vm8290_vm10 = vmmov %vm8280_vm0 }
 0x6d6   :  { %1697 = vperm.xlu2 %4517, %v1679_v12   ;;  %1687 = vperm.xlu0 %4518, %v1677_v41   ;;  %4671 = vrsqrt.f32 %v1290_v31  ;;  %vm1297_vm15 = vweird.f32 %v1290_v31  ;;  %v4531_v41 = vld [vmem:[%s8171_s12 + $0x3] ss:$0 sm:$0xff]  ;;  %8283 = vst [vmem:[#allocation11_spill] sm:$0xff] %v6255_v8  ;;  %vm8291_vm12 = vmmov %vm8280_vm0 }
 0x6d7   :  { %vm8292_vm13 = vmmov %vm8280_vm0 }
 0x6dc   :  { %v4672_v38 = vpop.eup %4671 }
 0x6dd   :  { %v1292_v59 = vmul.f32 %v4672_v38, %v1290_v31  ;;  %vm1298_vm14 = vweird.f32 %v4672_v38 }
 0x6de   :  { %1767 = vperm.xlu2 %4517, %v5948_v22   ;;  %1772 = vperm.xlu0 %4518, %v5952_v55   ;;  %vm1299_vm2 = vmor %vm1297_vm15, %vm1298_vm14 }
 0x6df   :  { %v1293_v37 = vmul.f32 %v4672_v38, %v1292_v59  ;;  %4343 = vmatmul.msk.bf16.gmra.mxu0 %vm8280_vm0, %v5713_v14 }
 0x6e1   :  { %v1294_v3 = vmul.f32 0.5, %v1293_v37 }
 0x6e3   :  { %v1295_v53 = vsub.f32 1.5, %v1294_v3 }
 0x6e5   :  { %v1296_v35 = vmul.f32 %v4672_v38, %v1295_v53 }
 0x6e6   :  { %1762 = vperm.xlu2 %4517, %v5996_v28   ;;  %1747 = vperm.xlu0 %4518, %v6046_v62  }
 0x6e7   :  { %v1300_v22 = vsel %vm1299_vm2, %v4672_v38, %v1296_v35 }
 0x6e8   :  { %v1301_v55 = vmul.f32 %v1300_v22, %v6152_v44  ;;  %v1302_v0 = vmul.f32 %v1300_v22, %v6158_v49  ;;  %v1303_v50 = vmul.f32 %v1300_v22, %v6146_v23  ;;  %v1304_v5 = vmul.f32 %v1300_v22, %v6149_v1 }
 0x6ea   :  { %v1305_v42 = vmax.f32 %v1301_v55, 0.0  ;;  %v1306_v63 = vmax.f32 %v1302_v0, 0.0  ;;  %v1307_v47 = vmax.f32 %v1303_v50, 0.0  ;;  %v1308_v21 = vmax.f32 %v1304_v5, 0.0 }
 0x6ec   :  { %v1566_v11 = vpack.c.bf16 %v1306_v63, %v1305_v42  ;;  %v1567_v16 = vpack.c.bf16 %v1308_v21, %v1307_v47 }
 0x6ee   :  { %4323 = vmatmul.msk.bf16.vlgmr.msrb.gmra.mxu2 %vm530_vm3, %v1566_v11  ;;  %1737 = vperm.xlu2 %4517, %v6067_v34   ;;  %v6267_v11 = vld [vmem:[%s8162_s3 + $0x8] sm:$0xff] }
 0x6ef   :  { %1742 = vperm.xlu0 %4518, %v6069_v56   ;;  %4344 = vmatmul.msk.bf16.gmra.mxu0 %vm8281_vm7, %v5722_v45  ;;  %8286 = vst [vmem:[#allocation12_spill] sm:$0xff] %v6267_v11 }
 0x6fe   :  { %4324 = vmatmul.msk.bf16.gmra.mxu2 %vm530_vm3, %v1567_v16 }
 0x6ff   :  { %4345 = vmatmul.msk.bf16.gmra.mxu0 %vm8282_vm5, %v5733_v26 }
 0x730   :  { %v6227_v19 = vpop.permute.xlu2 %1697  ;;  %v6242_v46 = vpop.permute.xlu1 %1682 }
 0x740   :  { %v6225_v34 = vpop.permute.xlu0 %1692 }
 0x748   :  { %v6235_v26 = vpop.permute.xlu0 %1687 }
 0x74c   :  { %v1916_v28 = vpop.f32.mrf.mxu0 }
 0x74d   :  { %v1917_v63 = vadd.f32 %v4531_v41, %v1916_v28 }
 0x754   :  { %v1918_v62 = vpop.f32.mrf.mxu0 }
 0x755   :  { %v1919_v47 = vadd.f32 %v4531_v41, %v1918_v62 }
 0x757   :  { %v1937_v28 = vmax.f32 %v1919_v47, 0.0 }
 0x75c   :  { %v1921_v1 = vpop.f32.mrf.mxu0 }
 0x75d   :  { %v1922_v12 = vadd.f32 %v4531_v41, %v1921_v1 }
 0x75f   :  { %v1938_v53 = vmax.f32 %v1922_v12, 0.0  ;;  %v6288_v12 = vpop.permute.xlu0 %1772 }
 0x764   :  { %v1923_v49 = vpop.f32.mrf.mxu0 }
 0x765   :  { %v1924_v35 = vadd.f32 %v4531_v41, %v1923_v49  ;;  %v1936_v49 = vmax.f32 %v1917_v63, 0.0 }
 0x767   :  { %v1939_v21 = vmax.f32 %v1924_v35, 0.0 }
 0x76c   :  { %v1926_v4 = vpop.f32.mrf.mxu0 }
 0x76d   :  { %v1927_v59 = vadd.f32 %v4531_v41, %v1926_v4  ;;  %v1950_v4 = vmul.f32 %v4532_v60, %v1939_v21 }
 0x76f   :  { %v1940_v22 = vmax.f32 %v1927_v59, 0.0  ;;  %v6292_v59 = vpop.permute.xlu1 %1757 }
 0x771   :  { %v1595_v23 = vpop.f32.mrf.mxu2  ;;  %v1951_v16 = vmul.f32 %v4532_v60, %v1940_v22 }
 0x772   :  { %v6245_v29 = vmul.f32 %v6242_v46, %v1595_v23  ;;  %v1949_v23 = vmul.f32 %v4532_v60, %v1938_v53 }
 0x774   :  { %v1928_v51 = vpop.f32.mrf.mxu0  ;;  %v1961_v62 = vsel %vm8288_vm4, %v1949_v23, 0.0 }
 0x775   :  { %v1929_v15 = vadd.f32 %v4531_v41, %v1928_v51  ;;  %v1947_v51 = vmul.f32 %v4532_v60, %v1936_v49 }
 0x777   :  { %v1941_v55 = vmax.f32 %v1929_v15, 0.0  ;;  %v6294_v15 = vpop.permute.xlu0 %1747 }
 0x779   :  { %v1597_v44 = vpop.f32.mrf.mxu2  ;;  %v1952_v1 = vmul.f32 %v4532_v60, %v1941_v55 }
 0x77a   :  { %v6238_v48 = vmul.f32 %v6235_v26, %v1597_v44  ;;  %v1967_v44 = vsel %vm8287_vm11, %v1951_v16, 0.0 }
 0x77b   :  { %1968 = vadd.xlane.f32.xlu0 %v1967_v44 }
 0x77c   :  { %v1704_v6 = vpack.c.bf16 %v6238_v48, %v6245_v29  ;;  %v1931_v2 = vpop.f32.mrf.mxu0 }
 0x77d   :  { %v1932_v31 = vadd.f32 %v4531_v41, %v1931_v2  ;;  %v1955_v2 = vsel %vm8292_vm13, %v1947_v51, 0.0 }
 0x77f   :  { %v1942_v37 = vmax.f32 %v1932_v31, 0.0  ;;  %v6286_v31 = vpop.permute.xlu2 %1767 }
 0x781   :  { %v1600_v56 = vpop.f32.mrf.mxu2  ;;  %v1953_v50 = vmul.f32 %v4532_v60, %v1942_v37 }
 0x782   :  { %v6230_v10 = vmul.f32 %v6225_v34, %v1600_v56  ;;  %v1970_v56 = vsel %vm8289_vm8, %v1952_v1, 0.0 }
 0x783   :  { %v1973_v42 = vsel %vm8285_vm9, %v1953_v50, 0.0 }
 0x784   :  { %v1933_v38 = vpop.f32.mrf.mxu0  ;;  %1974 = vadd.xlane.f32.xlu1 %v1973_v42 }
 0x785   :  { %v1934_v9 = vadd.f32 %v4531_v41, %v1933_v38  ;;  %v6280_v41 = vld [vmem:[%s8162_s3 + $0x10] sm:$0xff] }
 0x786   :  { %8293 = vst [vmem:[#allocation13_spill] sm:$0xff] %v6280_v41 }
 0x787   :  { %v1943_v3 = vmax.f32 %v1934_v9, 0.0  ;;  %v6290_v38 = vpop.permute.xlu2 %1762  ;;  %v6298_v9 = vpop.permute.xlu1 %1752 }
 0x789   :  { %v1602_v14 = vpop.f32.mrf.mxu2  ;;  %v1954_v0 = vmul.f32 %v4532_v60, %v1943_v3 }
 0x78a   :  { %v6233_v45 = vmul.f32 %v6227_v19, %v1602_v14  ;;  %v1964_v14 = vsel %vm8290_vm10, %v1950_v4, 0.0 }
 0x78b   :  { %v1976_v5 = vsel %vm8284_vm6, %v1954_v0, 0.0  ;;  %1965 = vadd.xlane.f32.xlu0 %v1964_v14 }
 0x78c   :  { %v1705_v58 = vpack.c.bf16 %v6233_v45, %v6230_v10  ;;  %1977 = vadd.xlane.f32.xlu2 %v1976_v5  ;;  %1971 = vadd.xlane.f32.xlu1 %v1970_v56 }
 0x78e   :  { %1712 = vmatpush.bf16.msra.mxu3 %v1705_v58  ;;  %v1948_v58 = vmul.f32 %v4532_v60, %v1937_v28  ;;  %v6302_v60 = vpop.permute.xlu0 %1742 }
 0x78f   :  { %v6296_v37 = vpop.permute.xlu2 %1737 }
 0x792   :  { %1713 = vmatpush.bf16.msra.mxu3 %v1704_v6  ;;  %v1958_v6 = vsel %vm8291_vm12, %v1948_v58, 0.0 }
 0x794   :  { %1962 = vadd.xlane.f32.xlu2 %v1961_v62  ;;  %1956 = vadd.xlane.f32.xlu1 %v1955_v2 }
 0x795   :  { %4327 = vmatmul.msk.bf16.vlgmr.msra.gmra.mxu3 %vm530_vm3, %v6255_v8 }
 0x79c   :  { %1959 = vadd.xlane.f32.xlu2 %v1958_v6 }
 0x7a5   :  { %4328 = vmatmul.msk.bf16.gmra.mxu3 %vm530_vm3, %v6267_v11 }
 0x7b5   :  { %4329 = vmatmul.msk.bf16.gmra.mxu3 %vm530_vm3, %v6280_v41 }
 0x7c5   :  { %4330 = vmatmul.msk.bf16.gmra.mxu3 %vm530_vm3, %v5787_v24  ;;  %v4533_v24 = vld [vmem:[%s8173_s14 + $0x3] ss:$0 sm:$0xff] }
 0x7ee   :  { %v1969_v50 = vpop.xlane.xlu0 %1968 }
 0x7ef   :  { %v1986_v16 = vadd.f32 %v4533_v24, %v1969_v50 }
 0x7f1   :  { %v4350_v1 = vmul.f32 -1.442695, %v1986_v16 }
 0x7f7   :  { %v1975_v22 = vpop.xlane.xlu1 %1974 }
 0x7f8   :  { %v1988_v55 = vadd.f32 %v4533_v24, %v1975_v22 }
 0x7fa   :  { %v4352_v5 = vmul.f32 -1.442695, %v1988_v55 }
 0x7fc   :  { %4673 = vpow2.f32 %v4352_v5 }
 0x7fe   :  { %v1966_v44 = vpop.xlane.xlu0 %1965 }
 0x7ff   :  { %v1978_v53 = vpop.xlane.xlu2 %1977  ;;  %v1972_v21 = vpop.xlane.xlu1 %1971  ;;  %v1985_v14 = vadd.f32 %v4533_v24, %v1966_v44 }
 0x800   :  { %v1989_v0 = vadd.f32 %v4533_v24, %v1978_v53  ;;  %v1987_v23 = vadd.f32 %v4533_v24, %v1972_v21 }
 0x801   :  { %v4349_v22 = vmul.f32 -1.442695, %v1985_v14 }
 0x802   :  { %v4353_v63 = vmul.f32 -1.442695, %v1989_v0  ;;  %v4674_v49 = vpop.eup %4673  ;;  %v4351_v56 = vmul.f32 -1.442695, %v1987_v23 }
 0x803   :  { %v6311_v58 = vadd.f32 1.0, %v4674_v49 }
 0x804   :  { %4675 = vpow2.f32 %v4353_v63 }
 0x805   :  { %4677 = vpow2.f32 %v4350_v1  ;;  %vm2117_vm14 = vweird.f32 %v6311_v58 }
 0x806   :  { %4679 = vpow2.f32 %v4351_v56 }
 0x807   :  { %v1963_v47 = vpop.xlane.xlu2 %1962  ;;  %v1957_v2 = vpop.xlane.xlu1 %1956  ;;  %4681 = vrcp.f32 %v6311_v58 }
 0x808   :  { %v1984_v62 = vadd.f32 %v4533_v24, %v1963_v47  ;;  %v1982_v0 = vadd.f32 %v4533_v24, %v1957_v2 }
 0x80a   :  { %v4676_v4 = vpop.eup %4675  ;;  %v4348_v6 = vmul.f32 -1.442695, %v1984_v62  ;;  %v4346_v21 = vmul.f32 -1.442695, %v1982_v0 }
 0x80b   :  { %v6313_v53 = vadd.f32 1.0, %v4676_v4  ;;  %v4678_v5 = vpop.eup %4677 }
 0x80c   :  { %4683 = vpow2.f32 %v4348_v6  ;;  %v4680_v47 = vpop.eup %4679  ;;  %v6319_v16 = vadd.f32 1.0, %v4678_v5 }
 0x80d   :  { %4685 = vrcp.f32 %v6313_v53  ;;  %v6321_v23 = vpop.eup %4681  ;;  %v6323_v44 = vadd.f32 1.0, %v4680_v47  ;;  %v2138_v41 = vand.u32 2147483648, %v6313_v53  ;;  %vm2132_vm1 = vweird.f32 %v6313_v53 }
 0x80e   :  { %4687 = vpow2.f32 %v4349_v22  ;;  %v2113_v62 = vmul.f32 %v6321_v23, %v6311_v58  ;;  %vm2118_vm15 = vweird.f32 %v6321_v23  ;;  %vm2087_vm9 = vweird.f32 %v6319_v16 }
 0x80f   :  { %v1960_v51 = vpop.xlane.xlu2 %1959  ;;  %vm6376_vm0 = vmor %vm2117_vm14, %vm2118_vm15  ;;  %vm2102_vm4 = vweird.f32 %v6323_v44 }
 0x810   :  { %v1983_v55 = vadd.f32 %v4533_v24, %v1960_v51  ;;  %v2114_v2 = vsub.f32 1.0, %v2113_v62 }
 0x812   :  { %v4347_v63 = vmul.f32 -1.442695, %v1983_v55  ;;  %v4684_v1 = vpop.eup %4683 }
 0x813   :  { %v6325_v49 = vpop.eup %4685  ;;  %v6332_v14 = vadd.f32 1.0, %v4684_v1 }
 0x814   :  { %4689 = vpow2.f32 %v4347_v63  ;;  %v4688_v24 = vpop.eup %4687  ;;  %v2128_v4 = vmul.f32 %v6325_v49, %v6313_v53  ;;  %vm2133_vm2 = vweird.f32 %v6325_v49 }
 0x815   :  { %4691 = vpow2.f32 %v4346_v21  ;;  %v6335_v51 = vadd.f32 1.0, %v4688_v24  ;;  %v2115_v21 = vmul.f32 %v6321_v23, %v2114_v2  ;;  %v2123_v2 = vand.u32 2147483648, %v6311_v58  ;;  %vm6394_vm7 = vmor %vm2132_vm1, %vm2133_vm2 }
 0x816   :  { %4693 = vrcp.f32 %v6319_v16  ;;  %v2129_v0 = vsub.f32 1.0, %v2128_v4  ;;  %vm2057_vm14 = vweird.f32 %v6332_v14 }
 0x817   :  { %4695 = vrcp.f32 %v6323_v44  ;;  %v2124_v54 = vor.u32 1.1754944e-38, %v2123_v2  ;;  %vm2072_vm1 = vweird.f32 %v6335_v51 }
 0x818   :  { %v6300_v3 = vpop.f32.mrf.mxu3  ;;  %4697 = vrcp.f32 %v6332_v14  ;;  %v2130_v4 = vmul.f32 %v6325_v49, %v2129_v0 }
 0x819   :  { %4699 = vrcp.f32 %v6335_v51  ;;  %v6382_v13 = vmul.f32 %v6296_v37, %v6300_v3 }
 0x81a   :  { %v4690_v6 = vpop.eup %4689 }
 0x81b   :  { %v4692_v22 = vpop.eup %4691  ;;  %v6341_v5 = vadd.f32 1.0, %v4690_v6 }
 0x81c   :  { %v6337_v55 = vpop.eup %4693  ;;  %v6348_v24 = vadd.f32 1.0, %v4692_v22 }
 0x81d   :  { %v6343_v63 = vpop.eup %4695  ;;  %v2083_v1 = vmul.f32 %v6337_v55, %v6319_v16  ;;  %4701 = vrcp.f32 %v6341_v5  ;;  %vm2088_vm11 = vweird.f32 %v6337_v55 }
 0x81e   :  { %v2098_v6 = vmul.f32 %v6343_v63, %v6323_v44  ;;  %v6361_v22 = vpop.eup %4697  ;;  %4703 = vrcp.f32 %v6348_v24  ;;  %vm2103_vm8 = vweird.f32 %v6343_v63  ;;  %vm6449_vm10 = vmor %vm2087_vm9, %vm2088_vm11  ;;  %vm2027_vm9 = vweird.f32 %v6348_v24 }
 0x81f   :  { %v6367_v0 = vpop.eup %4699  ;;  %v2053_v27 = vmul.f32 %v6361_v22, %v6332_v14  ;;  %vm6460_vm13 = vmor %vm2102_vm4, %vm2103_vm8  ;;  %vm2058_vm15 = vweird.f32 %v6361_v22  ;;  %vm2042_vm8 = vweird.f32 %v6341_v5 }
 0x820   :  { %v6307_v35 = vpop.f32.mrf.mxu3  ;;  %v2099_v37 = vsub.f32 1.0, %v2098_v6  ;;  %v2068_v3 = vmul.f32 %v6367_v0, %v6335_v51  ;;  %vm2073_vm2 = vweird.f32 %v6367_v0 }
 0x821   :  { %v6386_v7 = vmul.f32 %v6302_v60, %v6307_v35 }
 0x828   :  { %v6309_v42 = vpop.f32.mrf.mxu3 }
 0x829   :  { %v6371_v11 = vmul.f32 %v6294_v15, %v6309_v42  ;;  %v2131_v15 = vadd.f32 %v6325_v49, %v2130_v4  ;;  %v2136_v42 = vand.u32 2147483647, %v6313_v53  ;;  %v2139_v4 = vor.u32 1.1754944e-38, %v2138_v41 }
 0x82b   :  { %v2135_v8 = vsel %vm6394_vm7, %v6325_v49, %v2131_v15  ;;  %vm6416_vm6 = vcmp.eq.f32.partialorder %v2136_v42, 8.507059e+37  ;;  %vm6483_vm7 = vmor %vm2057_vm14, %vm2058_vm15  ;;  %vm8317_vm14 = vcmask 523264  }
 0x830   :  { %v1722_v28 = vpop.f32.mrf.mxu3 }
 0x831   :  { %v6351_v62 = vmul.f32 %v6298_v9, %v1722_v28  ;;  %v2116_v9 = vadd.f32 %v6321_v23, %v2115_v21  ;;  %v2121_v28 = vand.u32 2147483647, %v6311_v58  ;;  %v2084_v21 = vsub.f32 1.0, %v2083_v1  ;;  %v6407_v58 = vpop.eup %4701 }
 0x832   :  { %v6422_v41 = vpop.eup %4703  ;;  %v2038_v49 = vmul.f32 %v6407_v58, %v6341_v5 }
 0x833   :  { %v2120_v35 = vsel %vm6376_vm0, %v6321_v23, %v2116_v9  ;;  %vm6403_vm5 = vcmp.eq.f32.partialorder %v2121_v28, 8.507059e+37  ;;  %v2085_v20 = vmul.f32 %v6337_v55, %v2084_v21  ;;  %v2093_v9 = vand.u32 2147483648, %v6319_v16 }
 0x834   :  { %v2069_v28 = vsub.f32 1.0, %v2068_v3  ;;  %vm2028_vm11 = vweird.f32 %v6422_v41 }
 0x835   :  { %v2086_v21 = vadd.f32 %v6337_v55, %v2085_v20  ;;  %v2094_v3 = vor.u32 1.1754944e-38, %v2093_v9 }
 0x838   :  { %v6316_v50 = vpop.f32.mrf.mxu3 }
 0x840   :  { %v1727_v56 = vpop.f32.mrf.mxu3 }
 0x841   :  { %v1780_v2 = vmul.f32 %v6290_v38, %v1727_v56  ;;  %v2054_v56 = vsub.f32 1.0, %v2053_v27  ;;  %v2023_v27 = vmul.f32 %v6422_v41, %v6348_v24 }
 0x848   :  { %v1730_v47 = vpop.f32.mrf.mxu3 }
 0x849   :  { %v1781_v30 = vmul.f32 %v6286_v31, %v1730_v47  ;;  %v2091_v31 = vand.u32 2147483647, %v6319_v16  ;;  %v1779_v47 = vmul.f32 %v6292_v59, %v6316_v50  ;;  %v6439_v59 = vsel %vm6403_vm5, %v2124_v54, %v2120_v35 }
 0x84a   :  { %v6443_v50 = vsel %vm6416_vm6, %v2139_v4, %v2135_v8  ;;  %v2106_v54 = vand.u32 2147483647, %v6323_v44  ;;  %v2070_v16 = vmul.f32 %v6367_v0, %v2069_v28  ;;  %v2090_v35 = vsel %vm6449_vm10, %v6337_v55, %v2086_v21  ;;  %vm6508_vm6 = vmor %vm2072_vm1, %vm2073_vm2 }
 0x84b   :  { %v1785_v15 = vpack.c.bf16 %v1780_v2, %v1779_v47  ;;  %vm6453_vm12 = vcmp.eq.f32.partialorder %v2091_v31, 8.507059e+37  ;;  %v2063_v4 = vand.u32 2147483648, %v6332_v14  ;;  %v2024_v2 = vsub.f32 1.0, %v2023_v27  ;;  %vm8318_vm2 = vmmov %vm8317_vm14 }
 0x84c   :  { %vm2107_vm0 = vcmp.eq.f32.partialorder %v2106_v54, 8.507059e+37  ;;  %v2078_v55 = vand.u32 2147483648, %v6335_v51  ;;  %v2071_v31 = vadd.f32 %v6367_v0, %v2070_v16  ;;  %v2184_v47 = vpack.c.bf16 %v6443_v50, %v6439_v59 }
 0x84d   :  { %vm2043_vm10 = vweird.f32 %v6407_v58 }
 0x84e   :  { %v2079_v21 = vor.u32 1.1754944e-38, %v2078_v55 }
 0x850   :  { %v1732_v60 = vpop.f32.mrf.mxu3 }
 0x851   :  { %v1782_v6 = vmul.f32 %v6288_v12, %v1732_v60  ;;  %v2100_v12 = vmul.f32 %v6343_v63, %v2099_v37  ;;  %v2055_v37 = vmul.f32 %v6361_v22, %v2054_v56  ;;  %v8310_v56 = vpack.c.bf16 %v6351_v62, %v6371_v11 }
 0x852   :  { %v2064_v11 = vor.u32 1.1754944e-38, %v2063_v4  ;;  %v2025_v62 = vmul.f32 %v6422_v41, %v2024_v2  ;;  %v4534_v2 = vld [vmem:[%s8169_s10 + $0x2] ss:$0 sm:$0xff] }
 0x853   :  { %v1786_v38 = vpack.c.bf16 %v1782_v6, %v1781_v30  ;;  %v2108_v30 = vand.u32 2147483648, %v6323_v44  ;;  %v2101_v1 = vadd.f32 %v6343_v63, %v2100_v12  ;;  %v2061_v44 = vand.u32 2147483647, %v6332_v14 }
 0x854   :  { %v2039_v6 = vsub.f32 1.0, %v2038_v49  ;;  %v2056_v23 = vadd.f32 %v6361_v22, %v2055_v37  ;;  %v2076_v12 = vand.u32 2147483647, %v6335_v51  ;;  %v6498_v14 = vsel %vm6453_vm12, %v2094_v3, %v2090_v35  ;;  %vm6532_vm12 = vmor %vm2027_vm9, %vm2028_vm11 }
 0x855   :  { %1795 = vmatpush.bf16.msra.mxu2 %v1786_v38  ;;  %v2109_v53 = vor.u32 1.1754944e-38, %v2108_v30  ;;  %v2105_v8 = vsel %vm6460_vm13, %v6343_v63, %v2101_v1  ;;  %v1783_v63 = vpack.c.bf16 %v6386_v7, %v6382_v13  ;;  %vm6500_vm5 = vcmp.eq.f32.partialorder %v2061_v44, 8.507059e+37  ;;  %vm2044_vm13 = vmor %vm2042_vm8, %vm2043_vm10 }
 0x856   :  { %v2040_v9 = vmul.f32 %v6407_v58, %v2039_v6  ;;  %v2060_v28 = vsel %vm6483_vm7, %v6361_v22, %v2056_v23  ;;  %v2075_v51 = vsel %vm6508_vm6, %v6367_v0, %v2071_v31  ;;  %vm2077_vm4 = vcmp.eq.f32.partialorder %v2076_v12, 8.507059e+37  ;;  %v8323_v0 = vld [vmem:[#allocation7_spill] sm:$0xff] }
 0x857   :  { %v6512_v13 = vsel %vm2107_vm0, %v2109_v53, %v2105_v8  ;;  %v2031_v30 = vand.u32 2147483647, %v6348_v24  ;;  %v2048_v22 = vand.u32 2147483648, %v6341_v5  ;;  %v2026_v20 = vadd.f32 %v6422_v41, %v2025_v62  ;;  %vm8319_vm0 = vmmov %vm8318_vm2 }
 0x858   :  { %v2183_v27 = vpack.c.bf16 %v6512_v13, %v6498_v14  ;;  %v2041_v42 = vadd.f32 %v6407_v58, %v2040_v9  ;;  %v2046_v1 = vand.u32 2147483647, %v6341_v5  ;;  %v6540_v54 = vsel %vm6500_vm5, %v2064_v11, %v2060_v28  ;;  %vm8320_vm7 = vmmov %vm8319_vm0 }
 0x859   :  { %1796 = vmatpush.bf16.msra.mxu2 %v1785_v15  ;;  %v2033_v15 = vand.u32 2147483648, %v6348_v24  ;;  %v6542_v24 = vsel %vm2077_vm4, %v2079_v21, %v2075_v51  ;;  %vm2032_vm15 = vcmp.eq.f32.partialorder %v2031_v30, 8.507059e+37  ;;  %v2049_v3 = vor.u32 1.1754944e-38, %v2048_v22  ;;  %v8322_v22 = vld [vmem:[#allocation6_spill] sm:$0xff] }
 0x85a   :  { %v2182_v60 = vpack.c.bf16 %v6542_v24, %v6540_v54  ;;  %v2030_v5 = vsel %vm6532_vm12, %v6422_v41, %v2026_v20  ;;  %v2045_v16 = vsel %vm2044_vm13, %v6407_v58, %v2041_v42  ;;  %vm2047_vm1 = vcmp.eq.f32.partialorder %v2046_v1, 8.507059e+37 }
 0x85b   :  { %v2034_v37 = vor.u32 1.1754944e-38, %v2033_v15  ;;  %v6554_v53 = vsel %vm2047_vm1, %v2049_v3, %v2045_v16  ;;  %v1787_v58 = vmul.f32 %v6245_v29, %v5447_v52  ;;  %v1249_v8 = vadd.f32 %v6094_v36, %v5520_v43  ;;  %v8321_v15 = vld [vmem:[#allocation5_spill] sm:$0xff] }
 0x85c   :  { %v1250_v12 = vadd.f32 %v6097_v32, %v5527_v39  ;;  %v1790_v62 = vmul.f32 %v6233_v45, %v5480_v33 }
 0x85d   :  { %1797 = vmatpush.bf16.msra.mxu2 %v8310_v56  ;;  %v6552_v35 = vsel %vm2032_vm15, %v2034_v37, %v2030_v5 }
 0x85e   :  { %v2181_v44 = vpack.c.bf16 %v6554_v53, %v6552_v35 }
 0x861   :  { %1798 = vmatpush.bf16.msra.mxu2 %v1783_v63 }
 0x864   :  { %4331 = vmatmul.msk.bf16.vlgmr.msra.gmra.mxu2 %vm8317_vm14, %v6055_v17 }
 0x865   :  { %2189 = vmatpush.bf16.msrb.mxu2 %v2184_v47 }
 0x869   :  { %2190 = vmatpush.bf16.msrb.mxu2 %v2183_v27 }
 0x86d   :  { %2191 = vmatpush.bf16.msrb.mxu2 %v2182_v60 }
 0x871   :  { %2192 = vmatpush.bf16.msrb.mxu2 %v2181_v44 }
 0x874   :  { %4332 = vmatmul.msk.bf16.gmra.mxu2 %vm8318_vm2, %v6076_v57 }
 0x884   :  { %4364 = vmatmul.msk.bf16.vlgmr.msrb.gmra.mxu2 %vm8319_vm0, %v6055_v17  ;;  %v1788_v17 = vmul.f32 %v6238_v48, %v5441_v61 }
 0x894   :  { %4365 = vmatmul.msk.bf16.gmra.mxu2 %vm8320_vm7, %v6076_v57 }
 0x8e7   :  { %v1800_v41 = vpop.f32.mrf.mxu2 }
 0x8e8   :  { %v1801_v4 = vadd.f32 %v1800_v41, %v1787_v58 }
 0x8ea   :  { %v1810_v6 = vmul.f32 %v1801_v4, %v6242_v46  ;;  %v1789_v46 = vmul.f32 %v6230_v10, %v5515_v25 }
 0x8ec   :  { %v1817_v23 = vadd.f32 %v4534_v2, %v1810_v6 }
 0x8ee   :  { %v1821_v55 = vadd.f32 %v1817_v23, %v1249_v8 }
 0x8ef   :  { %v1802_v57 = vpop.f32.mrf.mxu2 }
 0x8f0   :  { %v1803_v38 = vadd.f32 %v1802_v57, %v1788_v17  ;;  %v6574_v31 = vadd.f32 %v1821_v55, %v1249_v8  ;;  %v1829_v36 = vsel %vm530_vm3, %v1821_v55, 0.0 }
 0x8f2   :  { %v1811_v29 = vmul.f32 %v1803_v38, %v6235_v26  ;;  %v1251_v26 = vadd.f32 %v6107_v18, %v5581_v40 }
 0x8f4   :  { %v1818_v63 = vadd.f32 %v4534_v2, %v1811_v29  ;;  %v8325_v29 = vld [vmem:[#allocation9_spill] sm:$0xff] }
 0x8f6   :  { %v1822_v56 = vadd.f32 %v1818_v63, %v1250_v12 }
 0x8f7   :  { %v1805_v43 = vpop.f32.mrf.mxu2 }
 0x8f8   :  { %v1830_v47 = vsel %vm530_vm3, %v1822_v56, 0.0  ;;  %v1806_v48 = vadd.f32 %v1805_v43, %v1789_v46  ;;  %v6583_v49 = vadd.f32 %v1822_v56, %v1250_v12 }
 0x8f9   :  { %v1831_v7 = vadd.f32 %v1830_v47, %v1829_v36 }
 0x8fa   :  { %v1812_v11 = vmul.f32 %v1806_v48, %v6225_v34  ;;  %v1252_v34 = vadd.f32 %v8322_v22, %v8321_v15  ;;  %v8326_v22 = vld [vmem:[#allocation10_spill] sm:$0xff] }
 0x8fc   :  { %v1819_v39 = vadd.f32 %v4534_v2, %v1812_v11 }
 0x8fe   :  { %v1823_v32 = vadd.f32 %v1819_v39, %v1251_v26 }
 0x8ff   :  { %v1807_v10 = vpop.f32.mrf.mxu2 }
 0x900   :  { %v1832_v9 = vsel %vm530_vm3, %v1823_v32, 0.0  ;;  %v1808_v28 = vadd.f32 %v1807_v10, %v1790_v62  ;;  %v6591_v21 = vadd.f32 %v1823_v32, %v1251_v26 }
 0x901   :  { %v1833_v51 = vadd.f32 %v1832_v9, %v1831_v7 }
 0x902   :  { %v1813_v30 = vmul.f32 %v1808_v28, %v6227_v19  ;;  %v8324_v19 = vld [vmem:[#allocation8_spill] sm:$0xff] }
 0x904   :  { %v1820_v27 = vadd.f32 %v4534_v2, %v1813_v30  ;;  %v4506_v30 = vld [vmem:[%s8168_s9 + $0x28] sm:$0xff] }
 0x905   :  { %2168 = vmatpush.bf16.msra.mxu1 %v4506_v30  ;;  %v6660_v30 = vld [vmem:[%s8160_s1] sm:$0xff] }
 0x906   :  { %v1824_v20 = vadd.f32 %v1820_v27, %v1252_v34 }
 0x907   :  { %v2194_v40 = vpop.f32.mrf.mxu2 }
 0x908   :  { %v1834_v18 = vsel %vm530_vm3, %v1824_v20, 0.0  ;;  %v2195_v42 = vadd.f32 %v8323_v0, %v2194_v40  ;;  %v6598_v45 = vadd.f32 %v1824_v20, %v1252_v34 }
 0x909   :  { %v1835_v1 = vadd.f32 %v1834_v18, %v1833_v51 }
 0x90a   :  { %v2208_v37 = vmax.f32 %v2195_v42, 1e-12  ;;  %vm2204_vm11 = vcmp.gt.f32.partialorder %v2195_v42, 0.0 }
 0x90b   :  { %v1836_v3 = vrot.slane %v1835_v1, 4 }
 0x90c   :  { %4705 = vrsqrt.f32 %v2208_v37  ;;  %vm2218_vm5 = vweird.f32 %v2208_v37 }
 0x90d   :  { %v1837_v60 = vadd.f32 %v1836_v3, %v1835_v1 }
 0x90f   :  { %v1838_v5 = vrot.slane %v1837_v60, 2  ;;  %v2196_v16 = vpop.f32.mrf.mxu2 }
 0x910   :  { %v6601_v44 = vadd.f32 %v8324_v19, %v2196_v16  ;;  %v4505_v19 = vld [vmem:[%s8168_s9 + $0x20] sm:$0xff] }
 0x911   :  { %v1839_v58 = vadd.f32 %v1838_v5, %v1837_v60  ;;  %2169 = vmatpush.bf16.msra.mxu1 %v4505_v19 }
 0x912   :  { %v4706_v41 = vpop.eup %4705  ;;  %v6604_v4 = vmax.f32 %v6601_v44, 1e-12  ;;  %vm2205_vm0 = vcmp.gt.f32.partialorder %v6601_v44, 0.0 }
 0x913   :  { %v1840_v2 = vrot.slane %v1839_v58, 1  ;;  %v2213_v6 = vmul.f32 %v4706_v41, %v2208_v37  ;;  %vm2219_vm6 = vweird.f32 %v4706_v41 }
 0x914   :  { %4707 = vrsqrt.f32 %v6604_v4  ;;  %vm2220_vm9 = vmor %vm2218_vm5, %vm2219_vm6  ;;  %vm2228_vm13 = vweird.f32 %v6604_v4  ;;  %vm8329_vm6 = vcmask 1043456  }
 0x915   :  { %v1841_v8 = vadd.f32 %v1840_v2, %v1839_v58  ;;  %v2214_v23 = vmul.f32 %v4706_v41, %v2213_v6 }
 0x917   :  { %v1842_v17 = vmul.f32 0.03125, %v1841_v8  ;;  %v2215_v57 = vmul.f32 0.5, %v2214_v23  ;;  %v2199_v38 = vpop.f32.mrf.mxu2 }
 0x918   :  { %v2200_v12 = vadd.f32 %v8325_v29, %v2199_v38 }
 0x919   :  { %v6608_v63 = vsub.f32 %v1823_v32, %v1842_v17  ;;  %v6610_v46 = vsub.f32 %v1824_v20, %v1842_v17  ;;  %v2216_v43 = vsub.f32 1.5, %v2215_v57  ;;  %v6612_v36 = vsub.f32 %v1821_v55, %v1842_v17 }
 0x91a   :  { %v6614_v47 = vpop.eup %4707  ;;  %v2210_v48 = vmax.f32 %v2200_v12, 1e-12  ;;  %v6616_v7 = vsub.f32 %v1822_v56, %v1842_v17  ;;  %vm2206_vm10 = vcmp.gt.f32.partialorder %v2200_v12, 0.0 }
 0x91b   :  { %v2217_v11 = vmul.f32 %v4706_v41, %v2216_v43  ;;  %v1847_v26 = vmul.f32 %v6612_v36, %v6612_v36  ;;  %v2223_v32 = vmul.f32 %v6614_v47, %v6604_v4  ;;  %v1849_v62 = vmul.f32 %v6608_v63, %v6608_v63 }
 0x91c   :  { %4709 = vrsqrt.f32 %v2210_v48  ;;  %v1848_v39 = vmul.f32 %v6616_v7, %v6616_v7  ;;  %v1850_v56 = vmul.f32 %v6610_v46, %v6610_v46  ;;  %vm2238_vm4 = vweird.f32 %v2210_v48 }
 0x91d   :  { %v2221_v55 = vsel %vm2220_vm9, %v4706_v41, %v2217_v11  ;;  %v1851_v9 = vsel %vm530_vm3, %v1847_v26, 0.0  ;;  %v1854_v27 = vsel %vm530_vm3, %v1849_v62, 0.0  ;;  %v2224_v20 = vmul.f32 %v6614_v47, %v2223_v32  ;;  %v8334_v11 = vld [vmem:[#allocation11_spill] sm:$0xff] }
 0x91e   :  { %v2252_v10 = vsel %vm2204_vm11, %v2221_v55, 0.0  ;;  %v1852_v28 = vsel %vm530_vm3, %v1848_v39, 0.0  ;;  %v1856_v0 = vsel %vm530_vm3, %v1850_v56, 0.0  ;;  %vm2229_vm14 = vweird.f32 %v6614_v47 }
 0x91f   :  { %v2201_v51 = vpop.f32.mrf.mxu2  ;;  %2258 = vperm.xlu2 %4517, %v2252_v10   ;;  %v1853_v15 = vadd.f32 %v1852_v28, %v1851_v9  ;;  %v2225_v60 = vmul.f32 0.5, %v2224_v20  ;;  %vm6644_vm15 = vmor %vm2228_vm13, %vm2229_vm14  ;;  %v4377_v28 = vld [vmem:[%s8170_s11 + $0x20] sm:$0xff]  ;;  %vm8330_vm9 = vcmask 64512  }
 0x920   :  { %v2202_v34 = vadd.f32 %v8326_v22, %v2201_v51  ;;  %v2476_v44 = vpack.c.bf16 %v4377_v28, %v4377_v28  ;;  %vm8333_vm13 = vmmov %vm8330_vm9 }
 0x921   :  { %v1855_v40 = vadd.f32 %v1854_v27, %v1853_v15  ;;  %v2226_v2 = vsub.f32 1.5, %v2225_v60  ;;  %vm8335_vm14 = vmmov %vm8330_vm9 }
 0x922   :  { %v4710_v18 = vpop.eup %4709  ;;  %v2211_v42 = vmax.f32 %v2202_v34, 1e-12  ;;  %vm2207_vm5 = vcmp.gt.f32.partialorder %v2202_v34, 0.0  ;;  %v2481_v51 = vsel %vm8329_vm6, %v2476_v44, 0 }
 0x923   :  { %v2233_v1 = vmul.f32 %v4710_v18, %v2210_v48  ;;  %v1857_v37 = vadd.f32 %v1856_v0, %v1855_v40  ;;  %vm2239_vm8 = vweird.f32 %v4710_v18  ;;  %v2227_v29 = vmul.f32 %v6614_v47, %v2226_v2  ;;  %2490 = vmatpush.bf16.msra.mxu2 %v2481_v51 }
 0x924   :  { %4711 = vrsqrt.f32 %v2211_v42  ;;  %vm2240_vm12 = vmor %vm2238_vm4, %vm2239_vm8  ;;  %vm2248_vm1 = vweird.f32 %v2211_v42 }
 0x925   :  { %v2234_v3 = vmul.f32 %v4710_v18, %v2233_v1  ;;  %v1858_v5 = vrot.slane %v1857_v37, 4  ;;  %v2231_v39 = vsel %vm6644_vm15, %v6614_v47, %v2227_v29  ;;  %vm8336_vm15 = vmmov %vm8330_vm9 }
 0x926   :  { %v2253_v56 = vsel %vm2205_vm0, %v2231_v39, 0.0  ;;  %4381 = vmatmul.msk.bf16.vlgmr.msra.gmra.mxu2 %vm8330_vm9, %v6660_v30 }
 0x927   :  { %v2235_v16 = vmul.f32 0.5, %v2234_v3  ;;  %2333 = vperm.xlu2 %4517, %v6498_v14   ;;  %v1859_v58 = vadd.f32 %v1858_v5, %v1857_v37 }
 0x929   :  { %v2236_v41 = vsub.f32 1.5, %v2235_v16  ;;  %v1860_v6 = vrot.slane %v1859_v58, 2 }
 0x92a   :  { %v4712_v8 = vpop.eup %4711 }
 0x92b   :  { %v2243_v23 = vmul.f32 %v4712_v8, %v2211_v42  ;;  %v2237_v17 = vmul.f32 %v4710_v18, %v2236_v41  ;;  %v1861_v14 = vadd.f32 %v1860_v6, %v1859_v58  ;;  %vm2249_vm2 = vweird.f32 %v4712_v8 }
 0x92c   :  { %vm2250_vm7 = vmor %vm2248_vm1, %vm2249_vm2 }
 0x92d   :  { %v2241_v57 = vsel %vm2240_vm12, %v4710_v18, %v2237_v17  ;;  %v2244_v38 = vmul.f32 %v4712_v8, %v2243_v23  ;;  %v1862_v43 = vrot.slane %v1861_v14, 1  ;;  %vm8332_vm12 = vmmov %vm8330_vm9 }
 0x92e   :  { %v2254_v48 = vsel %vm2206_vm10, %v2241_v57, 0.0  ;;  %vm8331_vm10 = vmmov %vm8330_vm9 }
 0x92f   :  { %2268 = vperm.xlu0 %4518, %v2254_v48   ;;  %2328 = vperm.xlu2 %4517, %v6542_v24   ;;  %v2245_v12 = vmul.f32 0.5, %v2244_v38  ;;  %v1863_v4 = vadd.f32 %v1862_v43, %v1861_v14  ;;  %vm8338_vm1 = vmmov %vm8330_vm9 }
 0x930   :  { %vm8339_vm2 = vmmov %vm8338_vm1 }
 0x931   :  { %v2246_v26 = vsub.f32 1.5, %v2245_v12  ;;  %v1864_v32 = vmul.f32 0.03125, %v1863_v4  ;;  %v4535_v4 = vld [vmem:[%s8171_s12 + $0x4] ss:$0 sm:$0xff]  ;;  %vm8340_vm0 = vmmov %vm8338_vm1 }
 0x932   :  { %vm8343_vm6 = vmmov %vm8340_vm0 }
 0x933   :  { %v2247_v55 = vmul.f32 %v4712_v8, %v2246_v26  ;;  %v1865_v62 = vmax.f32 %v1864_v32, 0.0 }
 0x935   :  { %v2251_v10 = vsel %vm2250_vm7, %v4712_v8, %v2247_v55  ;;  %v1866_v9 = vadd.f32 1e-05, %v1865_v62  ;;  %vm8341_vm7 = vmmov %vm8340_vm0 }
 0x936   :  { %v2255_v24 = vsel %vm2207_vm5, %v2251_v10, 0.0  ;;  %vm8342_vm5 = vmmov %vm8340_vm0 }
 0x937   :  { %2273 = vperm.xlu1 %4519, %v2255_v24   ;;  %2263 = vperm.xlu0 %4518, %v2253_v56   ;;  %4713 = vrsqrt.f32 %v1866_v9  ;;  %vm1873_vm4 = vweird.f32 %v1866_v9  ;;  %v4536_v24 = vld [vmem:[%s8172_s13 + $0x4] ss:$0 sm:$0xff] }
 0x93d   :  { %v4714_v47 = vpop.eup %4713 }
 0x93e   :  { %v1868_v15 = vmul.f32 %v4714_v47, %v1866_v9  ;;  %vm1874_vm11 = vweird.f32 %v4714_v47 }
 0x93f   :  { %2348 = vperm.xlu1 %4519, %v6443_v50   ;;  %2343 = vperm.xlu0 %4518, %v6439_v59   ;;  %vm1875_vm8 = vmor %vm1873_vm4, %vm1874_vm11 }
 0x940   :  { %v1869_v22 = vmul.f32 %v4714_v47, %v1868_v15 }
 0x942   :  { %v1870_v34 = vmul.f32 0.5, %v1869_v22 }
 0x944   :  { %v1871_v27 = vsub.f32 1.5, %v1870_v34 }
 0x946   :  { %v1872_v20 = vmul.f32 %v4714_v47, %v1871_v27 }
 0x947   :  { %2323 = vperm.xlu1 %4519, %v6540_v54   ;;  %2338 = vperm.xlu0 %4518, %v6512_v13   ;;  %v6675_v13 = vld [vmem:[%s8160_s1 + $0x8] sm:$0xff]  ;;  %v6685_v54 = vld [vmem:[%s8160_s1 + $0x10] sm:$0xff] }
 0x948   :  { %v1876_v40 = vsel %vm1875_vm8, %v4714_v47, %v1872_v20  ;;  %4382 = vmatmul.msk.bf16.gmra.mxu2 %vm8331_vm10, %v6675_v13 }
 0x949   :  { %v1877_v18 = vmul.f32 %v1876_v40, %v6612_v36  ;;  %v1878_v0 = vmul.f32 %v1876_v40, %v6616_v7  ;;  %v1879_v50 = vmul.f32 %v1876_v40, %v6608_v63  ;;  %v1880_v59 = vmul.f32 %v1876_v40, %v6610_v46  ;;  %v6693_v63 = vld [vmem:[%s8160_s1 + $0x18] sm:$0xff] }
 0x94a   :  { %v8337_v40 = vld [vmem:[#allocation12_spill] sm:$0xff] }
 0x94b   :  { %v1881_v42 = vmax.f32 %v1877_v18, 0.0  ;;  %v1882_v1 = vmax.f32 %v1878_v0, 0.0  ;;  %v1883_v37 = vmax.f32 %v1879_v50, 0.0  ;;  %v1884_v3 = vmax.f32 %v1880_v59, 0.0 }
 0x94d   :  { %v2142_v60 = vpack.c.bf16 %v1882_v1, %v1881_v42  ;;  %v2143_v5 = vpack.c.bf16 %v1884_v3, %v1883_v37 }
 0x94f   :  { %4362 = vmatmul.msk.bf16.vlgmr.msra.gmra.mxu1 %vm530_vm3, %v2142_v60  ;;  %2318 = vperm.xlu1 %4519, %v6554_v53  }
 0x950   :  { %2313 = vperm.xlu0 %4518, %v6552_v35  }
 0x958   :  { %4383 = vmatmul.msk.bf16.gmra.mxu2 %vm8332_vm12, %v6685_v54 }
 0x95f   :  { %4363 = vmatmul.msk.bf16.gmra.mxu1 %vm530_vm3, %v2143_v5 }
 0x968   :  { %4384 = vmatmul.msk.bf16.gmra.mxu2 %vm8333_vm13, %v6693_v63 }
 0x979   :  { %v6714_v38 = vpop.permute.xlu2 %2258 }
 0x9a1   :  { %v6697_v19 = vpop.permute.xlu0 %2268 }
 0x9a9   :  { %v2492_v53 = vpop.f32.mrf.mxu2  ;;  %v6699_v2 = vpop.permute.xlu1 %2273 }
 0x9aa   :  { %v6707_v17 = vpop.permute.xlu0 %2263  ;;  %v2493_v59 = vadd.f32 %v4535_v4, %v2492_v53 }
 0x9ac   :  { %v2512_v5 = vmax.f32 %v2493_v59, 0.0 }
 0x9b1   :  { %v2494_v35 = vpop.f32.mrf.mxu2 }
 0x9b2   :  { %v2495_v0 = vadd.f32 %v4535_v4, %v2494_v35  ;;  %v2523_v35 = vmul.f32 %v4536_v24, %v2512_v5 }
 0x9b4   :  { %v2513_v3 = vmax.f32 %v2495_v0, 0.0 }
 0x9cb   :  { %v2497_v36 = vpop.f32.mrf.mxu2 }
 0x9cc   :  { %v2171_v46 = vpop.f32.mrf.mxu1  ;;  %v2498_v55 = vadd.f32 %v4535_v4, %v2497_v36 }
 0x9cd   :  { %v6717_v43 = vmul.f32 %v6714_v38, %v2171_v46 }
 0x9ce   :  { %v2514_v51 = vmax.f32 %v2498_v55, 0.0 }
 0x9d0   :  { %v2525_v50 = vmul.f32 %v4536_v24, %v2514_v51 }
 0x9d2   :  { %v2537_v60 = vsel %vm8339_vm2, %v2525_v50, 0.0 }
 0x9d3   :  { %v2499_v16 = vpop.f32.mrf.mxu2 }
 0x9d4   :  { %v2173_v7 = vpop.f32.mrf.mxu1  ;;  %v2500_v28 = vadd.f32 %v4535_v4, %v2499_v16  ;;  %v2531_v16 = vsel %vm8343_vm6, %v2523_v35, 0.0 }
 0x9d5   :  { %v6710_v14 = vmul.f32 %v6707_v17, %v2173_v7  ;;  %v2524_v7 = vmul.f32 %v4536_v24, %v2513_v3 }
 0x9d6   :  { %v2515_v20 = vmax.f32 %v2500_v28, 0.0 }
 0x9d7   :  { %v2280_v48 = vpack.c.bf16 %v6710_v14, %v6717_v43  ;;  %v2534_v53 = vsel %vm8342_vm5, %v2524_v7, 0.0 }
 0x9d8   :  { %v2526_v37 = vmul.f32 %v4536_v24, %v2515_v20 }
 0x9da   :  { %v2540_v36 = vsel %vm8341_vm7, %v2526_v37, 0.0 }
 0x9db   :  { %v2502_v41 = vpop.f32.mrf.mxu2 }
 0x9dc   :  { %v2176_v58 = vpop.f32.mrf.mxu1  ;;  %v2503_v39 = vadd.f32 %v4535_v4, %v2502_v41  ;;  %v6744_v41 = vld [vmem:[%s8162_s3 + $0x18] sm:$0xff] }
 0x9dd   :  { %v6702_v8 = vmul.f32 %v6697_v19, %v2176_v58  ;;  %v8344_v58 = vld [vmem:[#allocation13_spill] sm:$0xff]  ;;  %8345 = vst [vmem:[#allocation5_spill] sm:$0xff] %v6744_v41 }
 0x9de   :  { %v2516_v44 = vmax.f32 %v2503_v39, 0.0 }
 0x9e0   :  { %v2527_v18 = vmul.f32 %v4536_v24, %v2516_v44 }
 0x9e2   :  { %v2543_v42 = vsel %vm8338_vm1, %v2527_v18, 0.0 }
 0x9e3   :  { %v2504_v29 = vpop.f32.mrf.mxu2  ;;  %2544 = vadd.xlane.f32.xlu1 %v2543_v42 }
 0x9e4   :  { %v2178_v6 = vpop.f32.mrf.mxu1  ;;  %v2505_v10 = vadd.f32 %v4535_v4, %v2504_v29 }
 0x9e5   :  { %v6705_v23 = vmul.f32 %v6699_v2, %v2178_v6  ;;  %v6748_v6 = vpop.permute.xlu0 %2343 }
 0x9e6   :  { %v2517_v22 = vmax.f32 %v2505_v10, 0.0 }
 0x9e7   :  { %v2281_v57 = vpack.c.bf16 %v6705_v23, %v6702_v8 }
 0x9e8   :  { %v2528_v1 = vmul.f32 %v4536_v24, %v2517_v22 }
 0x9e9   :  { %2288 = vmatpush.bf16.msrb.mxu1 %v2281_v57  ;;  %v6750_v57 = vpop.permute.xlu1 %2348 }
 0x9ea   :  { %v2546_v46 = vsel %vm8340_vm0, %v2528_v1, 0.0 }
 0x9eb   :  { %v2507_v12 = vpop.f32.mrf.mxu2  ;;  %2541 = vadd.xlane.f32.xlu1 %v2540_v36 }
 0x9ec   :  { %v2508_v26 = vadd.f32 %v4535_v4, %v2507_v12 }
 0x9ed   :  { %2289 = vmatpush.bf16.msrb.mxu1 %v2280_v48  ;;  %v6752_v29 = vpop.permute.xlu0 %2338  ;;  %v6754_v48 = vpop.permute.xlu2 %2333 }
 0x9ee   :  { %v2518_v62 = vmax.f32 %v2508_v26, 0.0 }
 0x9f0   :  { %4366 = vmatmul.msk.bf16.vlgmr.msrb.gmra.mxu1 %vm530_vm3, %v8334_v11  ;;  %v2529_v15 = vmul.f32 %v4536_v24, %v2518_v62 }
 0x9f1   :  { %v6756_v11 = vpop.permute.xlu1 %2323 }
 0x9f2   :  { %v2549_v27 = vsel %vm8336_vm15, %v2529_v15, 0.0 }
 0x9f3   :  { %v2509_v32 = vpop.f32.mrf.mxu2  ;;  %2550 = vadd.xlane.f32.xlu2 %v2549_v27 }
 0x9f4   :  { %v2510_v56 = vadd.f32 %v4535_v4, %v2509_v32 }
 0x9f5   :  { %v6758_v12 = vpop.permute.xlu0 %2313  ;;  %v6760_v4 = vpop.permute.xlu2 %2328 }
 0x9f6   :  { %v2519_v9 = vmax.f32 %v2510_v56, 0.0  ;;  %v4537_v56 = vld [vmem:[%s8173_s14 + $0x4] ss:$0 sm:$0xff] }
 0x9f8   :  { %v2530_v47 = vmul.f32 %v4536_v24, %v2519_v9 }
 0x9f9   :  { %v6764_v39 = vpop.permute.xlu1 %2318 }
 0x9fa   :  { %v2552_v34 = vsel %vm8335_vm14, %v2530_v47, 0.0 }
 0x9fb   :  { %2553 = vadd.xlane.f32.xlu0 %v2552_v34  ;;  %2547 = vadd.xlane.f32.xlu2 %v2546_v46 }
 0xa00   :  { %4367 = vmatmul.msk.bf16.gmra.mxu1 %vm530_vm3, %v8337_v40 }
 0xa03   :  { %2538 = vadd.xlane.f32.xlu0 %v2537_v60  ;;  %2532 = vadd.xlane.f32.xlu2 %v2531_v16 }
 0xa0b   :  { %2535 = vadd.xlane.f32.xlu0 %v2534_v53 }
 0xa10   :  { %4368 = vmatmul.msk.bf16.gmra.mxu1 %vm530_vm3, %v8344_v58 }
 0xa20   :  { %4369 = vmatmul.msk.bf16.gmra.mxu1 %vm530_vm3, %v6744_v41 }
 0xa56   :  { %v2545_v24 = vpop.xlane.xlu1 %2544 }
 0xa57   :  { %v2562_v15 = vadd.f32 %v4537_v56, %v2545_v24 }
 0xa59   :  { %v4389_v27 = vmul.f32 -1.442695, %v2562_v15 }
 0xa5e   :  { %v2542_v40 = vpop.xlane.xlu1 %2541 }
 0xa5f   :  { %v2561_v42 = vadd.f32 %v4537_v56, %v2542_v40 }
 0xa61   :  { %v4388_v46 = vmul.f32 -1.442695, %v2561_v42 }
 0xa66   :  { %v2551_v55 = vpop.xlane.xlu2 %2550 }
 0xa67   :  { %v2564_v9 = vadd.f32 %v4537_v56, %v2551_v55 }
 0xa69   :  { %v4391_v28 = vmul.f32 -1.442695, %v2564_v9 }
 0xa6b   :  { %4715 = vpow2.f32 %v4391_v28 }
 0xa6d   :  { %v6762_v26 = vpop.f32.mrf.mxu1 }
 0xa6e   :  { %v2554_v32 = vpop.xlane.xlu0 %2553  ;;  %v2548_v22 = vpop.xlane.xlu2 %2547 }
 0xa6f   :  { %v2565_v10 = vadd.f32 %v4537_v56, %v2554_v32  ;;  %v2563_v34 = vadd.f32 %v4537_v56, %v2548_v22 }
 0xa71   :  { %v4392_v44 = vmul.f32 -1.442695, %v2565_v10  ;;  %v4716_v18 = vpop.eup %4715  ;;  %v4390_v0 = vmul.f32 -1.442695, %v2563_v34 }
 0xa72   :  { %v6775_v3 = vadd.f32 1.0, %v4716_v18 }
 0xa73   :  { %4717 = vpow2.f32 %v4392_v44 }
 0xa74   :  { %4719 = vpow2.f32 %v4389_v27  ;;  %vm2693_vm9 = vweird.f32 %v6775_v3 }
 0xa75   :  { %v6766_v62 = vpop.f32.mrf.mxu1  ;;  %4721 = vpow2.f32 %v4390_v0 }
 0xa76   :  { %v2539_v51 = vpop.xlane.xlu0 %2538  ;;  %v2533_v5 = vpop.xlane.xlu2 %2532 }
 0xa77   :  { %v2560_v20 = vadd.f32 %v4537_v56, %v2539_v51  ;;  %v2558_v35 = vadd.f32 %v4537_v56, %v2533_v5 }
 0xa79   :  { %v4718_v50 = vpop.eup %4717  ;;  %v4387_v1 = vmul.f32 -1.442695, %v2560_v20  ;;  %v4385_v55 = vmul.f32 -1.442695, %v2558_v35  ;;  %v6821_v35 = vmul.f32 %v6764_v39, %v6766_v62  ;;  %v2697_v62 = vand.u32 2147483647, %v6775_v3 }
 0xa7a   :  { %v6777_v60 = vadd.f32 1.0, %v4718_v50  ;;  %v4720_v7 = vpop.eup %4719 }
 0xa7b   :  { %4723 = vpow2.f32 %v4387_v1  ;;  %v4722_v58 = vpop.eup %4721  ;;  %v6783_v32 = vadd.f32 1.0, %v4720_v7  ;;  %vm6863_vm13 = vcmp.eq.f32.partialorder %v2697_v62, 8.507059e+37 }
 0xa7c   :  { %4725 = vrcp.f32 %v6775_v3  ;;  %v6787_v24 = vadd.f32 1.0, %v4722_v58  ;;  %vm2708_vm4 = vweird.f32 %v6777_v60 }
 0xa7d   :  { %v6771_v47 = vpop.f32.mrf.mxu1  ;;  %4727 = vrcp.f32 %v6777_v60  ;;  %vm2663_vm15 = vweird.f32 %v6783_v32 }
 0xa7e   :  { %v2536_v37 = vpop.xlane.xlu0 %2535  ;;  %4729 = vpow2.f32 %v4388_v46  ;;  %v6816_v46 = vmul.f32 %v6758_v12, %v6762_v26  ;;  %v2699_v12 = vand.u32 2147483648, %v6775_v3  ;;  %vm2678_vm2 = vweird.f32 %v6787_v24 }
 0xa7f   :  { %v2559_v36 = vadd.f32 %v4537_v56, %v2536_v37 }
 0xa81   :  { %v4386_v16 = vmul.f32 -1.442695, %v2559_v36  ;;  %v4724_v10 = vpop.eup %4723 }
 0xa82   :  { %v6785_v9 = vpop.eup %4725  ;;  %v6796_v22 = vadd.f32 1.0, %v4724_v10 }
 0xa83   :  { %4731 = vpow2.f32 %v4386_v16  ;;  %v6789_v28 = vpop.eup %4727  ;;  %v2689_v44 = vmul.f32 %v6785_v9, %v6775_v3  ;;  %vm2694_vm11 = vweird.f32 %v6785_v9  ;;  %v6853_v3 = vmul.f32 %v6756_v11, %v6771_v47 }
 0xa84   :  { %4733 = vrcp.f32 %v6783_v32  ;;  %v4730_v56 = vpop.eup %4729  ;;  %v2704_v15 = vmul.f32 %v6789_v28, %v6777_v60  ;;  %vm2709_vm8 = vweird.f32 %v6789_v28  ;;  %vm6838_vm10 = vmor %vm2693_vm9, %vm2694_vm11  ;;  %vm2633_vm9 = vweird.f32 %v6796_v22 }
 0xa85   :  { %v6773_v59 = vpop.f32.mrf.mxu1  ;;  %4735 = vpow2.f32 %v4385_v55  ;;  %v6799_v34 = vadd.f32 1.0, %v4730_v56  ;;  %v2690_v40 = vsub.f32 1.0, %v2689_v44  ;;  %v2712_v44 = vand.u32 2147483647, %v6777_v60  ;;  %vm6847_vm12 = vmor %vm2708_vm4, %vm2709_vm8 }
 0xa86   :  { %4737 = vrcp.f32 %v6787_v24  ;;  %v2705_v0 = vsub.f32 1.0, %v2704_v15  ;;  %v2714_v15 = vand.u32 2147483648, %v6777_v60 }
 0xa87   :  { %4739 = vrcp.f32 %v6796_v22  ;;  %v2691_v5 = vmul.f32 %v6785_v9, %v2690_v40  ;;  %vm6873_vm14 = vcmp.eq.f32.partialorder %v2712_v44, 8.507059e+37  ;;  %vm2648_vm8 = vweird.f32 %v6799_v34 }
 0xa88   :  { %4741 = vrcp.f32 %v6799_v34  ;;  %v2706_v7 = vmul.f32 %v6789_v28, %v2705_v0 }
 0xa89   :  { %v4732_v27 = vpop.eup %4731  ;;  %v2692_v39 = vadd.f32 %v6785_v9, %v2691_v5  ;;  %v2700_v5 = vor.u32 1.1754944e-38, %v2699_v12  ;;  %v2637_v12 = vand.u32 2147483647, %v6796_v22 }
 0xa8a   :  { %v6801_v20 = vpop.eup %4733  ;;  %v6807_v42 = vadd.f32 1.0, %v4732_v27  ;;  %v2707_v56 = vadd.f32 %v6789_v28, %v2706_v7 }
 0xa8b   :  { %v4736_v18 = vpop.eup %4735  ;;  %v2659_v1 = vmul.f32 %v6801_v20, %v6783_v32  ;;  %v2696_v7 = vsel %vm6838_vm10, %v6785_v9, %v2692_v39  ;;  %vm2664_vm1 = vweird.f32 %v6801_v20 }
 0xa8c   :  { %v6805_v50 = vpop.eup %4737  ;;  %v6811_v37 = vadd.f32 1.0, %v4736_v18  ;;  %4743 = vrcp.f32 %v6807_v42  ;;  %v2711_v41 = vsel %vm6847_vm12, %v6789_v28, %v2707_v56  ;;  %v2669_v28 = vand.u32 2147483648, %v6783_v32  ;;  %vm6898_vm7 = vmor %vm2663_vm15, %vm2664_vm1 }
 0xa8d   :  { %v6781_v53 = vpop.f32.mrf.mxu1  ;;  %v2674_v16 = vmul.f32 %v6805_v50, %v6787_v24  ;;  %v6827_v58 = vpop.eup %4739  ;;  %v2660_v55 = vsub.f32 1.0, %v2659_v1  ;;  %vm2679_vm0 = vweird.f32 %v6805_v50 }
 0xa8e   :  { %v6833_v26 = vpop.eup %4741  ;;  %4745 = vrcp.f32 %v6811_v37  ;;  %v2629_v0 = vmul.f32 %v6827_v58, %v6796_v22  ;;  %vm6922_vm6 = vmor %vm2678_vm2, %vm2679_vm0  ;;  %vm2634_vm11 = vweird.f32 %v6827_v58  ;;  %vm2603_vm15 = vweird.f32 %v6811_v37 }
 0xa8f   :  { %v2675_v18 = vsub.f32 1.0, %v2674_v16  ;;  %v2644_v1 = vmul.f32 %v6833_v26, %v6799_v34  ;;  %v2661_v11 = vmul.f32 %v6801_v20, %v2660_v55  ;;  %v2667_v55 = vand.u32 2147483647, %v6783_v32  ;;  %vm6953_vm12 = vmor %vm2633_vm9, %vm2634_vm11 }
 0xa90   :  { %v2630_v10 = vsub.f32 1.0, %v2629_v0  ;;  %v2354_v0 = vmul.f32 %v6760_v4, %v6773_v59  ;;  %vm2649_vm10 = vweird.f32 %v6833_v26  ;;  %vm2618_vm0 = vweird.f32 %v6807_v42 }
 0xa91   :  { %v2676_v62 = vmul.f32 %v6805_v50, %v2675_v18  ;;  %v2662_v44 = vadd.f32 %v6801_v20, %v2661_v11  ;;  %v2645_v18 = vsub.f32 1.0, %v2644_v1  ;;  %v2682_v11 = vand.u32 2147483647, %v6787_v24 }
 0xa92   :  { %v6868_v47 = vpop.eup %4743  ;;  %vm6914_vm5 = vcmp.eq.f32.partialorder %v2667_v55, 8.507059e+37  ;;  %v2631_v59 = vmul.f32 %v6827_v58, %v2630_v10  ;;  %v2654_v10 = vand.u32 2147483648, %v6799_v34  ;;  %v2622_v4 = vand.u32 2147483647, %v6807_v42 }
 0xa93   :  { %v2666_v27 = vsel %vm6898_vm7, %v6801_v20, %v2662_v44  ;;  %vm2683_vm4 = vcmp.eq.f32.partialorder %v2682_v11, 8.507059e+37  ;;  %v2639_v20 = vand.u32 2147483648, %v6796_v22  ;;  %vm2619_vm7 = vweird.f32 %v6868_v47 }
 0xa94   :  { %v6878_v9 = vpop.eup %4745  ;;  %vm8373_vm9 = vcmask 523264  }
 0xa95   :  { %v2303_v51 = vpop.f32.mrf.mxu1  ;;  %v2640_v22 = vor.u32 1.1754944e-38, %v2639_v20  ;;  %vm2604_vm1 = vweird.f32 %v6878_v9 }
 0xa96   :  { %v2356_v60 = vmul.f32 %v6752_v29, %v2303_v51  ;;  %v2715_v29 = vor.u32 1.1754944e-38, %v2714_v15  ;;  %v2599_v15 = vmul.f32 %v6878_v9, %v6811_v37 }
 0xa98   :  { %v6912_v32 = vsel %vm6873_vm14, %v2715_v29, %v2711_v41  ;;  %v2670_v41 = vor.u32 1.1754944e-38, %v2669_v28  ;;  %v2632_v29 = vadd.f32 %v6827_v58, %v2631_v59  ;;  %vm6969_vm14 = vmor %vm2648_vm8, %vm2649_vm10  ;;  %v8370_v59 = vpack.c.bf16 %v6821_v35, %v6816_v46  ;;  %v7017_v46 = vld [vmem:[%s8161_s2] sm:$0xff] }
 0xa99   :  { %vm8374_vm8 = vmmov %vm8373_vm9 }
 0xa9a   :  { %vm8375_vm10 = vmmov %vm8374_vm8 }
 0xa9d   :  { %v2306_v36 = vpop.f32.mrf.mxu1 }
 0xa9e   :  { %v2357_v51 = vmul.f32 %v6748_v6, %v2306_v36  ;;  %v2684_v6 = vand.u32 2147483648, %v6787_v24  ;;  %v2614_v36 = vmul.f32 %v6868_v47, %v6807_v42 }
 0xaa0   :  { %v2685_v1 = vor.u32 1.1754944e-38, %v2684_v6  ;;  %v2615_v24 = vsub.f32 1.0, %v2614_v36  ;;  %v2365_v36 = vmul.f32 %v6702_v8, %v5515_v25 }
 0xaa2   :  { %v2616_v6 = vmul.f32 %v6868_v47, %v2615_v24 }
 0xaa5   :  { %v2308_v16 = vpop.f32.mrf.mxu1 }
 0xaa6   :  { %v2358_v39 = vmul.f32 %v6750_v57, %v2308_v16  ;;  %v2355_v57 = vmul.f32 %v6754_v48, %v6781_v53  ;;  %v6906_v48 = vsel %vm6863_vm13, %v2700_v5, %v2696_v7  ;;  %v2677_v53 = vadd.f32 %v6805_v50, %v2676_v62 }
 0xaa7   :  { %v2646_v5 = vmul.f32 %v6833_v26, %v2645_v18  ;;  %v2360_v62 = vpack.c.bf16 %v2354_v0, %v6853_v3  ;;  %v2760_v55 = vpack.c.bf16 %v6912_v32, %v6906_v48  ;;  %vm6963_vm13 = vcmp.eq.f32.partialorder %v2637_v12, 8.507059e+37 }
 0xaa8   :  { %v2362_v56 = vpack.c.bf16 %v2358_v39, %v2357_v51  ;;  %v2361_v16 = vpack.c.bf16 %v2356_v60, %v2355_v57  ;;  %v2600_v60 = vsub.f32 1.0, %v2599_v15  ;;  %v2681_v7 = vsel %vm6922_vm6, %v6805_v50, %v2677_v53  ;;  %vm7000_vm6 = vmor %vm2618_vm0, %vm2619_vm7 }
 0xaa9   :  { %v2652_v39 = vand.u32 2147483647, %v6799_v34  ;;  %v6947_v50 = vsel %vm6914_vm5, %v2670_v41, %v2666_v27  ;;  %v2647_v3 = vadd.f32 %v6833_v26, %v2646_v5  ;;  %v2636_v15 = vsel %vm6953_vm12, %v6827_v58, %v2632_v29  ;;  %vm6991_vm5 = vmor %vm2603_vm15, %vm2604_vm1 }
 0xaaa   :  { %2371 = vmatpush.bf16.msrb.mxu3 %v2362_v56  ;;  %v6958_v56 = vsel %vm2683_vm4, %v2685_v1, %v2681_v7  ;;  %v2601_v44 = vmul.f32 %v6878_v9, %v2600_v60  ;;  %v2655_v34 = vor.u32 1.1754944e-38, %v2654_v10  ;;  %v2607_v18 = vand.u32 2147483647, %v6811_v37  ;;  %vm8376_vm12 = vmmov %vm8374_vm8 }
 0xaab   :  { %vm6978_vm2 = vcmp.eq.f32.partialorder %v2652_v39, 8.507059e+37  ;;  %v2609_v0 = vand.u32 2147483648, %v6811_v37  ;;  %v2624_v53 = vand.u32 2147483648, %v6807_v42  ;;  %v2651_v11 = vsel %vm6969_vm14, %v6833_v26, %v2647_v3  ;;  %v4538_v39 = vld [vmem:[%s8169_s10 + $0x3] ss:$0 sm:$0xff] }
 0xaac   :  { %v2602_v58 = vadd.f32 %v6878_v9, %v2601_v44  ;;  %v2617_v51 = vadd.f32 %v6868_v47, %v2616_v6  ;;  %v2759_v26 = vpack.c.bf16 %v6958_v56, %v6947_v50  ;;  %v7008_v27 = vsel %vm6963_vm13, %v2640_v22, %v2636_v15 }
 0xaad   :  { %v7012_v41 = vsel %vm6978_vm2, %v2655_v34, %v2651_v11  ;;  %v2610_v42 = vor.u32 1.1754944e-38, %v2609_v0  ;;  %v2625_v1 = vor.u32 1.1754944e-38, %v2624_v53  ;;  %vm2608_vm11 = vcmp.eq.f32.partialorder %v2607_v18, 8.507059e+37 }
 0xaae   :  { %2372 = vmatpush.bf16.msrb.mxu3 %v2361_v16  ;;  %v2606_v35 = vsel %vm6991_vm5, %v6878_v9, %v2602_v58  ;;  %v2621_v5 = vsel %vm7000_vm6, %v6868_v47, %v2617_v51  ;;  %vm2623_vm4 = vcmp.eq.f32.partialorder %v2622_v4, 8.507059e+37  ;;  %v2758_v60 = vpack.c.bf16 %v7012_v41, %v7008_v27  ;;  %v7038_v9 = vld [vmem:[%s8161_s2 + $0x8] sm:$0xff] }
 0xaaf   :  { %v7029_v24 = vsel %vm2608_vm11, %v2610_v42, %v2606_v35  ;;  %v7031_v7 = vsel %vm2623_vm4, %v2625_v1, %v2621_v5  ;;  %v2363_v47 = vmul.f32 %v6717_v43, %v5447_v52  ;;  %v2364_v10 = vmul.f32 %v6710_v14, %v5441_v61 }
 0xab0   :  { %v2757_v12 = vpack.c.bf16 %v7031_v7, %v7029_v24  ;;  %v2366_v53 = vmul.f32 %v6705_v23, %v5480_v33  ;;  %v7081_v23 = vld [vmem:[%s8163_s4] sm:$0xff] }
 0xab2   :  { %2373 = vmatpush.bf16.msrb.mxu3 %v2360_v62 }
 0xab6   :  { %2374 = vmatpush.bf16.msrb.mxu3 %v8370_v59 }
 0xab9   :  { %4370 = vmatmul.msk.bf16.vlgmr.msrb.gmra.mxu3 %vm8373_vm9, %v7017_v46 }
 0xaba   :  { %2765 = vmatpush.bf16.msra.mxu3 %v2760_v55 }
 0xabe   :  { %2766 = vmatpush.bf16.msra.mxu3 %v2759_v26 }
 0xac2   :  { %2767 = vmatpush.bf16.msra.mxu3 %v2758_v60 }
 0xac6   :  { %2768 = vmatpush.bf16.msra.mxu3 %v2757_v12 }
 0xac9   :  { %4371 = vmatmul.msk.bf16.gmra.mxu3 %vm8374_vm8, %v7038_v9 }
 0xad9   :  { %4403 = vmatmul.msk.bf16.vlgmr.msra.gmra.mxu3 %vm8375_vm10, %v7017_v46 }
 0xae9   :  { %4404 = vmatmul.msk.bf16.gmra.mxu3 %vm8376_vm12, %v7038_v9 }
 0xb3c   :  { %v2376_v20 = vpop.f32.mrf.mxu3 }
 0xb3d   :  { %v2377_v29 = vadd.f32 %v2376_v20, %v2363_v47 }
 0xb3f   :  { %v2386_v62 = vmul.f32 %v2377_v29, %v6714_v38 }
 0xb41   :  { %v2393_v55 = vadd.f32 %v4538_v39, %v2386_v62 }
 0xb43   :  { %v2397_v28 = vadd.f32 %v2393_v55, %v6574_v31 }
 0xb44   :  { %v2378_v3 = vpop.f32.mrf.mxu3 }
 0xb45   :  { %v2379_v44 = vadd.f32 %v2378_v3, %v2364_v10  ;;  %v7056_v6 = vadd.f32 %v2397_v28, %v6574_v31  ;;  %v2405_v15 = vsel %vm530_vm3, %v2397_v28, 0.0 }
 0xb47   :  { %v2387_v43 = vmul.f32 %v2379_v44, %v6707_v17 }
 0xb49   :  { %v2394_v57 = vadd.f32 %v4538_v39, %v2387_v43 }
 0xb4b   :  { %v2398_v22 = vadd.f32 %v2394_v57, %v6583_v49  ;;  %v7101_v57 = vld [vmem:[%s8163_s4 + $0x10] sm:$0xff] }
 0xb4c   :  { %v2381_v38 = vpop.f32.mrf.mxu3  ;;  %8377 = vst [vmem:[#allocation6_spill] sm:$0xff] %v7101_v57 }
 0xb4d   :  { %v2406_v40 = vsel %vm530_vm3, %v2398_v22, 0.0  ;;  %v2382_v34 = vadd.f32 %v2381_v38, %v2365_v36  ;;  %v7065_v14 = vadd.f32 %v2398_v22, %v6583_v49 }
 0xb4e   :  { %v2407_v18 = vadd.f32 %v2406_v40, %v2405_v15 }
 0xb4f   :  { %v2388_v31 = vmul.f32 %v2382_v34, %v6697_v19 }
 0xb51   :  { %v2395_v0 = vadd.f32 %v4538_v39, %v2388_v31 }
 0xb53   :  { %v2399_v17 = vadd.f32 %v2395_v0, %v6591_v21 }
 0xb54   :  { %v2383_v11 = vpop.f32.mrf.mxu3 }
 0xb55   :  { %v2408_v8 = vsel %vm530_vm3, %v2399_v17, 0.0  ;;  %v2384_v58 = vadd.f32 %v2383_v11, %v2366_v53  ;;  %v7073_v16 = vadd.f32 %v2399_v17, %v6591_v21 }
 0xb56   :  { %v2409_v51 = vadd.f32 %v2408_v8, %v2407_v18 }
 0xb57   :  { %v2389_v49 = vmul.f32 %v2384_v58, %v6699_v2 }
 0xb59   :  { %v2396_v4 = vadd.f32 %v4538_v39, %v2389_v49  ;;  %v7090_v39 = vld [vmem:[%s8163_s4 + $0x8] sm:$0xff] }
 0xb5b   :  { %v2400_v59 = vadd.f32 %v2396_v4, %v6598_v45 }
 0xb5c   :  { %v2770_v19 = vpop.f32.mrf.mxu3 }
 0xb5d   :  { %v2410_v37 = vsel %vm530_vm3, %v2400_v59, 0.0  ;;  %v2771_v26 = vadd.f32 %v7081_v23, %v2770_v19  ;;  %v7085_v42 = vadd.f32 %v2400_v59, %v6598_v45  ;;  %v4508_v19 = vld [vmem:[%s8168_s9 + $0x38] sm:$0xff] }
 0xb5e   :  { %v2411_v21 = vadd.f32 %v2410_v37, %v2409_v51  ;;  %2744 = vmatpush.bf16.msrb.mxu0 %v4508_v19 }
 0xb5f   :  { %v2784_v1 = vmax.f32 %v2771_v26, 1e-12  ;;  %vm2780_vm1 = vcmp.gt.f32.partialorder %v2771_v26, 0.0  ;;  %v7133_v26 = vld [vmem:[%s8163_s4 + $0x18] sm:$0xff] }
 0xb60   :  { %v2412_v35 = vrot.slane %v2411_v21, 4  ;;  %8378 = vst [vmem:[#allocation7_spill] sm:$0xff] %v7133_v26 }
 0xb61   :  { %4747 = vrsqrt.f32 %v2784_v1  ;;  %vm2794_vm13 = vweird.f32 %v2784_v1 }
 0xb62   :  { %v2413_v2 = vadd.f32 %v2412_v35, %v2411_v21 }
 0xb64   :  { %v2414_v5 = vrot.slane %v2413_v2, 2  ;;  %v2772_v60 = vpop.f32.mrf.mxu3 }
 0xb65   :  { %v7093_v62 = vadd.f32 %v7090_v39, %v2772_v60 }
 0xb66   :  { %v2415_v12 = vadd.f32 %v2414_v5, %v2413_v2 }
 0xb67   :  { %v4748_v47 = vpop.eup %4747  ;;  %v7096_v44 = vmax.f32 %v7093_v62, 1e-12 }
 0xb68   :  { %v2416_v20 = vrot.slane %v2415_v12, 1  ;;  %v2789_v29 = vmul.f32 %v4748_v47, %v2784_v1  ;;  %vm2795_vm14 = vweird.f32 %v4748_v47 }
 0xb69   :  { %4749 = vrsqrt.f32 %v7096_v44  ;;  %vm2796_vm15 = vmor %vm2794_vm13, %vm2795_vm14  ;;  %vm2804_vm8 = vweird.f32 %v7096_v44  ;;  %vm2781_vm13 = vcmp.gt.f32.partialorder %v7093_v62, 0.0  ;;  %vm8379_vm14 = vcmask 1043456  }
 0xb6a   :  { %v2417_v45 = vadd.f32 %v2416_v20, %v2415_v12  ;;  %v2790_v55 = vmul.f32 %v4748_v47, %v2789_v29 }
 0xb6c   :  { %v2418_v10 = vmul.f32 0.03125, %v2417_v45  ;;  %v2791_v3 = vmul.f32 0.5, %v2790_v55  ;;  %v2775_v43 = vpop.f32.mrf.mxu3 }
 0xb6d   :  { %v7104_v36 = vadd.f32 %v7101_v57, %v2775_v43 }
 0xb6e   :  { %v7106_v38 = vsub.f32 %v2397_v28, %v2418_v10  ;;  %v7108_v15 = vsub.f32 %v2398_v22, %v2418_v10  ;;  %v7110_v40 = vsub.f32 %v2399_v17, %v2418_v10  ;;  %v7112_v34 = vsub.f32 %v2400_v59, %v2418_v10  ;;  %v4507_v10 = vld [vmem:[%s8168_s9 + $0x30] sm:$0xff] }
 0xb6f   :  { %v2786_v18 = vmax.f32 %v7104_v36, 1e-12  ;;  %v2792_v31 = vsub.f32 1.5, %v2791_v3  ;;  %v7136_v1 = vpop.eup %4749  ;;  %2745 = vmatpush.bf16.msrb.mxu0 %v4507_v10  ;;  %vm2782_vm5 = vcmp.gt.f32.partialorder %v7104_v36, 0.0 }
 0xb70   :  { %v2423_v0 = vmul.f32 %v7106_v38, %v7106_v38  ;;  %v2424_v53 = vmul.f32 %v7108_v15, %v7108_v15  ;;  %v2425_v11 = vmul.f32 %v7110_v40, %v7110_v40  ;;  %v2426_v22 = vmul.f32 %v7112_v34, %v7112_v34 }
 0xb71   :  { %4751 = vrsqrt.f32 %v2786_v18  ;;  %v2793_v28 = vmul.f32 %v4748_v47, %v2792_v31  ;;  %v2799_v20 = vmul.f32 %v7136_v1, %v7096_v44  ;;  %vm2814_vm2 = vweird.f32 %v2786_v18 }
 0xb72   :  { %v2427_v17 = vsel %vm530_vm3, %v2423_v0, 0.0  ;;  %v2428_v8 = vsel %vm530_vm3, %v2424_v53, 0.0  ;;  %v2430_v49 = vsel %vm530_vm3, %v2425_v11, 0.0  ;;  %v2432_v35 = vsel %vm530_vm3, %v2426_v22, 0.0 }
 0xb73   :  { %v2429_v58 = vadd.f32 %v2428_v8, %v2427_v17  ;;  %v2797_v51 = vsel %vm2796_vm15, %v4748_v47, %v2793_v28  ;;  %v2800_v43 = vmul.f32 %v7136_v1, %v2799_v20  ;;  %vm2805_vm10 = vweird.f32 %v7136_v1 }
 0xb74   :  { %v2777_v4 = vpop.f32.mrf.mxu3  ;;  %v2828_v59 = vsel %vm2780_vm1, %v2797_v51, 0.0  ;;  %vm2806_vm12 = vmor %vm2804_vm8, %vm2805_vm10  ;;  %vm8380_vm15 = vcmask 64512  }
 0xb75   :  { %v2431_v37 = vadd.f32 %v2430_v49, %v2429_v58  ;;  %v2778_v21 = vadd.f32 %v7133_v26, %v2777_v4  ;;  %2834 = vperm.xlu0 %4518, %v2828_v59   ;;  %v2801_v22 = vmul.f32 0.5, %v2800_v43 }
 0xb77   :  { %v4752_v2 = vpop.eup %4751  ;;  %v2433_v5 = vadd.f32 %v2432_v35, %v2431_v37  ;;  %v2787_v60 = vmax.f32 %v2778_v21, 1e-12  ;;  %v2802_v59 = vsub.f32 1.5, %v2801_v22  ;;  %vm2783_vm4 = vcmp.gt.f32.partialorder %v2778_v21, 0.0 }
 0xb78   :  { %v2809_v12 = vmul.f32 %v4752_v2, %v2786_v18  ;;  %vm2815_vm0 = vweird.f32 %v4752_v2 }
 0xb79   :  { %v2434_v47 = vrot.slane %v2433_v5, 4  ;;  %4753 = vrsqrt.f32 %v2787_v60  ;;  %vm2816_vm7 = vmor %vm2814_vm2, %vm2815_vm0  ;;  %vm2824_vm6 = vweird.f32 %v2787_v60 }
 0xb7a   :  { %v2810_v29 = vmul.f32 %v4752_v2, %v2809_v12 }
 0xb7b   :  { %v2435_v45 = vadd.f32 %v2434_v47, %v2433_v5 }
 0xb7c   :  { %v2811_v55 = vmul.f32 0.5, %v2810_v29 }
 0xb7d   :  { %v2436_v3 = vrot.slane %v2435_v45, 2  ;;  %2924 = vperm.xlu0 %4518, %v6912_v32  }
 0xb7e   :  { %v2812_v31 = vsub.f32 1.5, %v2811_v55 }
 0xb7f   :  { %v4754_v0 = vpop.eup %4753  ;;  %v2437_v53 = vadd.f32 %v2436_v3, %v2435_v45 }
 0xb80   :  { %v2819_v11 = vmul.f32 %v4754_v0, %v2787_v60  ;;  %v2813_v28 = vmul.f32 %v4752_v2, %v2812_v31  ;;  %vm2825_vm9 = vweird.f32 %v4754_v0 }
 0xb81   :  { %v2438_v18 = vrot.slane %v2437_v53, 1  ;;  %vm2826_vm11 = vmor %vm2824_vm6, %vm2825_vm9 }
 0xb82   :  { %v2820_v17 = vmul.f32 %v4754_v0, %v2819_v11  ;;  %v2817_v8 = vsel %vm2816_vm7, %v4752_v2, %v2813_v28  ;;  %v2803_v2 = vmul.f32 %v7136_v1, %v2802_v59  ;;  %vm8381_vm7 = vmmov %vm8380_vm15 }
 0xb83   :  { %v2439_v58 = vadd.f32 %v2438_v18, %v2437_v53  ;;  %v2830_v51 = vsel %vm2782_vm5, %v2817_v8, 0.0  ;;  %vm8382_vm5 = vmmov %vm8381_vm7 }
 0xb84   :  { %v2821_v49 = vmul.f32 0.5, %v2820_v17  ;;  %2844 = vperm.xlu1 %4519, %v2830_v51   ;;  %v2807_v44 = vsel %vm2806_vm12, %v7136_v1, %v2803_v2  ;;  %vm8383_vm6 = vmmov %vm8382_vm5 }
 0xb85   :  { %v2440_v32 = vmul.f32 0.03125, %v2439_v58  ;;  %2899 = vperm.xlu0 %4518, %v7008_v27   ;;  %v4416_v27 = vld [vmem:[%s8170_s11 + $0x28] sm:$0xff]  ;;  %v2829_v47 = vsel %vm2781_vm13, %v2807_v44, 0.0  ;;  %vm8386_vm9 = vmmov %vm8382_vm5 }
 0xb86   :  { %v2822_v4 = vsub.f32 1.5, %v2821_v49  ;;  %v3052_v21 = vpack.c.bf16 %v4416_v27, %v4416_v27 }
 0xb87   :  { %v2441_v19 = vmax.f32 %v2440_v32, 0.0 }
 0xb88   :  { %v2823_v36 = vmul.f32 %v4754_v0, %v2822_v4  ;;  %v3057_v60 = vsel %vm8379_vm14, %v3052_v21, 0  ;;  %v7204_v4 = vld [vmem:[%s8162_s3] sm:$0xff] }
 0xb89   :  { %v2442_v37 = vadd.f32 1e-05, %v2441_v19  ;;  %3066 = vmatpush.bf16.msrb.mxu3 %v3057_v60  ;;  %8384 = vst [vmem:[#allocation8_spill] sm:$0xff] %v7204_v4  ;;  %v4539_v19 = vld [vmem:[%s8171_s12 + $0x5] ss:$0 sm:$0xff] }
 0xb8a   :  { %v2827_v35 = vsel %vm2826_vm11, %v4754_v0, %v2823_v36  ;;  %vm8387_vm11 = vmmov %vm8382_vm5 }
 0xb8b   :  { %4755 = vrsqrt.f32 %v2442_v37  ;;  %v2831_v5 = vsel %vm2783_vm4, %v2827_v35, 0.0  ;;  %vm2449_vm2 = vweird.f32 %v2442_v37  ;;  %vm8388_vm4 = vmmov %vm8382_vm5 }
 0xb8c   :  { %2849 = vperm.xlu2 %4517, %v2831_v5   ;;  %2919 = vperm.xlu1 %4519, %v6906_v48   ;;  %vm8389_vm8 = vmmov %vm8388_vm4 }
 0xb8d   :  { %2894 = vperm.xlu0 %4518, %v7031_v7   ;;  %4420 = vmatmul.msk.bf16.vlgmr.msrb.gmra.mxu3 %vm8380_vm15, %v6660_v30  ;;  %vm8390_vm10 = vmmov %vm8388_vm4 }
 0xb8e   :  { %vm8391_vm12 = vmmov %vm8388_vm4 }
 0xb8f   :  { %vm8392_vm13 = vmmov %vm8388_vm4 }
 0xb90   :  { %vm8393_vm14 = vmmov %vm8388_vm4 }
 0xb91   :  { %v4756_v12 = vpop.eup %4755 }
 0xb92   :  { %v2444_v20 = vmul.f32 %v4756_v12, %v2442_v37  ;;  %vm2450_vm1 = vweird.f32 %v4756_v12 }
 0xb93   :  { %vm2451_vm0 = vmor %vm2449_vm2, %vm2450_vm1 }
 0xb94   :  { %v2445_v48 = vmul.f32 %v4756_v12, %v2444_v20  ;;  %2914 = vperm.xlu1 %4519, %v6958_v56   ;;  %2839 = vperm.xlu2 %4517, %v2829_v47   ;;  %v4540_v47 = vld [vmem:[%s8172_s13 + $0x5] ss:$0 sm:$0xff] }
 0xb96   :  { %v2446_v29 = vmul.f32 0.5, %v2445_v48 }
 0xb98   :  { %v2447_v7 = vsub.f32 1.5, %v2446_v29 }
 0xb9a   :  { %v2448_v45 = vmul.f32 %v4756_v12, %v2447_v7 }
 0xb9c   :  { %2889 = vperm.xlu1 %4519, %v7029_v24   ;;  %2909 = vperm.xlu2 %4517, %v6947_v50   ;;  %v2452_v62 = vsel %vm2451_vm0, %v4756_v12, %v2448_v45  ;;  %v7217_v45 = vld [vmem:[%s8162_s3 + $0x8] sm:$0xff] }
 0xb9d   :  { %v2453_v1 = vmul.f32 %v2452_v62, %v7106_v38  ;;  %v2454_v55 = vmul.f32 %v2452_v62, %v7108_v15  ;;  %v2455_v30 = vmul.f32 %v2452_v62, %v7110_v40  ;;  %v2456_v56 = vmul.f32 %v2452_v62, %v7112_v34  ;;  %4421 = vmatmul.msk.bf16.gmra.mxu3 %vm8381_vm7, %v6675_v13 }
 0xb9e   :  { %8385 = vst [vmem:[#allocation9_spill] sm:$0xff] %v7217_v45 }
 0xb9f   :  { %v2457_v10 = vmax.f32 %v2453_v1, 0.0  ;;  %v2458_v3 = vmax.f32 %v2454_v55, 0.0  ;;  %v2459_v43 = vmax.f32 %v2455_v30, 0.0  ;;  %v2460_v31 = vmax.f32 %v2456_v56, 0.0 }
 0xba1   :  { %v2718_v0 = vpack.c.bf16 %v2458_v3, %v2457_v10  ;;  %v2719_v53 = vpack.c.bf16 %v2460_v31, %v2459_v43 }
 0xba3   :  { %4401 = vmatmul.msk.bf16.vlgmr.msrb.gmra.mxu0 %vm530_vm3, %v2718_v0 }
 0xba4   :  { %2904 = vperm.xlu2 %4517, %v7012_v41  }
 0xbad   :  { %4422 = vmatmul.msk.bf16.gmra.mxu3 %vm8382_vm5, %v6685_v54 }
 0xbb3   :  { %4402 = vmatmul.msk.bf16.gmra.mxu0 %vm530_vm3, %v2719_v53 }
 0xbbd   :  { %4423 = vmatmul.msk.bf16.gmra.mxu3 %vm8383_vm6, %v6693_v63 }
 0xbe6   :  { %v7177_v11 = vpop.permute.xlu2 %2849 }
 0xbe7   :  { %v7194_v58 = vpop.permute.xlu0 %2834 }
 0xbee   :  { %v7187_v63 = vpop.permute.xlu2 %2839 }
 0xbf6   :  { %v7179_v18 = vpop.permute.xlu1 %2844 }
 0xc10   :  { %v3068_v50 = vpop.f32.mrf.mxu3 }
 0xc11   :  { %v3069_v10 = vadd.f32 %v4539_v19, %v3068_v50 }
 0xc13   :  { %v3088_v53 = vmax.f32 %v3069_v10, 0.0 }
 0xc18   :  { %v3070_v24 = vpop.f32.mrf.mxu3 }
 0xc19   :  { %v3071_v3 = vadd.f32 %v4539_v19, %v3070_v24 }
 0xc20   :  { %v2747_v38 = vpop.f32.mrf.mxu0  ;;  %v3073_v15 = vpop.f32.mrf.mxu3 }
 0xc21   :  { %v7197_v51 = vmul.f32 %v7194_v58, %v2747_v38  ;;  %v3074_v2 = vadd.f32 %v4539_v19, %v3073_v15  ;;  %v3089_v38 = vmax.f32 %v3071_v3, 0.0 }
 0xc23   :  { %v3090_v20 = vmax.f32 %v3074_v2, 0.0 }
 0xc25   :  { %v3101_v43 = vmul.f32 %v4540_v47, %v3090_v20 }
 0xc27   :  { %v3113_v15 = vsel %vm8389_vm8, %v3101_v43, 0.0 }
 0xc28   :  { %v2749_v40 = vpop.f32.mrf.mxu0  ;;  %v3075_v34 = vpop.f32.mrf.mxu3 }
 0xc29   :  { %v7190_v17 = vmul.f32 %v7187_v63, %v2749_v40  ;;  %v3076_v44 = vadd.f32 %v4539_v19, %v3075_v34 }
 0xc2b   :  { %v2856_v32 = vpack.c.bf16 %v7190_v17, %v7197_v51  ;;  %v3091_v62 = vmax.f32 %v3076_v44, 0.0 }
 0xc2d   :  { %v3102_v0 = vmul.f32 %v4540_v47, %v3091_v62 }
 0xc2f   :  { %v3116_v34 = vsel %vm8391_vm12, %v3102_v0, 0.0 }
 0xc30   :  { %v2752_v28 = vpop.f32.mrf.mxu0  ;;  %v3078_v13 = vpop.f32.mrf.mxu3 }
 0xc31   :  { %v7182_v22 = vmul.f32 %v7179_v18, %v2752_v28  ;;  %v3079_v37 = vadd.f32 %v4539_v19, %v3078_v13  ;;  %v3100_v28 = vmul.f32 %v4540_v47, %v3089_v38  ;;  %v3099_v13 = vmul.f32 %v4540_v47, %v3088_v53 }
 0xc33   :  { %v3092_v60 = vmax.f32 %v3079_v37, 0.0  ;;  %v3110_v50 = vsel %vm8392_vm13, %v3100_v28, 0.0  ;;  %v3107_v24 = vsel %vm8393_vm14, %v3099_v13, 0.0 }
 0xc35   :  { %v3103_v1 = vmul.f32 %v4540_v47, %v3092_v60  ;;  %v4541_v60 = vld [vmem:[%s8173_s14 + $0x5] ss:$0 sm:$0xff] }
 0xc37   :  { %v3119_v56 = vsel %vm8388_vm4, %v3103_v1, 0.0 }
 0xc38   :  { %v2754_v41 = vpop.f32.mrf.mxu0  ;;  %v3080_v49 = vpop.f32.mrf.mxu3  ;;  %3120 = vadd.xlane.f32.xlu0 %v3119_v56 }
 0xc39   :  { %v7185_v54 = vmul.f32 %v7177_v11, %v2754_v41  ;;  %v3081_v5 = vadd.f32 %v4539_v19, %v3080_v49  ;;  %v7232_v41 = vld [vmem:[%s8162_s3 + $0x10] sm:$0xff]  ;;  %v7238_v49 = vpop.permute.xlu1 %2919 }
 0xc3a   :  { %8394 = vst [vmem:[#allocation10_spill] sm:$0xff] %v7232_v41 }
 0xc3b   :  { %v2857_v8 = vpack.c.bf16 %v7185_v54, %v7182_v22  ;;  %v3093_v48 = vmax.f32 %v3081_v5, 0.0 }
 0xc3d   :  { %2864 = vmatpush.bf16.msra.mxu0 %v2857_v8  ;;  %v3104_v31 = vmul.f32 %v4540_v47, %v3093_v48  ;;  %v8395_v8 = vld [vmem:[#allocation5_spill] sm:$0xff] }
 0xc3f   :  { %v3122_v40 = vsel %vm8390_vm10, %v3104_v31, 0.0 }
 0xc40   :  { %v3083_v59 = vpop.f32.mrf.mxu3  ;;  %3117 = vadd.xlane.f32.xlu0 %v3116_v34 }
 0xc41   :  { %2865 = vmatpush.bf16.msra.mxu0 %v2856_v32  ;;  %v3084_v36 = vadd.f32 %v4539_v19, %v3083_v59  ;;  %v7240_v32 = vpop.permute.xlu0 %2924  ;;  %v7242_v59 = vpop.permute.xlu1 %2914 }
 0xc43   :  { %v3094_v27 = vmax.f32 %v3084_v36, 0.0 }
 0xc44   :  { %4405 = vmatmul.msk.bf16.vlgmr.msra.gmra.mxu0 %vm530_vm3, %v7204_v4 }
 0xc45   :  { %v3105_v7 = vmul.f32 %v4540_v47, %v3094_v27 }
 0xc47   :  { %v3125_v30 = vsel %vm8387_vm11, %v3105_v7, 0.0 }
 0xc48   :  { %v3085_v35 = vpop.f32.mrf.mxu3  ;;  %3126 = vadd.xlane.f32.xlu2 %v3125_v30 }
 0xc49   :  { %v3086_v21 = vadd.f32 %v4539_v19, %v3085_v35  ;;  %v7244_v19 = vpop.permute.xlu2 %2909  ;;  %v7246_v36 = vpop.permute.xlu0 %2899 }
 0xc4a   :  { %v7248_v37 = vpop.permute.xlu1 %2889 }
 0xc4b   :  { %v3095_v12 = vmax.f32 %v3086_v21, 0.0 }
 0xc4d   :  { %v3106_v29 = vmul.f32 %v4540_v47, %v3095_v12 }
 0xc4f   :  { %v3128_v55 = vsel %vm8386_vm9, %v3106_v29, 0.0 }
 0xc50   :  { %3129 = vadd.xlane.f32.xlu1 %v3128_v55  ;;  %3123 = vadd.xlane.f32.xlu2 %v3122_v40 }
 0xc51   :  { %v7252_v2 = vpop.permute.xlu2 %2904  ;;  %v7254_v5 = vpop.permute.xlu0 %2894 }
 0xc54   :  { %4406 = vmatmul.msk.bf16.gmra.mxu0 %vm530_vm3, %v7217_v45 }
 0xc58   :  { %3114 = vadd.xlane.f32.xlu1 %v3113_v15  ;;  %3108 = vadd.xlane.f32.xlu2 %v3107_v24 }
 0xc60   :  { %3111 = vadd.xlane.f32.xlu1 %v3110_v50 }
 0xc64   :  { %4407 = vmatmul.msk.bf16.gmra.mxu0 %vm530_vm3, %v7232_v41 }
 0xc74   :  { %4408 = vmatmul.msk.bf16.gmra.mxu0 %vm530_vm3, %v8395_v8 }
 0xcab   :  { %v3121_v12 = vpop.xlane.xlu0 %3120 }
 0xcac   :  { %v3138_v1 = vadd.f32 %v4541_v60, %v3121_v12 }
 0xcae   :  { %v4428_v56 = vmul.f32 -1.442695, %v3138_v1 }
 0xcb3   :  { %v3118_v10 = vpop.xlane.xlu0 %3117 }
 0xcb4   :  { %v3137_v38 = vadd.f32 %v4541_v60, %v3118_v10 }
 0xcb6   :  { %v4427_v24 = vmul.f32 -1.442695, %v3137_v38 }
 0xcbb   :  { %v3127_v44 = vpop.xlane.xlu2 %3126 }
 0xcbc   :  { %v3140_v20 = vadd.f32 %v4541_v60, %v3127_v44 }
 0xcbe   :  { %v4430_v29 = vmul.f32 -1.442695, %v3140_v20 }
 0xcc1   :  { %v7250_v35 = vpop.f32.mrf.mxu0 }
 0xcc3   :  { %v3130_v21 = vpop.xlane.xlu1 %3129  ;;  %v3124_v55 = vpop.xlane.xlu2 %3123 }
 0xcc4   :  { %v3141_v47 = vadd.f32 %v4541_v60, %v3130_v21  ;;  %v3139_v30 = vadd.f32 %v4541_v60, %v3124_v55 }
 0xcc6   :  { %v4431_v48 = vmul.f32 -1.442695, %v3141_v47  ;;  %v4429_v43 = vmul.f32 -1.442695, %v3139_v30 }
 0xcc8   :  { %4757 = vpow2.f32 %v4431_v48 }
 0xcc9   :  { %v7256_v27 = vpop.f32.mrf.mxu0  ;;  %4759 = vpow2.f32 %v4430_v29 }
 0xcca   :  { %4761 = vpow2.f32 %v4428_v56 }
 0xccb   :  { %v3115_v62 = vpop.xlane.xlu1 %3114  ;;  %4763 = vpow2.f32 %v4429_v43  ;;  %v3109_v28 = vpop.xlane.xlu2 %3108 }
 0xccc   :  { %v3136_v53 = vadd.f32 %v4541_v60, %v3115_v62  ;;  %v3134_v21 = vadd.f32 %v4541_v60, %v3109_v28 }
 0xcce   :  { %v4758_v3 = vpop.eup %4757  ;;  %v4426_v13 = vmul.f32 -1.442695, %v3136_v53  ;;  %v4424_v48 = vmul.f32 -1.442695, %v3134_v21 }
 0xccf   :  { %v4760_v31 = vpop.eup %4759  ;;  %v7267_v34 = vadd.f32 1.0, %v4758_v3 }
 0xcd0   :  { %v7265_v40 = vadd.f32 1.0, %v4760_v31  ;;  %v4762_v8 = vpop.eup %4761 }
 0xcd1   :  { %v7261_v7 = vpop.f32.mrf.mxu0  ;;  %v4764_v47 = vpop.eup %4763  ;;  %v7271_v20 = vadd.f32 1.0, %v4762_v8  ;;  %vm3284_vm2 = vweird.f32 %v7267_v34 }
 0xcd2   :  { %4765 = vrcp.f32 %v7265_v40  ;;  %v7275_v62 = vadd.f32 1.0, %v4764_v47  ;;  %vm3269_vm15 = vweird.f32 %v7265_v40 }
 0xcd3   :  { %v3112_v15 = vpop.xlane.xlu1 %3111  ;;  %4767 = vrcp.f32 %v7267_v34  ;;  %vm3239_vm11 = vweird.f32 %v7271_v20  ;;  %v3243_v41 = vand.u32 2147483647, %v7271_v20 }
 0xcd4   :  { %v3135_v50 = vadd.f32 %v4541_v60, %v3112_v15  ;;  %4769 = vpow2.f32 %v4426_v13  ;;  %vm3254_vm8 = vweird.f32 %v7275_v62 }
 0xcd5   :  { %4771 = vpow2.f32 %v4427_v24  ;;  %vm7401_vm13 = vcmp.eq.f32.partialorder %v3243_v41, 8.507059e+37 }
 0xcd6   :  { %v4425_v12 = vmul.f32 -1.442695, %v3135_v50 }
 0xcd8   :  { %v7273_v29 = vpop.eup %4765  ;;  %4773 = vpow2.f32 %v4425_v12  ;;  %v7304_v12 = vmul.f32 %v7248_v37, %v7250_v35 }
 0xcd9   :  { %v7263_v0 = vpop.f32.mrf.mxu0  ;;  %v7277_v1 = vpop.eup %4767  ;;  %4775 = vrcp.f32 %v7271_v20  ;;  %v3265_v30 = vmul.f32 %v7273_v29, %v7265_v40  ;;  %vm3270_vm1 = vweird.f32 %v7273_v29 }
 0xcda   :  { %v4770_v60 = vpop.eup %4769  ;;  %4777 = vpow2.f32 %v4424_v48  ;;  %v3280_v10 = vmul.f32 %v7277_v1, %v7267_v34  ;;  %vm3285_vm0 = vweird.f32 %v7277_v1  ;;  %vm7326_vm7 = vmor %vm3269_vm15, %vm3270_vm1 }
 0xcdb   :  { %v4772_v55 = vpop.eup %4771  ;;  %4779 = vrcp.f32 %v7275_v62  ;;  %v7285_v3 = vadd.f32 1.0, %v4770_v60  ;;  %v3266_v38 = vsub.f32 1.0, %v3265_v30  ;;  %v7309_v60 = vmul.f32 %v7254_v5, %v7256_v27  ;;  %vm7334_vm5 = vmor %vm3284_vm2, %vm3285_vm0 }
 0xcdc   :  { %v7287_v31 = vadd.f32 1.0, %v4772_v55  ;;  %v3281_v28 = vsub.f32 1.0, %v3280_v10  ;;  %v3275_v30 = vand.u32 2147483648, %v7265_v40  ;;  %v3273_v5 = vand.u32 2147483647, %v7265_v40 }
 0xcdd   :  { %4781 = vrcp.f32 %v7285_v3  ;;  %v3267_v21 = vmul.f32 %v7273_v29, %v3266_v38  ;;  %v3290_v40 = vand.u32 2147483648, %v7267_v34  ;;  %vm3209_vm15 = vweird.f32 %v7285_v3 }
 0xcde   :  { %v4774_v43 = vpop.eup %4773  ;;  %4783 = vrcp.f32 %v7287_v31  ;;  %v3282_v48 = vmul.f32 %v7277_v1, %v3281_v28  ;;  %vm7348_vm6 = vcmp.eq.f32.partialorder %v3273_v5, 8.507059e+37  ;;  %vm3224_vm0 = vweird.f32 %v7287_v31 }
 0xcdf   :  { %v7289_v53 = vpop.eup %4775  ;;  %v7295_v50 = vadd.f32 1.0, %v4774_v43  ;;  %v3268_v35 = vadd.f32 %v7273_v29, %v3267_v21 }
 0xce0   :  { %v4778_v15 = vpop.eup %4777  ;;  %v3235_v24 = vmul.f32 %v7289_v53, %v7271_v20  ;;  %v3283_v38 = vadd.f32 %v7277_v1, %v3282_v48  ;;  %v3276_v48 = vor.u32 1.1754944e-38, %v3275_v30  ;;  %vm3240_vm4 = vweird.f32 %v7289_v53 }
 0xce1   :  { %v2877_v44 = vpop.f32.mrf.mxu0  ;;  %v7292_v13 = vpop.eup %4779  ;;  %v7299_v8 = vadd.f32 1.0, %v4778_v15  ;;  %4785 = vrcp.f32 %v7295_v50  ;;  %v3288_v15 = vand.u32 2147483647, %v7267_v34  ;;  %v3272_v28 = vsel %vm7326_vm7, %v7273_v29, %v3268_v35  ;;  %vm7385_vm12 = vmor %vm3239_vm11, %vm3240_vm4 }
 0xce2   :  { %v3250_v55 = vmul.f32 %v7292_v13, %v7275_v62  ;;  %v3236_v27 = vsub.f32 1.0, %v3235_v24  ;;  %v2931_v21 = vmul.f32 %v7244_v19, %v2877_v44  ;;  %v3287_v44 = vsel %vm7334_vm5, %v7277_v1, %v3283_v38 }
 0xce3   :  { %v7319_v37 = vpop.eup %4781  ;;  %4787 = vrcp.f32 %v7299_v8  ;;  %vm7358_vm9 = vcmp.eq.f32.partialorder %v3288_v15, 8.507059e+37  ;;  %v3291_v35 = vor.u32 1.1754944e-38, %v3290_v40  ;;  %v3245_v1 = vand.u32 2147483648, %v7271_v20 }
 0xce4   :  { %v7324_v10 = vpop.eup %4783  ;;  %v3251_v24 = vsub.f32 1.0, %v3250_v55  ;;  %v3205_v4 = vmul.f32 %v7319_v37, %v7285_v3  ;;  %v3237_v34 = vmul.f32 %v7289_v53, %v3236_v27  ;;  %vm3255_vm10 = vweird.f32 %v7292_v13 }
 0xce5   :  { %v3220_v26 = vmul.f32 %v7324_v10, %v7287_v31  ;;  %v3260_v15 = vand.u32 2147483648, %v7275_v62  ;;  %v7399_v20 = vsel %vm7358_vm9, %v3291_v35, %v3287_v44  ;;  %vm7409_vm14 = vmor %vm3254_vm8, %vm3255_vm10  ;;  %vm3210_vm1 = vweird.f32 %v7319_v37 }
 0xce6   :  { %v3252_v5 = vmul.f32 %v7292_v13, %v3251_v24  ;;  %v3206_v27 = vsub.f32 1.0, %v3205_v4  ;;  %v3238_v38 = vadd.f32 %v7289_v53, %v3237_v34  ;;  %v2930_v24 = vmul.f32 %v7252_v2, %v7263_v0  ;;  %vm7439_vm5 = vmor %vm3209_vm15, %vm3210_vm1 }
 0xce7   :  { %v7353_v19 = vpop.eup %4785  ;;  %v3221_v40 = vsub.f32 1.0, %v3220_v26  ;;  %v3246_v2 = vor.u32 1.1754944e-38, %v3245_v1  ;;  %v3261_v0 = vor.u32 1.1754944e-38, %v3260_v15  ;;  %v3213_v44 = vand.u32 2147483647, %v7285_v3 }
 0xce8   :  { %v3207_v57 = vmul.f32 %v7319_v37, %v3206_v27  ;;  %vm3225_vm7 = vweird.f32 %v7324_v10  ;;  %v3230_v1 = vand.u32 2147483648, %v7287_v31  ;;  %vm3179_vm11 = vweird.f32 %v7299_v8 }
 0xce9   :  { %v2879_v56 = vpop.f32.mrf.mxu0  ;;  %v7364_v29 = vpop.eup %4787  ;;  %vm7455_vm9 = vmor %vm3224_vm0, %vm3225_vm7  ;;  %vm3194_vm10 = vweird.f32 %v7295_v50  ;;  %v3198_v26 = vand.u32 2147483647, %v7295_v50  ;;  %vm8423_vm15 = vcmask 523264   ;;  %v2942_v4 = vmul.f32 %v7185_v54, %v5480_v33 }
 0xcea   :  { %v2932_v45 = vmul.f32 %v7242_v59, %v2879_v56  ;;  %v3208_v56 = vadd.f32 %v7319_v37, %v3207_v57  ;;  %vm3180_vm4 = vweird.f32 %v7364_v29  ;;  %v8420_v57 = vpack.c.bf16 %v7309_v60, %v7304_v12  ;;  %vm8424_vm0 = vmmov %vm8423_vm15 }
 0xceb   :  { %vm8425_vm7 = vmmov %vm8424_vm0 }
 0xcec   :  { %v2937_v34 = vpack.c.bf16 %v2932_v45, %v2931_v21  ;;  %v3242_v45 = vsel %vm7385_vm12, %v7289_v53, %v3238_v38  ;;  %v3215_v53 = vand.u32 2147483648, %v7285_v3  ;;  %vm3195_vm12 = vweird.f32 %v7353_v19 }
 0xcee   :  { %v3216_v3 = vor.u32 1.1754944e-38, %v3215_v53  ;;  %v4542_v53 = vld [vmem:[%s8169_s10 + $0x4] ss:$0 sm:$0xff] }
 0xcf1   :  { %v2882_v47 = vpop.f32.mrf.mxu0 }
 0xcf2   :  { %v2933_v55 = vmul.f32 %v7238_v49, %v2882_v47  ;;  %v2929_v49 = vmul.f32 %v7246_v36, %v7261_v7  ;;  %v3175_v47 = vmul.f32 %v7364_v29, %v7299_v8  ;;  %v3253_v36 = vadd.f32 %v7292_v13, %v3252_v5 }
 0xcf3   :  { %v3258_v7 = vand.u32 2147483647, %v7275_v62 }
 0xcf4   :  { %v3176_v21 = vsub.f32 1.0, %v3175_v47  ;;  %v2936_v35 = vpack.c.bf16 %v2930_v24, %v2929_v49  ;;  %v3212_v47 = vsel %vm7439_vm5, %v7319_v37, %v3208_v56  ;;  %v3185_v24 = vand.u32 2147483648, %v7299_v8  ;;  %vm8426_vm5 = vmmov %vm8424_vm0 }
 0xcf5   :  { %vm3259_vm2 = vcmp.eq.f32.partialorder %v3258_v7, 8.507059e+37 }
 0xcf6   :  { %v3177_v38 = vmul.f32 %v7364_v29, %v3176_v21 }
 0xcf8   :  { %v3178_v37 = vadd.f32 %v7364_v29, %v3177_v38  ;;  %v2941_v38 = vmul.f32 %v7182_v22, %v5515_v25 }
 0xcf9   :  { %v2884_v59 = vpop.f32.mrf.mxu0 }
 0xcfa   :  { %v2934_v30 = vmul.f32 %v7240_v32, %v2884_v59  ;;  %v3190_v32 = vmul.f32 %v7353_v19, %v7295_v50  ;;  %v7395_v59 = vsel %vm7348_vm6, %v3276_v48, %v3272_v28  ;;  %v3222_v28 = vmul.f32 %v7324_v10, %v3221_v40 }
 0xcfb   :  { %v3257_v48 = vsel %vm7409_vm14, %v7292_v13, %v3253_v36  ;;  %v3336_v5 = vpack.c.bf16 %v7399_v20, %v7395_v59  ;;  %v7433_v13 = vsel %vm7401_vm13, %v3246_v2, %v3242_v45  ;;  %vm7449_vm6 = vcmp.eq.f32.partialorder %v3213_v44, 8.507059e+37  ;;  %vm7477_vm13 = vmor %vm3179_vm11, %vm3180_vm4 }
 0xcfc   :  { %v2938_v43 = vpack.c.bf16 %v2934_v30, %v2933_v55  ;;  %v3191_v62 = vsub.f32 1.0, %v3190_v32  ;;  %v3228_v30 = vand.u32 2147483647, %v7287_v31  ;;  %v7444_v27 = vsel %vm3259_vm2, %v3261_v0, %v3257_v48  ;;  %vm7486_vm14 = vmor %vm3194_vm10, %vm3195_vm12 }
 0xcfd   :  { %v3231_v31 = vor.u32 1.1754944e-38, %v3230_v1  ;;  %v3183_v40 = vand.u32 2147483647, %v7299_v8  ;;  %v7494_v45 = vsel %vm7449_vm6, %v3216_v3, %v3212_v47  ;;  %v3182_v12 = vsel %vm7477_vm13, %v7364_v29, %v3178_v37 }
 0xcfe   :  { %2947 = vmatpush.bf16.msra.mxu1 %v2938_v43  ;;  %v3223_v43 = vadd.f32 %v7324_v10, %v3222_v28  ;;  %v3192_v15 = vmul.f32 %v7353_v19, %v3191_v62  ;;  %vm7464_vm8 = vcmp.eq.f32.partialorder %v3228_v30, 8.507059e+37  ;;  %vm3199_vm2 = vcmp.eq.f32.partialorder %v3198_v26, 8.507059e+37 }
 0xcff   :  { %vm3184_vm1 = vcmp.eq.f32.partialorder %v3183_v40, 8.507059e+37 }
 0xd00   :  { %v3227_v36 = vsel %vm7455_vm9, %v7324_v10, %v3223_v43  ;;  %v3193_v55 = vadd.f32 %v7353_v19, %v3192_v15  ;;  %v3335_v10 = vpack.c.bf16 %v7444_v27, %v7433_v13 }
 0xd01   :  { %v7498_v2 = vsel %vm7464_vm8, %v3231_v31, %v3227_v36 }
 0xd02   :  { %2948 = vmatpush.bf16.msra.mxu1 %v2937_v34  ;;  %v3200_v34 = vand.u32 2147483648, %v7295_v50  ;;  %v3186_v50 = vor.u32 1.1754944e-38, %v3185_v24  ;;  %v3197_v60 = vsel %vm7486_vm14, %v7353_v19, %v3193_v55  ;;  %v3334_v28 = vpack.c.bf16 %v7498_v2, %v7494_v45 }
 0xd03   :  { %v2939_v19 = vmul.f32 %v7197_v51, %v5447_v52 }
 0xd04   :  { %v3201_v0 = vor.u32 1.1754944e-38, %v3200_v34  ;;  %v7510_v21 = vsel %vm3184_vm1, %v3186_v50, %v3182_v12 }
 0xd06   :  { %2949 = vmatpush.bf16.msra.mxu1 %v2936_v35  ;;  %v7512_v62 = vsel %vm3199_vm2, %v3201_v0, %v3197_v60 }
 0xd07   :  { %v3333_v48 = vpack.c.bf16 %v7512_v62, %v7510_v21 }
 0xd0a   :  { %2950 = vmatpush.bf16.msra.mxu1 %v8420_v57 }
 0xd0d   :  { %4409 = vmatmul.msk.bf16.vlgmr.msra.gmra.mxu1 %vm8423_vm15, %v7017_v46 }
 0xd0e   :  { %3341 = vmatpush.bf16.msrb.mxu1 %v3336_v5 }
 0xd12   :  { %3342 = vmatpush.bf16.msrb.mxu1 %v3335_v10 }
 0xd16   :  { %3343 = vmatpush.bf16.msrb.mxu1 %v3334_v28 }
 0xd1a   :  { %3344 = vmatpush.bf16.msrb.mxu1 %v3333_v48 }
 0xd1d   :  { %4410 = vmatmul.msk.bf16.gmra.mxu1 %vm8424_vm0, %v7038_v9 }
 0xd2d   :  { %4442 = vmatmul.msk.bf16.vlgmr.msrb.gmra.mxu1 %vm8425_vm7, %v7017_v46  ;;  %v2940_v46 = vmul.f32 %v7190_v17, %v5441_v61 }
 0xd3d   :  { %4443 = vmatmul.msk.bf16.gmra.mxu1 %vm8426_vm5, %v7038_v9 }
 0xd8a   :  { %v2952_v29 = vpop.f32.mrf.mxu1 }
 0xd8b   :  { %v2953_v44 = vadd.f32 %v2952_v29, %v2939_v19 }
 0xd8d   :  { %v2962_v56 = vmul.f32 %v2953_v44, %v7194_v58 }
 0xd8f   :  { %v2969_v30 = vadd.f32 %v4542_v53, %v2962_v56 }
 0xd91   :  { %v2973_v35 = vadd.f32 %v2969_v30, %v7056_v6 }
 0xd92   :  { %v2954_v5 = vpop.f32.mrf.mxu1 }
 0xd93   :  { %v2955_v41 = vadd.f32 %v2954_v5, %v2940_v46  ;;  %v7532_v9 = vadd.f32 %v2973_v35, %v7056_v6  ;;  %v2981_v15 = vsel %vm530_vm3, %v2973_v35, 0.0 }
 0xd95   :  { %v2963_v51 = vmul.f32 %v2955_v41, %v7187_v63 }
 0xd97   :  { %v2970_v1 = vadd.f32 %v4542_v53, %v2963_v51 }
 0xd99   :  { %v2974_v43 = vadd.f32 %v2970_v1, %v7065_v14 }
 0xd9a   :  { %v2957_v58 = vpop.f32.mrf.mxu1 }
 0xd9b   :  { %v2982_v49 = vsel %vm530_vm3, %v2974_v43, 0.0  ;;  %v2958_v3 = vadd.f32 %v2957_v58, %v2941_v38  ;;  %v7541_v17 = vadd.f32 %v2974_v43, %v7065_v14 }
 0xd9c   :  { %v2983_v32 = vadd.f32 %v2982_v49, %v2981_v15 }
 0xd9d   :  { %v2964_v6 = vmul.f32 %v2958_v3, %v7179_v18 }
 0xd9f   :  { %v2971_v47 = vadd.f32 %v4542_v53, %v2964_v6 }
 0xda1   :  { %v2975_v63 = vadd.f32 %v2971_v47, %v7073_v16 }
 0xda2   :  { %v2959_v31 = vpop.f32.mrf.mxu1 }
 0xda3   :  { %v2984_v22 = vsel %vm530_vm3, %v2975_v63, 0.0  ;;  %v2960_v40 = vadd.f32 %v2959_v31, %v2942_v4  ;;  %v7549_v24 = vadd.f32 %v2975_v63, %v7073_v16 }
 0xda4   :  { %v2985_v34 = vadd.f32 %v2984_v22, %v2983_v32 }
 0xda5   :  { %v2965_v14 = vmul.f32 %v2960_v40, %v7177_v11  ;;  %v8428_v40 = vld [vmem:[#allocation7_spill] sm:$0xff] }
 0xda7   :  { %v2972_v36 = vadd.f32 %v4542_v53, %v2965_v14  ;;  %v8427_v53 = vld [vmem:[#allocation6_spill] sm:$0xff] }
 0xda9   :  { %v2976_v37 = vadd.f32 %v2972_v36, %v7085_v42 }
 0xdaa   :  { %v3346_v18 = vpop.f32.mrf.mxu1 }
 0xdab   :  { %v2986_v7 = vsel %vm530_vm3, %v2976_v37, 0.0  ;;  %v3347_v55 = vadd.f32 %v7081_v23, %v3346_v18  ;;  %v7556_v54 = vadd.f32 %v2976_v37, %v7085_v42 }
 0xdac   :  { %v2987_v26 = vadd.f32 %v2986_v7, %v2985_v34 }
 0xdad   :  { %v3360_v57 = vmax.f32 %v3347_v55, 1e-12  ;;  %vm3356_vm4 = vcmp.gt.f32.partialorder %v3347_v55, 0.0 }
 0xdae   :  { %v2988_v8 = vrot.slane %v2987_v26, 4 }
 0xdaf   :  { %4789 = vrsqrt.f32 %v3360_v57  ;;  %vm3370_vm6 = vweird.f32 %v3360_v57 }
 0xdb0   :  { %v2989_v16 = vadd.f32 %v2988_v8, %v2987_v26 }
 0xdb2   :  { %v2990_v10 = vrot.slane %v2989_v16, 2  ;;  %v3348_v50 = vpop.f32.mrf.mxu1 }
 0xdb3   :  { %v7559_v11 = vadd.f32 %v7090_v39, %v3348_v50 }
 0xdb4   :  { %v2991_v0 = vadd.f32 %v2990_v10, %v2989_v16 }
 0xdb5   :  { %v4790_v12 = vpop.eup %4789  ;;  %v7562_v60 = vmax.f32 %v7559_v11, 1e-12  ;;  %vm3357_vm7 = vcmp.gt.f32.partialorder %v7559_v11, 0.0  ;;  %v4455_v11 = vld [vmem:[%s8170_s11 + $0x30] sm:$0xff] }
 0xdb6   :  { %v2992_v28 = vrot.slane %v2991_v0, 1  ;;  %v3365_v23 = vmul.f32 %v4790_v12, %v3360_v57  ;;  %vm3371_vm9 = vweird.f32 %v4790_v12 }
 0xdb7   :  { %4791 = vrsqrt.f32 %v7562_v60  ;;  %vm3372_vm11 = vmor %vm3370_vm6, %vm3371_vm9  ;;  %vm3380_vm13 = vweird.f32 %v7562_v60  ;;  %vm8431_vm9 = vcmask 1043456  }
 0xdb8   :  { %v2993_v42 = vadd.f32 %v2992_v28, %v2991_v0  ;;  %v3366_v48 = vmul.f32 %v4790_v12, %v3365_v23  ;;  %v4509_v0 = vld [vmem:[%s8168_s9 + $0x40] sm:$0xff] }
 0xdba   :  { %v2994_v19 = vmul.f32 0.03125, %v2993_v42  ;;  %v3367_v29 = vmul.f32 0.5, %v3366_v48  ;;  %v3351_v44 = vpop.f32.mrf.mxu1 }
 0xdbb   :  { %v7566_v56 = vadd.f32 %v8427_v53, %v3351_v44 }
 0xdbc   :  { %v7568_v39 = vsub.f32 %v2973_v35, %v2994_v19  ;;  %v7570_v30 = vsub.f32 %v2974_v43, %v2994_v19  ;;  %v7572_v46 = vsub.f32 %v2975_v63, %v2994_v19  ;;  %v7574_v5 = vsub.f32 %v2976_v37, %v2994_v19  ;;  %v4510_v37 = vld [vmem:[%s8168_s9 + $0x48] sm:$0xff] }
 0xdbd   :  { %v7576_v41 = vpop.eup %4791  ;;  %v3362_v51 = vmax.f32 %v7566_v56, 1e-12  ;;  %v3368_v1 = vsub.f32 1.5, %v3367_v29  ;;  %3320 = vmatpush.bf16.msrb.mxu2 %v4510_v37  ;;  %vm3358_vm14 = vcmp.gt.f32.partialorder %v7566_v56, 0.0 }
 0xdbe   :  { %v2999_v38 = vmul.f32 %v7568_v39, %v7568_v39  ;;  %v3000_v58 = vmul.f32 %v7570_v30, %v7570_v30  ;;  %v3001_v35 = vmul.f32 %v7572_v46, %v7572_v46  ;;  %v3002_v15 = vmul.f32 %v7574_v5, %v7574_v5 }
 0xdbf   :  { %4793 = vrsqrt.f32 %v3362_v51  ;;  %v3369_v43 = vmul.f32 %v4790_v12, %v3368_v1  ;;  %v3375_v32 = vmul.f32 %v7576_v41, %v7562_v60  ;;  %vm3390_vm8 = vweird.f32 %v3362_v51 }
 0xdc0   :  { %v3003_v49 = vsel %vm530_vm3, %v2999_v38, 0.0  ;;  %v3004_v3 = vsel %vm530_vm3, %v3000_v58, 0.0  ;;  %v3006_v63 = vsel %vm530_vm3, %v3001_v35, 0.0  ;;  %v3008_v14 = vsel %vm530_vm3, %v3002_v15, 0.0 }
 0xdc1   :  { %v3005_v6 = vadd.f32 %v3004_v3, %v3003_v49  ;;  %v3373_v47 = vsel %vm3372_vm11, %v4790_v12, %v3369_v43  ;;  %v3376_v36 = vmul.f32 %v7576_v41, %v3375_v32  ;;  %3321 = vmatpush.bf16.msrb.mxu2 %v4509_v0  ;;  %vm3381_vm15 = vweird.f32 %v7576_v41 }
 0xdc2   :  { %v3353_v4 = vpop.f32.mrf.mxu1  ;;  %v3404_v31 = vsel %vm3356_vm4, %v3373_v47, 0.0  ;;  %vm7606_vm1 = vmor %vm3380_vm13, %vm3381_vm15 }
 0xdc3   :  { %v3007_v22 = vadd.f32 %v3006_v63, %v3005_v6  ;;  %v3354_v34 = vadd.f32 %v8428_v40, %v3353_v4  ;;  %3410 = vperm.xlu1 %4519, %v3404_v31   ;;  %v3377_v8 = vmul.f32 0.5, %v3376_v36 }
 0xdc5   :  { %v4794_v18 = vpop.eup %4793  ;;  %v3009_v7 = vadd.f32 %v3008_v14, %v3007_v22  ;;  %v3363_v55 = vmax.f32 %v3354_v34, 1e-12  ;;  %v3378_v23 = vsub.f32 1.5, %v3377_v8  ;;  %vm3359_vm6 = vcmp.gt.f32.partialorder %v3354_v34, 0.0  ;;  %v4869_v14 = vld [vmem:[%s8160_s1] sm:$0xff] }
 0xdc6   :  { %v3385_v26 = vmul.f32 %v4794_v18, %v3362_v51  ;;  %vm3391_vm10 = vweird.f32 %v4794_v18 }
 0xdc7   :  { %v3010_v57 = vrot.slane %v3009_v7, 4  ;;  %4795 = vrsqrt.f32 %v3363_v55  ;;  %vm3392_vm12 = vmor %vm3390_vm8, %vm3391_vm10  ;;  %v3379_v1 = vmul.f32 %v7576_v41, %v3378_v23  ;;  %vm3400_vm2 = vweird.f32 %v3363_v55 }
 0xdc8   :  { %v3386_v16 = vmul.f32 %v4794_v18, %v3385_v26  ;;  %vm8432_vm8 = vcmask 64512  }
 0xdc9   :  { %v3011_v10 = vadd.f32 %v3010_v57, %v3009_v7  ;;  %v3383_v43 = vsel %vm7606_vm1, %v7576_v41, %v3379_v1  ;;  %v3628_v41 = vpack.c.bf16 %v4455_v11, %v4455_v11  ;;  %vm8434_vm13 = vmmov %vm8432_vm8 }
 0xdca   :  { %v3387_v50 = vmul.f32 0.5, %v3386_v16  ;;  %v3405_v32 = vsel %vm3357_vm7, %v3383_v43, 0.0  ;;  %vm8438_vm15 = vmmov %vm8432_vm8 }
 0xdcb   :  { %v3012_v12 = vrot.slane %v3011_v10, 2  ;;  %3485 = vperm.xlu1 %4519, %v7433_v13   ;;  %v3633_v22 = vsel %vm8431_vm9, %v3628_v41, 0  ;;  %vm8439_vm1 = vmmov %vm8432_vm8 }
 0xdcc   :  { %v3388_v28 = vsub.f32 1.5, %v3387_v50  ;;  %3642 = vmatpush.bf16.msra.mxu1 %v3633_v22 }
 0xdcd   :  { %v4796_v42 = vpop.eup %4795  ;;  %v3013_v48 = vadd.f32 %v3012_v12, %v3011_v10 }
 0xdce   :  { %v3395_v19 = vmul.f32 %v4796_v42, %v3363_v55  ;;  %v3389_v29 = vmul.f32 %v4794_v18, %v3388_v28  ;;  %vm3401_vm0 = vweird.f32 %v4796_v42 }
 0xdcf   :  { %v3014_v44 = vrot.slane %v3013_v48, 1  ;;  %vm3402_vm5 = vmor %vm3400_vm2, %vm3401_vm0  ;;  %4459 = vmatmul.msk.bf16.vlgmr.msra.gmra.mxu1 %vm8432_vm8, %v4869_v14 }
 0xdd0   :  { %v3396_v53 = vmul.f32 %v4796_v42, %v3395_v19  ;;  %v3393_v51 = vsel %vm3392_vm12, %v4794_v18, %v3389_v29  ;;  %vm8433_vm12 = vmmov %vm8432_vm8 }
 0xdd1   :  { %v3015_v13 = vadd.f32 %v3014_v44, %v3013_v48  ;;  %v3406_v38 = vsel %vm3358_vm14, %v3393_v51, 0.0  ;;  %vm8435_vm14 = vmmov %vm8432_vm8 }
 0xdd2   :  { %v3397_v35 = vmul.f32 0.5, %v3396_v53  ;;  %3420 = vperm.xlu0 %4518, %v3406_v38   ;;  %v8436_v38 = vld [vmem:[#allocation8_spill] sm:$0xff]  ;;  %vm8440_vm2 = vmmov %vm8439_vm1 }
 0xdd3   :  { %v3016_v60 = vmul.f32 0.03125, %v3015_v13  ;;  %3480 = vperm.xlu1 %4519, %v7498_v2   ;;  %vm8441_vm0 = vmmov %vm8439_vm1 }
 0xdd4   :  { %v3398_v56 = vsub.f32 1.5, %v3397_v35  ;;  %v4543_v35 = vld [vmem:[%s8171_s12 + $0x6] ss:$0 sm:$0xff]  ;;  %vm8442_vm7 = vmmov %vm8441_vm0 }
 0xdd5   :  { %v3017_v15 = vmax.f32 %v3016_v60, 0.0  ;;  %vm8446_vm9 = vmmov %vm8441_vm0 }
 0xdd6   :  { %v3399_v49 = vmul.f32 %v4796_v42, %v3398_v56 }
 0xdd7   :  { %v3018_v3 = vadd.f32 1e-05, %v3017_v15 }
 0xdd8   :  { %v3403_v6 = vsel %vm3402_vm5, %v4796_v42, %v3399_v49  ;;  %vm8443_vm5 = vmmov %vm8441_vm0 }
 0xdd9   :  { %4797 = vrsqrt.f32 %v3018_v3  ;;  %v3407_v47 = vsel %vm3359_vm6, %v3403_v6, 0.0  ;;  %vm3025_vm4 = vweird.f32 %v3018_v3  ;;  %vm8445_vm6 = vmmov %vm8441_vm0 }
 0xdda   :  { %3425 = vperm.xlu2 %4517, %v3407_v47   ;;  %3415 = vperm.xlu0 %4518, %v3405_v32  }
 0xddf   :  { %v4798_v63 = vpop.eup %4797 }
 0xde0   :  { %v3020_v2 = vmul.f32 %v4798_v63, %v3018_v3  ;;  %vm3026_vm11 = vweird.f32 %v4798_v63 }
 0xde1   :  { %vm3027_vm10 = vmor %vm3025_vm4, %vm3026_vm11 }
 0xde2   :  { %v3021_v4 = vmul.f32 %v4798_v63, %v3020_v2  ;;  %3495 = vperm.xlu2 %4517, %v7395_v59   ;;  %3500 = vperm.xlu0 %4518, %v7399_v20   ;;  %v4544_v2 = vld [vmem:[%s8172_s13 + $0x6] ss:$0 sm:$0xff] }
 0xde4   :  { %v3022_v31 = vmul.f32 0.5, %v3021_v4  ;;  %v8437_v4 = vld [vmem:[#allocation9_spill] sm:$0xff] }
 0xde6   :  { %v3023_v40 = vsub.f32 1.5, %v3022_v31 }
 0xde8   :  { %v3024_v34 = vmul.f32 %v4798_v63, %v3023_v40 }
 0xdea   :  { %3490 = vperm.xlu2 %4517, %v7444_v27   ;;  %3475 = vperm.xlu0 %4518, %v7494_v45   ;;  %v3028_v59 = vsel %vm3027_vm10, %v4798_v63, %v3024_v34  ;;  %v4870_v27 = vld [vmem:[%s8160_s1 + $0x8] sm:$0xff]  ;;  %v4871_v45 = vld [vmem:[%s8160_s1 + $0x10] sm:$0xff] }
 0xdeb   :  { %v3029_v20 = vmul.f32 %v3028_v59, %v7568_v39  ;;  %v3030_v36 = vmul.f32 %v3028_v59, %v7570_v30  ;;  %v3031_v37 = vmul.f32 %v3028_v59, %v7572_v46  ;;  %v3032_v18 = vmul.f32 %v3028_v59, %v7574_v5  ;;  %4460 = vmatmul.msk.bf16.gmra.mxu1 %vm8433_vm12, %v4870_v27 }
 0xded   :  { %v3033_v7 = vmax.f32 %v3029_v20, 0.0  ;;  %v3034_v55 = vmax.f32 %v3030_v36, 0.0  ;;  %v3035_v26 = vmax.f32 %v3031_v37, 0.0  ;;  %v3036_v57 = vmax.f32 %v3032_v18, 0.0 }
 0xdef   :  { %v3294_v8 = vpack.c.bf16 %v3034_v55, %v3033_v7  ;;  %v3295_v16 = vpack.c.bf16 %v3036_v57, %v3035_v26 }
 0xdf1   :  { %4440 = vmatmul.msk.bf16.vlgmr.msrb.gmra.mxu2 %vm530_vm3, %v3294_v8 }
 0xdf2   :  { %3465 = vperm.xlu2 %4517, %v7510_v21   ;;  %3470 = vperm.xlu0 %4518, %v7512_v62   ;;  %v4872_v21 = vld [vmem:[%s8160_s1 + $0x18] sm:$0xff] }
 0xdfb   :  { %4461 = vmatmul.msk.bf16.gmra.mxu1 %vm8434_vm13, %v4871_v45 }
 0xe01   :  { %4441 = vmatmul.msk.bf16.gmra.mxu2 %vm530_vm3, %v3295_v16 }
 0xe0b   :  { %4462 = vmatmul.msk.bf16.gmra.mxu1 %vm8435_vm14, %v4872_v21 }
 0xe34   :  { %v7649_v12 = vpop.permute.xlu2 %3425 }
 0xe35   :  { %v7664_v53 = vpop.permute.xlu1 %3410 }
 0xe44   :  { %v7647_v10 = vpop.permute.xlu0 %3420 }
 0xe4c   :  { %v3644_v62 = vpop.f32.mrf.mxu1  ;;  %v7657_v19 = vpop.permute.xlu0 %3415 }
 0xe4d   :  { %v3645_v36 = vadd.f32 %v4543_v35, %v3644_v62 }
 0xe4f   :  { %v3664_v26 = vmax.f32 %v3645_v36, 0.0 }
 0xe51   :  { %v3675_v21 = vmul.f32 %v4544_v2, %v3664_v26 }
 0xe54   :  { %v3646_v30 = vpop.f32.mrf.mxu1 }
 0xe55   :  { %v3647_v37 = vadd.f32 %v4543_v35, %v3646_v30  ;;  %v3683_v30 = vsel %vm8446_vm9, %v3675_v21, 0.0 }
 0xe57   :  { %v3665_v57 = vmax.f32 %v3647_v37, 0.0 }
 0xe59   :  { %v3676_v45 = vmul.f32 %v4544_v2, %v3665_v57 }
 0xe5b   :  { %v3686_v62 = vsel %vm8445_vm6, %v3676_v45, 0.0 }
 0xe68   :  { %v3649_v5 = vpop.f32.mrf.mxu1 }
 0xe69   :  { %v3650_v43 = vadd.f32 %v4543_v35, %v3649_v5  ;;  %v7698_v5 = vpop.permute.xlu2 %3495 }
 0xe6b   :  { %v3666_v11 = vmax.f32 %v3650_v43, 0.0 }
 0xe6d   :  { %v3677_v18 = vmul.f32 %v4544_v2, %v3666_v11 }
 0xe6f   :  { %v3689_v8 = vsel %vm8441_vm0, %v3677_v18, 0.0 }
 0xe70   :  { %v3651_v0 = vpop.f32.mrf.mxu1 }
 0xe71   :  { %v3652_v47 = vadd.f32 %v4543_v35, %v3651_v0  ;;  %v7702_v0 = vpop.permute.xlu2 %3490 }
 0xe73   :  { %v3667_v34 = vmax.f32 %v3652_v47, 0.0 }
 0xe74   :  { %v3323_v39 = vpop.f32.mrf.mxu2 }
 0xe75   :  { %v7667_v51 = vmul.f32 %v7664_v53, %v3323_v39  ;;  %v3678_v55 = vmul.f32 %v4544_v2, %v3667_v34  ;;  %v8444_v39 = vld [vmem:[#allocation10_spill] sm:$0xff] }
 0xe77   :  { %v3692_v27 = vsel %vm8443_vm5, %v3678_v55, 0.0 }
 0xe78   :  { %v3654_v23 = vpop.f32.mrf.mxu1 }
 0xe79   :  { %v3655_v60 = vadd.f32 %v4543_v35, %v3654_v23 }
 0xe7b   :  { %v3668_v49 = vmax.f32 %v3655_v60, 0.0  ;;  %v4545_v60 = vld [vmem:[%s8173_s14 + $0x6] ss:$0 sm:$0xff] }
 0xe7c   :  { %v3325_v46 = vpop.f32.mrf.mxu2 }
 0xe7d   :  { %v7660_v29 = vmul.f32 %v7657_v19, %v3325_v46  ;;  %v3679_v40 = vmul.f32 %v4544_v2, %v3668_v49  ;;  %v7694_v46 = vld [vmem:[%s8162_s3 + $0x18] sm:$0xff] }
 0xe7f   :  { %v3432_v1 = vpack.c.bf16 %v7660_v29, %v7667_v51  ;;  %v3695_v20 = vsel %vm8440_vm2, %v3679_v40, 0.0 }
 0xe80   :  { %v3656_v13 = vpop.f32.mrf.mxu1  ;;  %3696 = vadd.xlane.f32.xlu0 %v3695_v20 }
 0xe81   :  { %v3657_v3 = vadd.f32 %v4543_v35, %v3656_v13 }
 0xe83   :  { %v3669_v41 = vmax.f32 %v3657_v3, 0.0 }
 0xe84   :  { %v3328_v50 = vpop.f32.mrf.mxu2 }
 0xe85   :  { %v7652_v42 = vmul.f32 %v7647_v10, %v3328_v50  ;;  %v3680_v7 = vmul.f32 %v4544_v2, %v3669_v41  ;;  %v7700_v50 = vpop.permute.xlu0 %3500 }
 0xe87   :  { %v3698_v16 = vsel %vm8442_vm7, %v3680_v7, 0.0 }
 0xe88   :  { %v3659_v58 = vpop.f32.mrf.mxu1  ;;  %3693 = vadd.xlane.f32.xlu0 %v3692_v27 }
 0xe89   :  { %v3660_v56 = vadd.f32 %v4543_v35, %v3659_v58 }
 0xe8b   :  { %v3670_v32 = vmax.f32 %v3660_v56, 0.0 }
 0xe8c   :  { %v3330_v28 = vpop.f32.mrf.mxu2 }
 0xe8d   :  { %v7655_v48 = vmul.f32 %v7649_v12, %v3330_v28  ;;  %v3681_v22 = vmul.f32 %v4544_v2, %v3670_v32  ;;  %v7704_v28 = vpop.permute.xlu1 %3485  ;;  %v7706_v23 = vpop.permute.xlu0 %3475 }
 0xe8f   :  { %v3433_v44 = vpack.c.bf16 %v7655_v48, %v7652_v42  ;;  %v3701_v59 = vsel %vm8439_vm1, %v3681_v22, 0.0 }
 0xe90   :  { %v3661_v15 = vpop.f32.mrf.mxu1  ;;  %3702 = vadd.xlane.f32.xlu1 %v3701_v59 }
 0xe91   :  { %3440 = vmatpush.bf16.msra.mxu2 %v3433_v44  ;;  %v3662_v6 = vadd.f32 %v4543_v35, %v3661_v15  ;;  %v7708_v44 = vpop.permute.xlu2 %3465 }
 0xe93   :  { %v3671_v63 = vmax.f32 %v3662_v6, 0.0 }
 0xe95   :  { %3441 = vmatpush.bf16.msra.mxu2 %v3432_v1  ;;  %v3682_v31 = vmul.f32 %v4544_v2, %v3671_v63  ;;  %v7712_v13 = vpop.permute.xlu1 %3480 }
 0xe97   :  { %v3704_v14 = vsel %vm8438_vm15, %v3682_v31, 0.0 }
 0xe98   :  { %4444 = vmatmul.msk.bf16.vlgmr.msra.gmra.mxu2 %vm530_vm3, %v8436_v38  ;;  %3705 = vadd.xlane.f32.xlu2 %v3704_v14  ;;  %v7714_v38 = vpop.permute.xlu0 %3470 }
 0xe99   :  { %3699 = vadd.xlane.f32.xlu1 %v3698_v16 }
 0xea0   :  { %3690 = vadd.xlane.f32.xlu2 %v3689_v8 }
 0xea1   :  { %3684 = vadd.xlane.f32.xlu1 %v3683_v30 }
 0xea8   :  { %4445 = vmatmul.msk.bf16.gmra.mxu2 %vm530_vm3, %v8437_v4  ;;  %3687 = vadd.xlane.f32.xlu2 %v3686_v62 }
 0xeb8   :  { %4446 = vmatmul.msk.bf16.gmra.mxu2 %vm530_vm3, %v8444_v39 }
 0xec8   :  { %4447 = vmatmul.msk.bf16.gmra.mxu2 %vm530_vm3, %v7694_v46 }
 0xef3   :  { %v3697_v49 = vpop.xlane.xlu0 %3696 }
 0xef4   :  { %v3714_v47 = vadd.f32 %v4545_v60, %v3697_v49 }
 0xef6   :  { %v4467_v11 = vmul.f32 -1.442695, %v3714_v47 }
 0xefb   :  { %v3694_v41 = vpop.xlane.xlu0 %3693 }
 0xefc   :  { %v3713_v59 = vadd.f32 %v4545_v60, %v3694_v41 }
 0xefe   :  { %v4466_v55 = vmul.f32 -1.442695, %v3713_v59 }
 0xf03   :  { %v3703_v56 = vpop.xlane.xlu1 %3702 }
 0xf04   :  { %v3716_v15 = vadd.f32 %v4545_v60, %v3703_v56 }
 0xf06   :  { %v4469_v3 = vmul.f32 -1.442695, %v3716_v15 }
 0xf08   :  { %4799 = vpow2.f32 %v4469_v3 }
 0xf0b   :  { %v3706_v35 = vpop.xlane.xlu2 %3705 }
 0xf0c   :  { %v3717_v43 = vadd.f32 %v4545_v60, %v3706_v35  ;;  %v3700_v2 = vpop.xlane.xlu1 %3699 }
 0xf0d   :  { %v3715_v4 = vadd.f32 %v4545_v60, %v3700_v2 }
 0xf0e   :  { %v4470_v32 = vmul.f32 -1.442695, %v3717_v43  ;;  %v4800_v31 = vpop.eup %4799 }
 0xf0f   :  { %v4468_v14 = vmul.f32 -1.442695, %v3715_v4  ;;  %v7723_v20 = vadd.f32 1.0, %v4800_v31 }
 0xf10   :  { %4801 = vpow2.f32 %v4470_v32 }
 0xf11   :  { %4803 = vpow2.f32 %v4467_v11  ;;  %vm3845_vm11 = vweird.f32 %v7723_v20 }
 0xf12   :  { %4805 = vpow2.f32 %v4468_v14 }
 0xf13   :  { %v3691_v63 = vpop.xlane.xlu2 %3690  ;;  %4807 = vrcp.f32 %v7723_v20 }
 0xf14   :  { %v3712_v34 = vadd.f32 %v4545_v60, %v3691_v63  ;;  %v3685_v7 = vpop.xlane.xlu1 %3684 }
 0xf15   :  { %v3710_v16 = vadd.f32 %v4545_v60, %v3685_v7 }
 0xf16   :  { %v4802_v40 = vpop.eup %4801  ;;  %v4465_v18 = vmul.f32 -1.442695, %v3712_v34 }
 0xf17   :  { %v7725_v36 = vadd.f32 1.0, %v4802_v40  ;;  %v4804_v26 = vpop.eup %4803  ;;  %v4463_v39 = vmul.f32 -1.442695, %v3710_v16 }
 0xf18   :  { %v7731_v27 = vadd.f32 1.0, %v4804_v26  ;;  %v4806_v45 = vpop.eup %4805 }
 0xf19   :  { %4809 = vrcp.f32 %v7725_v36  ;;  %v7733_v62 = vpop.eup %4807  ;;  %v7738_v35 = vadd.f32 1.0, %v4806_v45  ;;  %vm3860_vm8 = vweird.f32 %v7725_v36 }
 0xf1a   :  { %4811 = vpow2.f32 %v4465_v18  ;;  %vm3846_vm4 = vweird.f32 %v7733_v62  ;;  %vm3815_vm1 = vweird.f32 %v7731_v27 }
 0xf1b   :  { %v7710_v1 = vpop.f32.mrf.mxu2  ;;  %v3688_v37 = vpop.xlane.xlu2 %3687  ;;  %4813 = vpow2.f32 %v4466_v55  ;;  %v3851_v55 = vand.u32 2147483648, %v7723_v20  ;;  %vm7785_vm12 = vmor %vm3845_vm11, %vm3846_vm4  ;;  %vm3830_vm7 = vweird.f32 %v7738_v35 }
 0xf1c   :  { %v3711_v57 = vadd.f32 %v4545_v60, %v3688_v37  ;;  %4815 = vrcp.f32 %v7731_v27  ;;  %v3841_v60 = vmul.f32 %v7733_v62, %v7723_v20 }
 0xf1e   :  { %v4464_v21 = vmul.f32 -1.442695, %v3711_v57  ;;  %v3842_v63 = vsub.f32 1.0, %v3841_v60 }
 0xf1f   :  { %v7735_v30 = vpop.eup %4809 }
 0xf20   :  { %v4812_v56 = vpop.eup %4811  ;;  %4817 = vpow2.f32 %v4464_v21  ;;  %v3856_v49 = vmul.f32 %v7735_v30, %v7725_v36  ;;  %v3843_v14 = vmul.f32 %v7733_v62, %v3842_v63  ;;  %vm3861_vm10 = vweird.f32 %v7735_v30 }
 0xf21   :  { %v4814_v43 = vpop.eup %4813  ;;  %4819 = vpow2.f32 %v4463_v39  ;;  %v7744_v3 = vadd.f32 1.0, %v4812_v56  ;;  %v7792_v56 = vmul.f32 %v7708_v44, %v7710_v1  ;;  %vm7798_vm13 = vmor %vm3860_vm8, %vm3861_vm10  ;;  %v3852_v44 = vor.u32 1.1754944e-38, %v3851_v55 }
 0xf22   :  { %4821 = vrcp.f32 %v7738_v35  ;;  %v7747_v32 = vadd.f32 1.0, %v4814_v43  ;;  %v7749_v47 = vpop.eup %4815  ;;  %v3857_v11 = vsub.f32 1.0, %v3856_v49 }
 0xf23   :  { %v7716_v58 = vpop.f32.mrf.mxu2  ;;  %4823 = vrcp.f32 %v7744_v3  ;;  %v3811_v31 = vmul.f32 %v7749_v47, %v7731_v27  ;;  %vm3816_vm2 = vweird.f32 %v7749_v47  ;;  %vm3785_vm11 = vweird.f32 %v7744_v3 }
 0xf24   :  { %4825 = vrcp.f32 %v7747_v32  ;;  %v3858_v37 = vmul.f32 %v7735_v30, %v3857_v11  ;;  %vm7844_vm0 = vmor %vm3815_vm1, %vm3816_vm2  ;;  %vm3800_vm8 = vweird.f32 %v7747_v32 }
 0xf25   :  { %v3812_v57 = vsub.f32 1.0, %v3811_v31 }
 0xf26   :  { %v4818_v2 = vpop.eup %4817  ;;  %v3859_v39 = vadd.f32 %v7735_v30, %v3858_v37 }
 0xf27   :  { %v4820_v4 = vpop.eup %4819  ;;  %v7757_v34 = vadd.f32 1.0, %v4818_v2 }
 0xf28   :  { %v7753_v41 = vpop.eup %4821  ;;  %v7760_v59 = vadd.f32 1.0, %v4820_v4 }
 0xf29   :  { %v3826_v7 = vmul.f32 %v7753_v41, %v7738_v35  ;;  %v7773_v26 = vpop.eup %4823  ;;  %4827 = vrcp.f32 %v7757_v34  ;;  %vm3831_vm5 = vweird.f32 %v7753_v41 }
 0xf2a   :  { %v7778_v16 = vpop.eup %4825  ;;  %4829 = vrcp.f32 %v7760_v59  ;;  %v3781_v49 = vmul.f32 %v7773_v26, %v7744_v3  ;;  %vm7869_vm9 = vmor %vm3830_vm7, %vm3831_vm5  ;;  %vm3786_vm4 = vweird.f32 %v7773_v26  ;;  %vm3755_vm1 = vweird.f32 %v7760_v59 }
 0xf2b   :  { %v7721_v6 = vpop.f32.mrf.mxu2  ;;  %v3827_v1 = vsub.f32 1.0, %v3826_v7  ;;  %vm3801_vm10 = vweird.f32 %v7778_v16  ;;  %vm3770_vm7 = vweird.f32 %v7757_v34 }
 0xf2c   :  { %v7782_v45 = vmul.f32 %v7706_v23, %v7721_v6  ;;  %v3864_v23 = vand.u32 2147483647, %v7725_v36  ;;  %v3866_v6 = vand.u32 2147483648, %v7725_v36  ;;  %v3813_v36 = vmul.f32 %v7749_v47, %v3812_v57 }
 0xf2e   :  { %vm7826_vm15 = vcmp.eq.f32.partialorder %v3864_v23, 8.507059e+37  ;;  %v3867_v7 = vor.u32 1.1754944e-38, %v3866_v6  ;;  %v3814_v55 = vadd.f32 %v7749_v47, %v3813_v36  ;;  %v3791_v36 = vand.u32 2147483648, %v7744_v3 }
 0xf2f   :  { %v7824_v37 = vpop.eup %4827 }
 0xf30   :  { %vm3771_vm5 = vweird.f32 %v7824_v37 }
 0xf33   :  { %v3450_v22 = vpop.f32.mrf.mxu2 }
 0xf34   :  { %v7764_v18 = vmul.f32 %v7712_v13, %v3450_v22  ;;  %v3844_v13 = vadd.f32 %v7733_v62, %v3843_v14  ;;  %v3849_v22 = vand.u32 2147483647, %v7723_v20  ;;  %v7796_v20 = vmul.f32 %v7714_v38, %v7716_v58 }
 0xf35   :  { %v3796_v38 = vmul.f32 %v7778_v16, %v7747_v32  ;;  %v3863_v14 = vsel %vm7798_vm13, %v7735_v30, %v3859_v39  ;;  %vm7887_vm13 = vmor %vm3785_vm11, %vm3786_vm4  ;;  %vm8469_vm11 = vcmask 523264  }
 0xf36   :  { %v3512_v60 = vpack.c.bf16 %v7764_v18, %v7782_v45  ;;  %v3848_v63 = vsel %vm7785_vm12, %v7733_v62, %v3844_v13  ;;  %vm7813_vm14 = vcmp.eq.f32.partialorder %v3849_v22, 8.507059e+37  ;;  %v3821_v13 = vand.u32 2147483648, %v7731_v27 }
 0xf37   :  { %v3797_v22 = vsub.f32 1.0, %v3796_v38  ;;  %v7842_v57 = vsel %vm7813_vm14, %v3852_v44, %v3848_v63  ;;  %v7857_v43 = vsel %vm7826_vm15, %v3867_v7, %v3863_v14  ;;  %v3806_v14 = vand.u32 2147483648, %v7747_v32  ;;  %vm7912_vm15 = vmor %vm3800_vm8, %vm3801_vm10 }
 0xf38   :  { %v3822_v38 = vor.u32 1.1754944e-38, %v3821_v13  ;;  %v3792_v45 = vor.u32 1.1754944e-38, %v3791_v36  ;;  %v3761_v13 = vand.u32 2147483648, %v7760_v59  ;;  %vm8470_vm10 = vmmov %vm8469_vm11 }
 0xf39   :  { %v3798_v63 = vmul.f32 %v7778_v16, %v3797_v22 }
 0xf3a   :  { %v3762_v23 = vor.u32 1.1754944e-38, %v3761_v13 }
 0xf3b   :  { %v7728_v8 = vpop.f32.mrf.mxu2  ;;  %v3799_v7 = vadd.f32 %v7778_v16, %v3798_v63  ;;  %v7970_v63 = vld [vmem:[%s8161_s2 + $0x8] sm:$0xff] }
 0xf3c   :  { %v3507_v30 = vmul.f32 %v7704_v28, %v7728_v8  ;;  %v3836_v28 = vand.u32 2147483648, %v7738_v35 }
 0xf3e   :  { %v3837_v2 = vor.u32 1.1754944e-38, %v3836_v28 }
 0xf43   :  { %v3455_v15 = vpop.f32.mrf.mxu2 }
 0xf44   :  { %v3508_v11 = vmul.f32 %v7702_v0, %v3455_v15  ;;  %v7832_v0 = vpop.eup %4829  ;;  %v3828_v15 = vmul.f32 %v7753_v41, %v3827_v1  ;;  %v3818_v1 = vsel %vm7844_vm0, %v7749_v47, %v3814_v55  ;;  %v3759_v55 = vand.u32 2147483647, %v7760_v59 }
 0xf45   :  { %v3751_v39 = vmul.f32 %v7832_v0, %v7760_v59  ;;  %vm3756_vm2 = vweird.f32 %v7832_v0 }
 0xf46   :  { %v3513_v8 = vpack.c.bf16 %v3508_v11, %v3507_v30  ;;  %v3829_v6 = vadd.f32 %v7753_v41, %v3828_v15  ;;  %v3807_v30 = vor.u32 1.1754944e-38, %v3806_v14  ;;  %vm3760_vm4 = vcmp.eq.f32.partialorder %v3759_v55, 8.507059e+37 }
 0xf47   :  { %v3752_v47 = vsub.f32 1.0, %v3751_v39  ;;  %v7951_v39 = vld [vmem:[%s8161_s2] sm:$0xff] }
 0xf4b   :  { %v3458_v40 = vpop.f32.mrf.mxu2 }
 0xf4c   :  { %v3509_v4 = vmul.f32 %v7698_v5, %v3458_v40  ;;  %v3782_v40 = vsub.f32 1.0, %v3781_v49  ;;  %v3834_v49 = vand.u32 2147483647, %v7738_v35  ;;  %v3789_v35 = vand.u32 2147483647, %v7744_v3 }
 0xf4e   :  { %v3783_v44 = vmul.f32 %v7773_v26, %v3782_v40  ;;  %vm3835_vm12 = vcmp.eq.f32.partialorder %v3834_v49, 8.507059e+37  ;;  %vm7904_vm14 = vcmp.eq.f32.partialorder %v3789_v35, 8.507059e+37  ;;  %v4546_v35 = vld [vmem:[%s8169_s10 + $0x5] ss:$0 sm:$0xff] }
 0xf53   :  { %v3460_v58 = vpop.f32.mrf.mxu2 }
 0xf54   :  { %v3510_v31 = vmul.f32 %v7700_v50, %v3460_v58  ;;  %v3819_v50 = vand.u32 2147483647, %v7731_v27  ;;  %v3766_v27 = vmul.f32 %v7824_v37, %v7757_v34 }
 0xf56   :  { %v3514_v5 = vpack.c.bf16 %v3510_v31, %v3509_v4  ;;  %vm7859_vm6 = vcmp.eq.f32.partialorder %v3819_v50, 8.507059e+37  ;;  %v3767_v11 = vsub.f32 1.0, %v3766_v27  ;;  %v3833_v4 = vsel %vm7869_vm9, %v7753_v41, %v3829_v6  ;;  %vm3772_vm9 = vmor %vm3770_vm7, %vm3771_vm5 }
 0xf57   :  { %v3784_v31 = vadd.f32 %v7773_v26, %v3783_v44  ;;  %v3511_v50 = vpack.c.bf16 %v7796_v20, %v7792_v56  ;;  %v3912_v41 = vpack.c.bf16 %v7857_v43, %v7842_v57  ;;  %v7902_v3 = vsel %vm7859_vm6, %v3822_v38, %v3818_v1  ;;  %vm7936_vm6 = vmor %vm3755_vm1, %vm3756_vm2 }
 0xf58   :  { %3523 = vmatpush.bf16.msrb.mxu0 %v3514_v5  ;;  %v3804_v5 = vand.u32 2147483647, %v7747_v32  ;;  %v7916_v18 = vsel %vm3835_vm12, %v3837_v2, %v3833_v4  ;;  %v3753_v20 = vmul.f32 %v7832_v0, %v3752_v47  ;;  %v3803_v32 = vsel %vm7912_vm15, %v7778_v16, %v3799_v7  ;;  %vm8471_vm12 = vmmov %vm8470_vm10 }
 0xf59   :  { %v3788_v40 = vsel %vm7887_vm13, %v7773_v26, %v3784_v31  ;;  %v3776_v26 = vand.u32 2147483648, %v7757_v34  ;;  %v3911_v22 = vpack.c.bf16 %v7916_v18, %v7902_v3  ;;  %vm8472_vm13 = vmmov %vm8470_vm10  ;;  %v3516_v4 = vmul.f32 %v7660_v29, %v5441_v61 }
 0xf5a   :  { %vm3805_vm0 = vcmp.eq.f32.partialorder %v3804_v5, 8.507059e+37  ;;  %v3754_v21 = vadd.f32 %v7832_v0, %v3753_v20  ;;  %v7944_v27 = vsel %vm7904_vm14, %v3792_v45, %v3788_v40 }
 0xf5b   :  { %v7946_v59 = vsel %vm3805_vm0, %v3807_v30, %v3803_v32  ;;  %v3777_v6 = vor.u32 1.1754944e-38, %v3776_v26 }
 0xf5c   :  { %3524 = vmatpush.bf16.msrb.mxu0 %v3513_v8  ;;  %v3774_v8 = vand.u32 2147483647, %v7757_v34  ;;  %v3910_v34 = vpack.c.bf16 %v7946_v59, %v7944_v27  ;;  %v3758_v49 = vsel %vm7936_vm6, %v7832_v0, %v3754_v21 }
 0xf5d   :  { %v7961_v1 = vsel %vm3760_vm4, %v3762_v23, %v3758_v49 }
 0xf5e   :  { %vm3775_vm8 = vcmp.eq.f32.partialorder %v3774_v8, 8.507059e+37 }
 0xf60   :  { %3525 = vmatpush.bf16.msrb.mxu0 %v3512_v60  ;;  %v3768_v60 = vmul.f32 %v7824_v37, %v3767_v11 }
 0xf62   :  { %v3769_v28 = vadd.f32 %v7824_v37, %v3768_v60  ;;  %v3518_v60 = vmul.f32 %v7655_v48, %v5480_v33  ;;  %v4876_v48 = vld [vmem:[%s8163_s4] sm:$0xff] }
 0xf64   :  { %3526 = vmatpush.bf16.msrb.mxu0 %v3511_v50  ;;  %v3773_v44 = vsel %vm3772_vm9, %v7824_v37, %v3769_v28  ;;  %v3515_v37 = vmul.f32 %v7667_v51, %v5447_v52  ;;  %v3517_v50 = vmul.f32 %v7652_v42, %v5515_v25 }
 0xf65   :  { %v7963_v38 = vsel %vm3775_vm8, %v3777_v6, %v3773_v44 }
 0xf66   :  { %v3909_v58 = vpack.c.bf16 %v7963_v38, %v7961_v1 }
 0xf67   :  { %4448 = vmatmul.msk.bf16.vlgmr.msrb.gmra.mxu0 %vm8469_vm11, %v7951_v39 }
 0xf68   :  { %3917 = vmatpush.bf16.msra.mxu0 %v3912_v41 }
 0xf6c   :  { %3918 = vmatpush.bf16.msra.mxu0 %v3911_v22 }
 0xf70   :  { %3919 = vmatpush.bf16.msra.mxu0 %v3910_v34  ;;  %v4877_v34 = vld [vmem:[%s8163_s4 + $0x8] sm:$0xff] }
 0xf74   :  { %3920 = vmatpush.bf16.msra.mxu0 %v3909_v58 }
 0xf77   :  { %4449 = vmatmul.msk.bf16.gmra.mxu0 %vm8470_vm10, %v7970_v63 }
 0xf87   :  { %4481 = vmatmul.msk.bf16.vlgmr.msra.gmra.mxu0 %vm8471_vm12, %v7951_v39 }
 0xf97   :  { %4482 = vmatmul.msk.bf16.gmra.mxu0 %vm8472_vm13, %v7970_v63 }
 0xfe4   :  { %v3528_v0 = vpop.f32.mrf.mxu0 }
 0xfe5   :  { %v3529_v2 = vadd.f32 %v3528_v0, %v3515_v37 }
 0xfe7   :  { %v3538_v36 = vmul.f32 %v3529_v2, %v7664_v53 }
 0xfe9   :  { %v3545_v47 = vadd.f32 %v4546_v35, %v3538_v36 }
 0xfeb   :  { %v3549_v11 = vadd.f32 %v3545_v47, %v7532_v9 }
 0xfec   :  { %v3530_v31 = vpop.f32.mrf.mxu0 }
 0xfed   :  { %v3531_v14 = vadd.f32 %v3530_v31, %v3516_v4  ;;  %v7988_v62 = vadd.f32 %v3549_v11, %v7532_v9  ;;  %v3557_v41 = vsel %vm530_vm3, %v3549_v11, 0.0  ;;  %v4878_v31 = vld [vmem:[%s8163_s4 + $0x10] sm:$0xff] }
 0xfef   :  { %v3539_v51 = vmul.f32 %v3531_v14, %v7657_v19 }
 0xff1   :  { %v3546_v7 = vadd.f32 %v4546_v35, %v3539_v51 }
 0xff3   :  { %v3550_v5 = vadd.f32 %v3546_v7, %v7541_v17 }
 0xff4   :  { %v3533_v53 = vpop.f32.mrf.mxu0 }
 0xff5   :  { %v3558_v15 = vsel %vm530_vm3, %v3550_v5, 0.0  ;;  %v3534_v56 = vadd.f32 %v3533_v53, %v3517_v50  ;;  %v7997_v29 = vadd.f32 %v3550_v5, %v7541_v17 }
 0xff6   :  { %v3559_v45 = vadd.f32 %v3558_v15, %v3557_v41 }
 0xff7   :  { %v3540_v9 = vmul.f32 %v3534_v56, %v7647_v10 }
 0xff9   :  { %v3547_v20 = vadd.f32 %v4546_v35, %v3540_v9 }
 0xffb   :  { %v3551_v19 = vadd.f32 %v3547_v20, %v7549_v24 }
 0xffc   :  { %v3535_v40 = vpop.f32.mrf.mxu0 }
 0xffd   :  { %v3560_v42 = vsel %vm530_vm3, %v3551_v19, 0.0  ;;  %v3536_v30 = vadd.f32 %v3535_v40, %v3518_v60  ;;  %v8005_v32 = vadd.f32 %v3551_v19, %v7549_v24 }
 0xffe   :  { %v3561_v55 = vadd.f32 %v3560_v42, %v3559_v45 }
 0xfff   :  { %v3541_v17 = vmul.f32 %v3536_v30, %v7649_v12 }
0x1001   :  { %v3548_v13 = vadd.f32 %v4546_v35, %v3541_v17 }
0x1003   :  { %v3552_v26 = vadd.f32 %v3548_v13, %v7556_v54 }
0x1004   :  { %v3922_v10 = vpop.f32.mrf.mxu0 }
0x1005   :  { %v3562_v22 = vsel %vm530_vm3, %v3552_v26, 0.0  ;;  %v3923_v21 = vadd.f32 %v4876_v48, %v3922_v10  ;;  %v8014_v16 = vadd.f32 %v3552_v26, %v7556_v54  ;;  %v4879_v10 = vld [vmem:[%s8163_s4 + $0x18] sm:$0xff] }
0x1006   :  { %v3563_v28 = vadd.f32 %v3562_v22, %v3561_v55 }
0x1007   :  { %v3936_v24 = vmax.f32 %v3923_v21, 1e-12  ;;  %vm3932_vm2 = vcmp.gt.f32.partialorder %v3923_v21, 0.0 }
0x1008   :  { %v3564_v8 = vrot.slane %v3563_v28, 4 }
0x1009   :  { %4831 = vrsqrt.f32 %v3936_v24  ;;  %vm3946_vm14 = vweird.f32 %v3936_v24 }
0x100a   :  { %v3565_v23 = vadd.f32 %v3564_v8, %v3563_v28  ;;  %v4512_v28 = vld [vmem:[%s8168_s9 + $0x58] sm:$0xff] }
0x100b   :  { %3896 = vmatpush.bf16.msra.mxu3 %v4512_v28 }
0x100c   :  { %v3566_v12 = vrot.slane %v3565_v23, 2  ;;  %v3924_v6 = vpop.f32.mrf.mxu0 }
0x100d   :  { %v8019_v49 = vadd.f32 %v4877_v34, %v3924_v6 }
0x100e   :  { %v3567_v44 = vadd.f32 %v3566_v12, %v3565_v23 }
0x100f   :  { %v4832_v58 = vpop.eup %4831  ;;  %v8022_v37 = vmax.f32 %v8019_v49, 1e-12  ;;  %vm3933_vm12 = vcmp.gt.f32.partialorder %v8019_v49, 0.0 }
0x1010   :  { %v3568_v54 = vrot.slane %v3567_v44, 1  ;;  %v3941_v0 = vmul.f32 %v4832_v58, %v3936_v24  ;;  %vm3947_vm15 = vweird.f32 %v4832_v58 }
0x1011   :  { %4833 = vrsqrt.f32 %v8022_v37  ;;  %vm3948_vm1 = vmor %vm3946_vm14, %vm3947_vm15  ;;  %vm3956_vm6 = vweird.f32 %v8022_v37 }
0x1012   :  { %v3569_v2 = vadd.f32 %v3568_v54, %v3567_v44  ;;  %v3942_v35 = vmul.f32 %v4832_v58, %v3941_v0  ;;  %v4511_v0 = vld [vmem:[%s8168_s9 + $0x50] sm:$0xff] }
0x1013   :  { %3897 = vmatpush.bf16.msra.mxu3 %v4511_v0 }
0x1014   :  { %v3570_v36 = vmul.f32 0.03125, %v3569_v2  ;;  %v3943_v47 = vmul.f32 0.5, %v3942_v35  ;;  %v3927_v4 = vpop.f32.mrf.mxu0 }
0x1015   :  { %v8028_v14 = vadd.f32 %v4878_v31, %v3927_v4 }
0x1016   :  { %v8030_v51 = vsub.f32 %v3549_v11, %v3570_v36  ;;  %v8032_v7 = vsub.f32 %v3550_v5, %v3570_v36  ;;  %v8034_v50 = vsub.f32 %v3551_v19, %v3570_v36  ;;  %v8036_v53 = vsub.f32 %v3552_v26, %v3570_v36 }
0x1017   :  { %v8038_v41 = vpop.eup %4833  ;;  %v3938_v15 = vmax.f32 %v8028_v14, 1e-12  ;;  %v3944_v56 = vsub.f32 1.5, %v3943_v47  ;;  %vm3934_vm9 = vcmp.gt.f32.partialorder %v8028_v14, 0.0 }
0x1018   :  { %v3575_v45 = vmul.f32 %v8030_v51, %v8030_v51  ;;  %v3576_v9 = vmul.f32 %v8032_v7, %v8032_v7  ;;  %v3577_v11 = vmul.f32 %v8034_v50, %v8034_v50  ;;  %v3578_v20 = vmul.f32 %v8036_v53, %v8036_v53 }
0x1019   :  { %4835 = vrsqrt.f32 %v3938_v15  ;;  %v3945_v5 = vmul.f32 %v4832_v58, %v3944_v56  ;;  %v3951_v40 = vmul.f32 %v8038_v41, %v8022_v37  ;;  %vm3966_vm0 = vweird.f32 %v3938_v15 }
0x101a   :  { %v3579_v19 = vsel %vm530_vm3, %v3575_v45, 0.0  ;;  %v3580_v60 = vsel %vm530_vm3, %v3576_v9, 0.0  ;;  %v3582_v55 = vsel %vm530_vm3, %v3577_v11, 0.0  ;;  %v3584_v48 = vsel %vm530_vm3, %v3578_v20, 0.0 }
0x101b   :  { %v3581_v42 = vadd.f32 %v3580_v60, %v3579_v19  ;;  %v3949_v30 = vsel %vm3948_vm1, %v4832_v58, %v3945_v5  ;;  %v3952_v21 = vmul.f32 %v8038_v41, %v3951_v40  ;;  %vm3957_vm11 = vweird.f32 %v8038_v41 }
0x101c   :  { %v3929_v17 = vpop.f32.mrf.mxu0  ;;  %v3980_v13 = vsel %vm3932_vm2, %v3949_v30, 0.0  ;;  %vm8070_vm4 = vmor %vm3956_vm6, %vm3957_vm11 }
0x101d   :  { %v3583_v26 = vadd.f32 %v3582_v55, %v3581_v42  ;;  %v3930_v22 = vadd.f32 %v4879_v10, %v3929_v17  ;;  %3986 = vperm.xlu2 %4517, %v3980_v13   ;;  %v3953_v34 = vmul.f32 0.5, %v3952_v21 }
0x101f   :  { %v4836_v24 = vpop.eup %4835  ;;  %v3585_v8 = vadd.f32 %v3584_v48, %v3583_v26  ;;  %v3939_v23 = vmax.f32 %v3930_v22, 1e-12  ;;  %v3954_v36 = vsub.f32 1.5, %v3953_v34  ;;  %vm3935_vm14 = vcmp.gt.f32.partialorder %v3930_v22, 0.0 }
0x1020   :  { %v3961_v12 = vmul.f32 %v4836_v24, %v3938_v15  ;;  %vm3967_vm7 = vweird.f32 %v4836_v24 }
0x1021   :  { %v3586_v6 = vrot.slane %v3585_v8, 4  ;;  %4837 = vrsqrt.f32 %v3939_v23  ;;  %vm3968_vm5 = vmor %vm3966_vm0, %vm3967_vm7  ;;  %v3955_v11 = vmul.f32 %v8038_v41, %v3954_v36  ;;  %vm3976_vm8 = vweird.f32 %v3939_v23  ;;  %v4880_v36 = vld [vmem:[%s8162_s3] sm:$0xff] }
0x1022   :  { %v3962_v44 = vmul.f32 %v4836_v24, %v3961_v12  ;;  %vm8475_vm0 = vcmask 523264  }
0x1023   :  { %v3587_v58 = vadd.f32 %v3586_v6, %v3585_v8  ;;  %v3959_v60 = vsel %vm8070_vm4, %v8038_v41, %v3955_v11  ;;  %vm8476_vm7 = vmmov %vm8475_vm0 }
0x1024   :  { %v3963_v54 = vmul.f32 0.5, %v3962_v44  ;;  %v3981_v55 = vsel %vm3933_vm12, %v3959_v60, 0.0 }
0x1025   :  { %v3588_v2 = vrot.slane %v3587_v58, 2  ;;  %4061 = vperm.xlu2 %4517, %v7902_v3  }
0x1026   :  { %v3964_v35 = vsub.f32 1.5, %v3963_v54 }
0x1027   :  { %v4838_v47 = vpop.eup %4837  ;;  %v3589_v4 = vadd.f32 %v3588_v2, %v3587_v58 }
0x1028   :  { %v3971_v31 = vmul.f32 %v4838_v47, %v3939_v23  ;;  %v3965_v15 = vmul.f32 %v4836_v24, %v3964_v35  ;;  %vm3977_vm10 = vweird.f32 %v4838_v47 }
0x1029   :  { %v3590_v56 = vrot.slane %v3589_v4, 1  ;;  %vm3978_vm13 = vmor %vm3976_vm8, %vm3977_vm10 }
0x102a   :  { %v3972_v45 = vmul.f32 %v4838_v47, %v3971_v31  ;;  %v3969_v9 = vsel %vm3968_vm5, %v4836_v24, %v3965_v15  ;;  %vm4179_vm5 = vcmask 25600  }
0x102b   :  { %v3591_v3 = vadd.f32 %v3590_v56, %v3589_v4  ;;  %v3982_v5 = vsel %vm3934_vm9, %v3969_v9, 0.0  ;;  %v4882_v4 = vld [vmem:[%s8162_s3 + $0x10] sm:$0xff] }
0x102c   :  { %v3973_v19 = vmul.f32 0.5, %v3972_v45  ;;  %3996 = vperm.xlu0 %4518, %v3982_v5  }
0x102d   :  { %v3592_v37 = vmul.f32 0.03125, %v3591_v3  ;;  %4056 = vperm.xlu2 %4517, %v7946_v59  }
0x102e   :  { %v3974_v14 = vsub.f32 1.5, %v3973_v19 }
0x102f   :  { %v3593_v40 = vmax.f32 %v3592_v37, 0.0 }
0x1030   :  { %v3975_v42 = vmul.f32 %v4838_v47, %v3974_v14 }
0x1031   :  { %v3594_v30 = vadd.f32 1e-05, %v3593_v40 }
0x1032   :  { %v3979_v17 = vsel %vm3978_vm13, %v4838_v47, %v3975_v42  ;;  %v4881_v47 = vld [vmem:[%s8162_s3 + $0x8] sm:$0xff] }
0x1033   :  { %4839 = vrsqrt.f32 %v3594_v30  ;;  %v3983_v13 = vsel %vm3935_vm14, %v3979_v17, 0.0  ;;  %vm3601_vm1 = vweird.f32 %v3594_v30 }
0x1034   :  { %4001 = vperm.xlu1 %4519, %v3983_v13   ;;  %3991 = vperm.xlu0 %4518, %v3981_v55  }
0x1039   :  { %v4840_v26 = vpop.eup %4839 }
0x103a   :  { %v3596_v59 = vmul.f32 %v4840_v26, %v3594_v30  ;;  %vm3602_vm15 = vweird.f32 %v4840_v26 }
0x103b   :  { %vm3603_vm2 = vmor %vm3601_vm1, %vm3602_vm15 }
0x103c   :  { %v3597_v10 = vmul.f32 %v4840_v26, %v3596_v59  ;;  %4071 = vperm.xlu1 %4519, %v7842_v57   ;;  %4076 = vperm.xlu0 %4518, %v7857_v43  }
0x103e   :  { %v3598_v49 = vmul.f32 0.5, %v3597_v10 }
0x1040   :  { %v3599_v41 = vsub.f32 1.5, %v3598_v49 }
0x1042   :  { %v3600_v48 = vmul.f32 %v4840_v26, %v3599_v41 }
0x1044   :  { %4066 = vperm.xlu1 %4519, %v7916_v18   ;;  %4051 = vperm.xlu0 %4518, %v7944_v27   ;;  %v3604_v22 = vsel %vm3603_vm2, %v4840_v26, %v3600_v48 }
0x1045   :  { %v3605_v21 = vmul.f32 %v3604_v22, %v8030_v51  ;;  %v3606_v28 = vmul.f32 %v3604_v22, %v8032_v7  ;;  %v3607_v24 = vmul.f32 %v3604_v22, %v8034_v50  ;;  %v3608_v57 = vmul.f32 %v3604_v22, %v8036_v53 }
0x1047   :  { %v3609_v43 = vmax.f32 %v3605_v21, 0.0  ;;  %v3610_v8 = vmax.f32 %v3606_v28, 0.0  ;;  %v3611_v23 = vmax.f32 %v3607_v24, 0.0  ;;  %v3612_v12 = vmax.f32 %v3608_v57, 0.0 }
0x1049   :  { %v3870_v6 = vpack.c.bf16 %v3610_v8, %v3609_v43  ;;  %v3871_v34 = vpack.c.bf16 %v3612_v12, %v3611_v23  ;;  %v4547_v43 = vld [vmem:[%s8169_s10 + $0x6] ss:$0 sm:$0xff] }
0x104b   :  { %4479 = vmatmul.msk.bf16.vlgmr.msra.gmra.mxu3 %vm530_vm3, %v3870_v6 }
0x104c   :  { %4041 = vperm.xlu1 %4519, %v7961_v1   ;;  %4046 = vperm.xlu0 %4518, %v7963_v38  }
0x105b   :  { %4480 = vmatmul.msk.bf16.gmra.mxu3 %vm530_vm3, %v3871_v34 }
0x1077   :  { %v3987_v0 = vpop.permute.xlu2 %3986 }
0x107f   :  { %v4062_v19 = vpop.permute.xlu2 %4061 }
0x109e   :  { %v8091_v51 = vpop.permute.xlu0 %3996 }
0x10a6   :  { %v8093_v50 = vpop.permute.xlu1 %4001  ;;  %v3992_v54 = vpop.permute.xlu0 %3991 }
0x10ae   :  { %v4077_v3 = vpop.permute.xlu0 %4076  ;;  %v4072_v5 = vpop.permute.xlu1 %4071 }
0x10b6   :  { %v4052_v37 = vpop.permute.xlu0 %4051  ;;  %v4067_v42 = vpop.permute.xlu1 %4066 }
0x10be   :  { %v4047_v10 = vpop.permute.xlu0 %4046  ;;  %v4042_v48 = vpop.permute.xlu1 %4041 }
0x10ce   :  { %v3899_v18 = vpop.f32.mrf.mxu3 }
0x10cf   :  { %v4004_v2 = vmul.f32 %v3987_v0, %v3899_v18 }
0x10d1   :  { %v4091_v28 = vmul.f32 %v4004_v2, %v5447_v52  ;;  %v4155_v52 = vld [vmem:[%s8165_s6 + $0x18] sm:$0xff] }
0x10d6   :  { %v3901_v27 = vpop.f32.mrf.mxu3 }
0x10d7   :  { %v4005_v1 = vmul.f32 %v3992_v54, %v3901_v27  ;;  %v4152_v27 = vld [vmem:[%s8165_s6] sm:$0xff] }
0x10d9   :  { %v4008_v35 = vpack.c.bf16 %v4005_v1, %v4004_v2  ;;  %v4092_v12 = vmul.f32 %v4005_v1, %v5441_v61  ;;  %v4153_v61 = vld [vmem:[%s8165_s6 + $0x8] sm:$0xff] }
0x10da   :  { %v4157_v1 = vpack.c.bf16 %v4153_v61, %v4152_v27 }
0x10de   :  { %v3904_v7 = vpop.f32.mrf.mxu3 }
0x10df   :  { %v8096_v44 = vmul.f32 %v8091_v51, %v3904_v7 }
0x10e6   :  { %v3906_v53 = vpop.f32.mrf.mxu3 }
0x10e7   :  { %v8099_v58 = vmul.f32 %v8093_v50, %v3906_v53 }
0x10e9   :  { %v4009_v38 = vpack.c.bf16 %v8099_v58, %v8096_v44 }
0x10eb   :  { %4016 = vmatpush.bf16.msrb.mxu3 %v4009_v38 }
0x10ef   :  { %4017 = vmatpush.bf16.msrb.mxu3 %v4008_v35 }
0x10f2   :  { %4483 = vmatmul.msk.bf16.vlgmr.msrb.gmra.mxu3 %vm530_vm3, %v4880_v36 }
0x1102   :  { %4484 = vmatmul.msk.bf16.gmra.mxu3 %vm530_vm3, %v4881_v47 }
0x1112   :  { %4485 = vmatmul.msk.bf16.gmra.mxu3 %vm530_vm3, %v4882_v4 }
0x1122   :  { %4486 = vmatmul.msk.bf16.gmra.mxu3 %vm530_vm3, %v7694_v46  ;;  %v4057_v46 = vpop.permute.xlu2 %4056 }
0x1175   :  { %v4019_v31 = vpop.f32.mrf.mxu3 }
0x1176   :  { %v4079_v22 = vmul.f32 %v4042_v48, %v4019_v31 }
0x117d   :  { %v4021_v15 = vpop.f32.mrf.mxu3 }
0x117e   :  { %v4080_v49 = vmul.f32 %v4047_v10, %v4021_v15  ;;  %v4094_v15 = vmul.f32 %v8099_v58, %v5480_v33 }
0x1180   :  { %v4087_v21 = vpack.c.bf16 %v4080_v49, %v4079_v22 }
0x1185   :  { %v4024_v56 = vpop.f32.mrf.mxu3 }
0x1186   :  { %v4081_v59 = vmul.f32 %v4052_v37, %v4024_v56 }
0x118d   :  { %v4026_v45 = vpop.f32.mrf.mxu3 }
0x118e   :  { %v4082_v13 = vmul.f32 %v4057_v46, %v4026_v45 }
0x1190   :  { %v4088_v41 = vpack.c.bf16 %v4082_v13, %v4081_v59 }
0x1195   :  { %v4029_v9 = vpop.f32.mrf.mxu3 }
0x1196   :  { %v4083_v17 = vmul.f32 %v4062_v19, %v4029_v9 }
0x119d   :  { %v4031_v11 = vpop.f32.mrf.mxu3 }
0x119e   :  { %v4084_v30 = vmul.f32 %v4067_v42, %v4031_v11 }
0x11a0   :  { %v4089_v26 = vpack.c.bf16 %v4084_v30, %v4083_v17 }
0x11a5   :  { %v4034_v20 = vpop.f32.mrf.mxu3 }
0x11a6   :  { %v4085_v60 = vmul.f32 %v4072_v5, %v4034_v20 }
0x11ad   :  { %v4036_v14 = vpop.f32.mrf.mxu3 }
0x11ae   :  { %v4086_v40 = vmul.f32 %v4077_v3, %v4036_v14 }
0x11b0   :  { %v4090_v55 = vpack.c.bf16 %v4086_v40, %v4085_v60 }
0x11b2   :  { %4099 = vmatpush.bf16.msrb.mxu2 %v4090_v55 }
0x11b6   :  { %4100 = vmatpush.bf16.msrb.mxu2 %v4089_v26 }
0x11ba   :  { %4101 = vmatpush.bf16.msrb.mxu2 %v4088_v41 }
0x11be   :  { %4102 = vmatpush.bf16.msrb.mxu2 %v4087_v21 }
0x11c1   :  { %4487 = vmatmul.msk.bf16.vlgmr.msrb.gmra.mxu2 %vm8475_vm0, %v7951_v39 }
0x11d1   :  { %4488 = vmatmul.msk.bf16.gmra.mxu2 %vm8476_vm7, %v7970_v63  ;;  %v4154_v63 = vld [vmem:[%s8165_s6 + $0x10] sm:$0xff] }
0x11d2   :  { %v4158_v53 = vpack.c.bf16 %v4155_v52, %v4154_v63 }
0x11d4   :  { %4172 = vmatpush.bf16.msrb.mxu1 %v4158_v53 }
0x11d8   :  { %4173 = vmatpush.bf16.msrb.mxu1 %v4157_v1 }
0x1244   :  { %v4104_v24 = vpop.f32.mrf.mxu2 }
0x1245   :  { %v4105_v57 = vadd.f32 %v4104_v24, %v4091_v28 }
0x1247   :  { %v4114_v8 = vmul.f32 %v4105_v57, %v3987_v0 }
0x1249   :  { %v4121_v23 = vadd.f32 %v4547_v43, %v4114_v8 }
0x124b   :  { %v4125_v6 = vadd.f32 %v4121_v23, %v7988_v62  ;;  %v4093_v62 = vmul.f32 %v8096_v44, %v5515_v25 }
0x124c   :  { %v4106_v34 = vpop.f32.mrf.mxu2 }
0x124d   :  { %v4107_v18 = vadd.f32 %v4106_v34, %v4092_v12  ;;  %v4129_v2 = vmax.f32 %v4125_v6, 0.0 }
0x124f   :  { %v4115_v39 = vmul.f32 %v4107_v18, %v3992_v54 }
0x1251   :  { %v4122_v7 = vadd.f32 %v4547_v43, %v4115_v39 }
0x1253   :  { %v4126_v54 = vadd.f32 %v4122_v7, %v7997_v29 }
0x1254   :  { %v4109_v38 = vpop.f32.mrf.mxu2 }
0x1255   :  { %v4110_v0 = vadd.f32 %v4109_v38, %v4093_v62  ;;  %v4130_v35 = vmax.f32 %v4126_v54, 0.0 }
0x1257   :  { %v4116_v36 = vmul.f32 %v4110_v0, %v8091_v51  ;;  %v4134_v47 = vpack.c.bf16 %v4130_v35, %v4129_v2  ;;  %v4133_v51 = vld [vmem:[%s8164_s5] sm:$0x1] }
0x1259   :  { %v4123_v4 = vadd.f32 %v4547_v43, %v4116_v36 }
0x125b   :  { %v4127_v31 = vadd.f32 %v4123_v4, %v8005_v32 }
0x125c   :  { %v4111_v56 = vpop.f32.mrf.mxu2 }
0x125d   :  { %v4112_v25 = vadd.f32 %v4111_v56, %v4094_v15  ;;  %v4131_v9 = vmax.f32 %v4127_v31, 0.0 }
0x125f   :  { %v4117_v29 = vmul.f32 %v4112_v25, %v8093_v50 }
0x1261   :  { %v4124_v44 = vadd.f32 %v4547_v43, %v4117_v29 }
0x1263   :  { %v4128_v45 = vadd.f32 %v4124_v44, %v8014_v16  ;;  %v4548_v16 = vld [vmem:[%s8166_s7] ss:$0 sm:$0xff] }
0x1265   :  { %v4132_v11 = vmax.f32 %v4128_v45, 0.0 }
0x1267   :  { %v4135_v3 = vpack.c.bf16 %v4132_v11, %v4131_v9 }
0x1269   :  { %4145 = vmatpush.bf16.msrb.mxu0 %v4135_v3 }
0x126d   :  { %4146 = vmatpush.bf16.msrb.mxu0 %v4134_v47 }
0x1270   :  { %4489 = vmatmul.msk.bf16.vlgmr.msrb.gmra.mxu0 %vm530_vm3, %v4133_v51 }
0x12ed   :  { %v4148_v32 = vpop.f32.mrf.mxu0 }
0x12ee   :  { %v4156_v33 = vpack.c.bf16 %v4148_v32, %v4148_v32 }
0x12f0   :  { %4490 = vmatmul.msk.bf16.vlgmr.msrb.gmra.mxu1 %vm530_vm3, %v4156_v33 }
0x12f5   :  { %v4150_v58 = vpop.f32.mrf.mxu0 }
0x136d   :  { %v4175_v50 = vpop.f32.mrf.mxu1 }
0x136e   :  { %v4176_v5 = vadd.f32 %v4548_v16, %v4175_v50 }
0x1370   :  { %4180 = vst.msk [vmem:[#allocation2] sm:$0x3] %vm4179_vm5, %v4176_v5 }
0x1371   :  { %4191 = dma.vmem_to_hbm [thread:$0]  %s4187_s26, 32, %s4189_s29, [#allocation3]  }
0x1375   :  { %v4177_v20 = vpop.f32.mrf.mxu1 }
0x1376   :  { %4907 = dma.done.wait [#allocation3], 32  }
0x1377   :  { %4908 = vsyncadd [#allocation3], 4294967264 }
0x1378   :  { %4196 = vsyncpa [#allocation3], 1 }

</bundles_post_ra>
